<compile_context>
chip_gen: v7x
topology: tpu7x:2x2x1
jax: 0.10.0
libtpu: 0.0.40
codegen_flags: <defaults>
</compile_context>

<pallas_src>
import functools

import jax
import jax.numpy as jnp
from jax.experimental import pallas as pl
from jax.experimental.pallas import tpu as pltpu

BN_EPS = 1e-5

_LO_TILE_CAP = 512          # matmul-pass Lo tile (MXU M tile)
_EW_TILE_CAP = 1024         # elementwise-pass Lo tile (amortizes per-grid-step overhead)
_VMEM_LIMIT = 48 * 1024 * 1024   # > 32 MiB scoped default, < v7x 64 MiB physical


def _cparams(*semantics):
    return pltpu.CompilerParams(dimension_semantics=semantics,
                                vmem_limit_bytes=_VMEM_LIMIT)


def _pick_tile(n, cap=_LO_TILE_CAP):
    """Largest Lo tile <= cap that divides n and is a multiple of 8 (else n itself)."""
    if n <= cap:
        return n
    for d in range(cap - cap % 8, 7, -8):
        if n % d == 0:
            return d
    return n   # no multiple-of-8 divisor: single (full) tile, still correct


# ---------------------------------------------------------------------------
# Window / phase preparation shared by conv and maxpool
# ---------------------------------------------------------------------------
def _prep_windows(x, *, ksize, stride, pad, Lo, tlo):
    """Pad + phase-split a (B, L, C) activation for K-tap sliding windows.

    Stride > 1 is handled by a phase split so every in-kernel row access stays
    contiguous.  Preferred ("halo") mode tiles each phase along L and adds an
    8-row-aligned halo block (the same buffer passed a second time with a shifted
    BlockSpec), so only O(tlo) rows are VMEM-resident per grid step and input
    DMA/compute pipelining is steady.  Falls back to a whole-phase resident block
    for awkward (non-multiple-of-8) Lo.  Returns (arrays, in_specs, mode, Q).
    """
    B, L, C = x.shape
    assert Lo % tlo == 0
    n_t = Lo // tlo
    Q = (ksize - 1) // stride                       # max per-phase row offset of a tap
    hblk = 8 * ((Q + 7) // 8) if Q > 0 else 0
    halo = (Lo % 8 == 0) and (tlo % 8 == 0) and (Q == 0 or tlo % hblk == 0)
    lph = n_t * tlo + hblk if halo else Lo + Q
    n_ph = min(stride, ksize)

    # Single jnp.pad: conv left pad plus enough right slack for phase split + halo.
    need = (lph - 1) * stride + n_ph if stride > 1 else lph
    rpad = max(pad, need - (L + pad))
    xp = jnp.pad(x, ((0, 0), (pad, rpad), (0, 0)))
    if stride == 1:
        ph = xp[None, :, :lph, :]
    else:
        ph = jnp.stack([xp[:, r::stride, :][:, :lph, :] for r in range(n_ph)], axis=0)

    if halo:
        arrays = [ph]
        specs = [pl.BlockSpec((n_ph, 1, tlo, C), lambda b, t: (0, b, t, 0))]
        if Q > 0:
            off = tlo // hblk
            specs.append(pl.BlockSpec((n_ph, 1, hblk, C),
                                      lambda b, t: (0, b, (t + 1) * off, 0)))
            arrays.append(ph)                       # same buffer, halo window
        return arrays, specs, "halo", Q
    return ([ph],
            [pl.BlockSpec((n_ph, 1, lph, C), lambda b, t: (0, b, 0, 0))],
            "resident", Q)


def _gather_taps(win_refs, *, ksize, stride, tlo, mode, Q):
    """Return the K shifted (tlo, C) tap views for the current grid step."""
    if mode == "halo":
        main_ref = win_refs[0]
        halo_ref = win_refs[1] if Q > 0 else None
        wins = []
        for r in range(min(stride, ksize)):
            w = main_ref[r, 0, :, :]
            if Q > 0:
                w = jnp.concatenate([w, halo_ref[r, 0, :, :]], axis=0)
            wins.append(w)
        return [wins[k % stride][k // stride:k // stride + tlo] for k in range(ksize)]
    # Fallback: whole-phase resident block, dynamic per-tap loads (rare path).
    (ph_ref,) = win_refs
    base = pl.program_id(1) * tlo
    return [ph_ref[k % stride, 0, pl.ds(base + k // stride, tlo), :]
            for k in range(ksize)]


# ---------------------------------------------------------------------------
# Pass 1: Conv1d (no bias) + per-channel BN statistics (sum, sum-of-squares)
# ---------------------------------------------------------------------------
def _conv_stats_kernel(*refs, ksize, stride, tlo, per_tap, mode, Q):
    nw = 2 if (mode == "halo" and Q > 0) else 1
    w_ref, y_ref, ssum_ref, ssq_ref = refs[nw:]
    taps = _gather_taps(refs[:nw], ksize=ksize, stride=stride, tlo=tlo, mode=mode, Q=Q)

    if per_tap and ksize > 1:
        # Large-Ci layers: K separate MXU dots accumulated in f32 (no im2col slab).
        acc = jnp.dot(taps[0], w_ref[0], preferred_element_type=jnp.float32)
        for k in range(1, ksize):
            acc = acc + jnp.dot(taps[k], w_ref[k], preferred_element_type=jnp.float32)
    else:
        # Small-Ci layers / 1x1 convs: one K*Ci-wide contraction.
        xcol = taps[0] if ksize == 1 else jnp.concatenate(taps, axis=-1)
        acc = jnp.dot(xcol, w_ref[...], preferred_element_type=jnp.float32)

    y_ref[0] = acc.astype(y_ref.dtype)

    # BN batch statistics, partially reduced to 8 sublanes -> unmasked (8, Co) RMW.
    co = acc.shape[-1]
    if tlo % 8 == 0:
        ps = jnp.sum(acc.reshape(tlo // 8, 8, co), axis=0)
        pq = jnp.sum((acc * acc).reshape(tlo // 8, 8, co), axis=0)
    else:
        z = jnp.zeros((7, co), jnp.float32)
        ps = jnp.concatenate([jnp.sum(acc, axis=0, keepdims=True), z], axis=0)
        pq = jnp.concatenate([jnp.sum(acc * acc, axis=0, keepdims=True), z], axis=0)

    @pl.when(pl.program_id(1) == 0)
    def _():
        ssum_ref[...] = jnp.zeros_like(ssum_ref)
        ssq_ref[...] = jnp.zeros_like(ssq_ref)

    ssum_ref[0] += ps
    ssq_ref[0] += pq


def conv1d_raw(x, w, *, stride=1, pad=None):
    """x: (B, L, Ci), w: (K, Ci, Co) f32.
    Returns (y bf16 (B, Lo, Co), ssum f32 (B, 8, Co), ssq f32 (B, 8, Co))."""
    B, L, Ci = x.shape
    K, _, Co = w.shape
    pad = (K // 2) if pad is None else pad
    Lo = (L + 2 * pad - K) // stride + 1
    tlo = _pick_tile(Lo)

    arrays, win_specs, mode, Q = _prep_windows(
        x.astype(jnp.bfloat16), ksize=K, stride=stride, pad=pad, Lo=Lo, tlo=tlo)

    per_tap = (Ci >= 128) and (K > 1)
    wb = (w if per_tap else w.reshape(K * Ci, Co)).astype(jnp.bfloat16)
    nwd = wb.ndim
    w_spec = pl.BlockSpec(wb.shape, lambda b, t: (0,) * nwd)     # resident weight

    kernel = functools.partial(_conv_stats_kernel, ksize=K, stride=stride, tlo=tlo,
                               per_tap=per_tap, mode=mode, Q=Q)
    # TODO(synk): v7x — emit per-(b,t) partial stats so both grid axes can be
    # "parallel" (2 TensorCores), and split Co for the deepest-stage weights.
    y, ssum, ssq = pl.pallas_call(
        kernel,
        grid=(B, Lo // tlo),
        in_specs=win_specs + [w_spec],
        out_specs=(
            pl.BlockSpec((1, tlo, Co), lambda b, t: (b, t, 0)),
            pl.BlockSpec((1, 8, Co), lambda b, t: (b, 0, 0)),    # stats accumulators
            pl.BlockSpec((1, 8, Co), lambda b, t: (b, 0, 0)),
        ),
        out_shape=(jax.ShapeDtypeStruct((B, Lo, Co), jnp.bfloat16),
                   jax.ShapeDtypeStruct((B, 8, Co), jnp.float32),
                   jax.ShapeDtypeStruct((B, 8, Co), jnp.float32)),
        compiler_params=_cparams("parallel", "arbitrary"),
    )(*arrays, wb)
    return y, ssum, ssq


def _bn_scale_shift(ssum, ssq, gamma, beta, count):
    """Per-channel BN scale/shift from the conv pass's partial sums (tiny XLA op).
    NOTE: biased variance E[x^2]-mean^2 in f32 (clamped at 0); conv inputs are
    BN-normalized so the cancellation risk flagged in review is mild."""
    s = jnp.sum(ssum, axis=(0, 1))
    q = jnp.sum(ssq, axis=(0, 1))
    mean = s / count
    var = jnp.maximum(q / count - mean * mean, 0.0)
    scale = gamma.astype(jnp.float32) * jax.lax.rsqrt(var + BN_EPS)
    shift = beta.astype(jnp.float32) - mean * scale
    co = scale.shape[0]
    return scale.reshape(1, co), shift.reshape(1, co)


# ---------------------------------------------------------------------------
# Pass 2: BN normalize + affine [+ fused residual-branch BN + add] [+ ReLU]
# ---------------------------------------------------------------------------
def _bn_act_kernel(y_ref, sc_ref, sh_ref, o_ref, *, relu):
    out = y_ref[0].astype(jnp.float32) * sc_ref[...] + sh_ref[...]
    if relu:
        out = jnp.maximum(out, 0.0)
    o_ref[0] = out.astype(o_ref.dtype)


def bn_act(y, scale, shift, *, relu):
    B, Lo, Co = y.shape
    tlo = _pick_tile(Lo, cap=_EW_TILE_CAP)
    return pl.pallas_call(
        functools.partial(_bn_act_kernel, relu=relu),
        grid=(B, Lo // tlo),
        in_specs=[pl.BlockSpec((1, tlo, Co), lambda b, t: (b, t, 0)),
                  pl.BlockSpec((1, Co), lambda b, t: (0, 0)),
                  pl.BlockSpec((1, Co), lambda b, t: (0, 0))],
        out_specs=pl.BlockSpec((1, tlo, Co), lambda b, t: (b, t, 0)),
        out_shape=jax.ShapeDtypeStruct((B, Lo, Co), jnp.bfloat16),
        compiler_params=_cparams("parallel", "parallel"),
    )(y, scale, shift)


def _bn_add_relu_kernel(y_ref, sc_ref, sh_ref, yr_ref, scr_ref, shr_ref, o_ref):
    out = (y_ref[0].astype(jnp.float32) * sc_ref[...] + sh_ref[...]
           + yr_ref[0].astype(jnp.float32) * scr_ref[...] + shr_ref[...])
    o_ref[0] = jnp.maximum(out, 0.0).astype(o_ref.dtype)


def _bn_add_relu_pool_kernel(y_ref, sc_ref, sh_ref, yr_ref, scr_ref, shr_ref,
                             o_ref, ps_ref):
    out = (y_ref[0].astype(jnp.float32) * sc_ref[...] + sh_ref[...]
           + yr_ref[0].astype(jnp.float32) * scr_ref[...] + shr_ref[...])
    out = jnp.maximum(out, 0.0)
    o_ref[0] = out.astype(o_ref.dtype)
    # Per-batch channel sums for AdaptiveAvgPool1d(1), accumulated on this pass so
    # the final activation never has to be re-read from HBM.
    tlo, co = out.shape
    if tlo % 8 == 0:
        ps = jnp.sum(out.reshape(tlo // 8, 8, co), axis=0)
    else:
        ps = jnp.concatenate([jnp.sum(out, axis=0, keepdims=True),
                              jnp.zeros((7, co), jnp.float32)], axis=0)

    @pl.when(pl.program_id(1) == 0)
    def _():
        ps_ref[...] = jnp.zeros_like(ps_ref)

    ps_ref[0] += ps


def bn_add_relu(y2, sc2, sh2, yd, scd, shd, *, pool=False):
    B, Lo, Co = y2.shape
    tlo = _pick_tile(Lo, cap=_EW_TILE_CAP)
    tile = pl.BlockSpec((1, tlo, Co), lambda b, t: (b, t, 0))
    vec = pl.BlockSpec((1, Co), lambda b, t: (0, 0))
    act = jax.ShapeDtypeStruct((B, Lo, Co), jnp.bfloat16)
    if pool:
        return pl.pallas_call(
            _bn_add_relu_pool_kernel,
            grid=(B, Lo // tlo),
            in_specs=[tile, vec, vec, tile, vec, vec],
            out_specs=(tile, pl.BlockSpec((1, 8, Co), lambda b, t: (b, 0, 0))),
            out_shape=(act, jax.ShapeDtypeStruct((B, 8, Co), jnp.float32)),
            compiler_params=_cparams("parallel", "arbitrary"),
        )(y2, sc2, sh2, yd, scd, shd)
    return pl.pallas_call(
        _bn_add_relu_kernel,
        grid=(B, Lo // tlo),
        in_specs=[tile, vec, vec, tile, vec, vec],
        out_specs=tile,
        out_shape=act,
        compiler_params=_cparams("parallel", "parallel"),
    )(y2, sc2, sh2, yd, scd, shd)


def conv_bn_act(x, w, gamma, beta, *, stride=1, pad=None, relu=False):
    y, ss, sq = conv1d_raw(x, w, stride=stride, pad=pad)
    sc, sh = _bn_scale_shift(ss, sq, gamma, beta, float(y.shape[0] * y.shape[1]))
    return bn_act(y, sc, sh, relu=relu)


# ---------------------------------------------------------------------------
# MaxPool1d (tiled, halo windows, taps as static slices)
# ---------------------------------------------------------------------------
def _maxpool_kernel(*refs, ksize, stride, tlo, mode, Q):
    nw = 2 if (mode == "halo" and Q > 0) else 1
    o_ref = refs[nw]
    taps = _gather_taps(refs[:nw], ksize=ksize, stride=stride, tlo=tlo, mode=mode, Q=Q)
    out = taps[0]
    for k in range(1, ksize):
        out = jnp.maximum(out, taps[k])
    o_ref[0] = out.astype(o_ref.dtype)


def maxpool1d(x, *, kernel_size, stride, pad):
    B, L, C = x.shape
    Lo = (L + 2 * pad - kernel_size) // stride + 1
    tlo = _pick_tile(Lo, cap=_EW_TILE_CAP)
    # Zero padding is exact here: the input is post-ReLU (>= 0), so a padded zero
    # never beats the window max (PyTorch pads with -inf).
    arrays, win_specs, mode, Q = _prep_windows(
        x, ksize=kernel_size, stride=stride, pad=pad, Lo=Lo, tlo=tlo)
    kernel = functools.partial(_maxpool_kernel, ksize=kernel_size, stride=stride,
                               tlo=tlo, mode=mode, Q=Q)
    # TODO(synk): fuse into the head's BN+ReLU epilogue to save one HBM round trip.
    return pl.pallas_call(
        kernel,
        grid=(B, Lo // tlo),
        in_specs=win_specs,
        out_specs=pl.BlockSpec((1, tlo, C), lambda b, t: (b, t, 0)),
        out_shape=jax.ShapeDtypeStruct((B, Lo, C), x.dtype),
        compiler_params=_cparams("parallel", "parallel"),
    )(*arrays)


# ---------------------------------------------------------------------------
# Final Linear (whole-batch single MXU dot; avgpool sums come from the last block)
# ---------------------------------------------------------------------------
def _fc_kernel(x_ref, w_ref, b_ref, o_ref):
    o_ref[...] = (jnp.dot(x_ref[...], w_ref[...], preferred_element_type=jnp.float32)
                  + b_ref[...])


def fc(x, w, b):
    B, C = x.shape
    F = w.shape[1]
    return pl.pallas_call(
        _fc_kernel,
        grid=(1,),
        in_specs=[pl.BlockSpec((B, C), lambda i: (0, 0)),
                  pl.BlockSpec((C, F), lambda i: (0, 0)),
                  pl.BlockSpec((1, F), lambda i: (0, 0))],
        out_specs=pl.BlockSpec((B, F), lambda i: (0, 0)),
        out_shape=jax.ShapeDtypeStruct((B, F), jnp.float32),
        compiler_params=_cparams("arbitrary"),
    )(x.astype(jnp.bfloat16), w.astype(jnp.bfloat16),
      b.reshape(1, F).astype(jnp.float32))


# ---------------------------------------------------------------------------
# R1DBlock / R1DNet assembly
# ---------------------------------------------------------------------------
def _conv_w(key, K, ci, co):
    std = (2.0 / (co * K)) ** 0.5     # kaiming-normal, fan_out, relu
    return jax.random.normal(key, (K, ci, co), jnp.float32) * std


def r1d_block_params(key, in_c, out_c, ksize):
    k1, k2, k3 = jax.random.split(key, 3)
    ones = jnp.ones((out_c,), jnp.float32)
    zeros = jnp.zeros((out_c,), jnp.float32)
    return {
        "conv1": _conv_w(k1, ksize, in_c, out_c), "bn1_g": ones, "bn1_b": zeros,
        "conv2": _conv_w(k2, ksize, out_c, out_c), "bn2_g": ones, "bn2_b": zeros,
        "convd": _conv_w(k3, 1, in_c, out_c), "bnd_g": ones, "bnd_b": zeros,
    }


def r1d_block_forward(p, x, stride, *, pool=False):
    # out = BN2(conv2(relu(BN1(conv1(x)))));  identity = BNd(convd(x));  relu(out+identity)
    h = conv_bn_act(x, p["conv1"], p["bn1_g"], p["bn1_b"], stride=stride, relu=True)
    y2, s2, q2 = conv1d_raw(h, p["conv2"], stride=1)
    yd, sd, qd = conv1d_raw(x, p["convd"], stride=stride, pad=0)
    B, lo2, _ = y2.shape
    sc2, sh2 = _bn_scale_shift(s2, q2, p["bn2_g"], p["bn2_b"], float(B * lo2))
    scd, shd = _bn_scale_shift(sd, qd, p["bnd_g"], p["bnd_b"], float(B * yd.shape[1]))
    # Both branch normalizations, residual add and final ReLU fused into one pass;
    # the last block additionally accumulates the avg-pool channel sums.
    return bn_add_relu(y2, sc2, sh2, yd, scd, shd, pool=pool)


def init_r1dnet_params(key, in_channel, mid_channel, feature_dim,
                       layers=None, kernel_size=7, stride=1):
    if isinstance(kernel_size, int):
        kernel_size = [kernel_size] * 4
    if isinstance(stride, int):
        stride = [stride] * 4
    if layers is None:
        layers = [2, 2, 2, 2]

    keys = jax.random.split(key, 6)
    params = {
        "head_conv": _conv_w(keys[0], 7, in_channel, mid_channel),
        "head_bn_g": jnp.ones((mid_channel,), jnp.float32),
        "head_bn_b": jnp.zeros((mid_channel,), jnp.float32),
    }

    chans = [mid_channel, mid_channel * 2, mid_channel * 4,
             mid_channel * 8, mid_channel * 16]
    params["layers"] = []
    for li in range(4):
        in_c, out_c = chans[li], chans[li + 1]
        bkeys = jax.random.split(keys[1 + li], layers[li] + 1)
        blocks = [r1d_block_params(bkeys[0], in_c, out_c, kernel_size[li])]
        for bi in range(layers[li]):
            blocks.append(r1d_block_params(bkeys[1 + bi], out_c, out_c, kernel_size[li]))
        params["layers"].append(blocks)

    fsize = mid_channel * 16
    # TODO(synk): PyTorch uses nn.init.orthogonal_ for the fc weight; a scaled-normal
    # init is used for these synthetic weights instead.
    params["fc_w"] = jax.random.normal(keys[5], (fsize, feature_dim), jnp.float32) / jnp.sqrt(fsize)
    params["fc_b"] = jnp.zeros((feature_dim,), jnp.float32)

    cfg = {"kernel_size": kernel_size, "stride": stride, "layers": layers}
    return params, cfg


def r1dnet_forward(params, cfg, x_ncl, final_fc=True):
    # x_ncl: (B, C, L) as in PyTorch; convert to channels-last (B, L, C).
    x = jnp.transpose(x_ncl, (0, 2, 1))
    # head: Conv1d(k=7, s=2, p=3) + BN + ReLU + MaxPool1d(k=7, s=2, p=3)
    x = conv_bn_act(x, params["head_conv"], params["head_bn_g"], params["head_bn_b"],
                    stride=2, pad=3, relu=True)
    x = maxpool1d(x, kernel_size=7, stride=2, pad=3)
    psum = None
    for li in range(4):
        s = cfg["stride"][li]
        blocks = params["layers"][li]
        for bi, bp in enumerate(blocks):
            is_last = final_fc and (li == 3) and (bi == len(blocks) - 1)
            out = r1d_block_forward(bp, x, stride=(s if bi == 0 else 1), pool=is_last)
            if is_last:
                x, psum = out
            else:
                x = out
    if final_fc:
        Lo = x.shape[1]
        pooled = jnp.sum(psum, axis=1) / float(Lo)            # (B, C) f32, tiny
        return fc(pooled, params["fc_w"], params["fc_b"])     # (B, feature_dim)
    return x
    # TODO(synk): BatchNorm running-stat updates (training-mode side effect) are not
    # reproduced; they do not affect the forward output.


# ---------------------------------------------------------------------------
# XLA reference for spot-checks
# ---------------------------------------------------------------------------
def _ref_conv_bn_act(x, w, gamma, beta, *, stride, pad, relu):
    y = jax.lax.conv_general_dilated(
        x, w, window_strides=(stride,), padding=[(pad, pad)],
        dimension_numbers=("NWC", "WIO", "NWC"))
    mean = jnp.mean(y, axis=(0, 1))
    var = jnp.mean(jnp.square(y - mean), axis=(0, 1))
    out = (y - mean) * jax.lax.rsqrt(var + BN_EPS) * gamma + beta
    return jnp.maximum(out, 0.0) if relu else out


if __name__ == "__main__":
    key = jax.random.PRNGKey(0)
    pkey, xkey, ckey = jax.random.split(key, 3)
    c1, c2, c3, c4 = jax.random.split(ckey, 4)

    # --- spot-check 1: strided conv + BN (phase split + halo, concat path) ---------
    xc = jax.random.normal(c1, (2, 2048, 8), jnp.float32)
    wc = jax.random.normal(c2, (7, 8, 16), jnp.float32) * 0.15
    gc = 1.0 + 0.1 * jax.random.normal(c3, (16,), jnp.float32)
    bc = 0.1 * jax.random.normal(c4, (16,), jnp.float32)
    got = conv_bn_act(xc, wc, gc, bc, stride=2, pad=3, relu=True)
    want = _ref_conv_bn_act(xc, wc, gc, bc, stride=2, pad=3, relu=True)
    assert got.shape == want.shape
    # NOTE: bf16 operands/activations -> ~1e-2-level deviation vs the f32 reference.
    assert float(jnp.max(jnp.abs(got.astype(jnp.float32) - want))) < 0.1, "conv+BN s=2"

    # --- spot-check 2: per-tap MXU accumulation path (Ci >= 128) --------------------
    xt = jax.random.normal(c2, (2, 256, 128), jnp.float32)
    wt = jax.random.normal(c3, (7, 128, 128), jnp.float32) * 0.05
    gt = 1.0 + 0.1 * jax.random.normal(c4, (128,), jnp.float32)
    bt = 0.1 * jax.random.normal(c1, (128,), jnp.float32)
    got = conv_bn_act(xt, wt, gt, bt, stride=1, pad=3, relu=False)
    want = _ref_conv_bn_act(xt, wt, gt, bt, stride=1, pad=3, relu=False)
    assert float(jnp.max(jnp.abs(got.astype(jnp.float32) - want))) < 0.1, "conv+BN per-tap"

    # --- spot-check 3: resident fallback path (Lo not a multiple of 8) -------------
    xo = jax.random.normal(c4, (1, 30, 8), jnp.float32)
    wo = jax.random.normal(c1, (7, 8, 16), jnp.float32) * 0.2
    g1 = jnp.ones((16,), jnp.float32)
    b0 = jnp.zeros((16,), jnp.float32)
    got = conv_bn_act(xo, wo, g1, b0, stride=1, pad=3, relu=True)
    want = _ref_conv_bn_act(xo, wo, g1, b0, stride=1, pad=3, relu=True)
    assert float(jnp.max(jnp.abs(got.astype(jnp.float32) - want))) < 0.1, "conv+BN fallback"

    # --- spot-check 4: maxpool (phase split + halo) vs reduce_window ----------------
    xm = jnp.maximum(jax.random.normal(c1, (2, 64, 8), jnp.float32), 0.0)
    got_mp = maxpool1d(xm, kernel_size=7, stride=2, pad=3)
    want_mp = jax.lax.reduce_window(xm, -jnp.inf, jax.lax.max,
                                    (1, 7, 1), (1, 2, 1),
                                    ((0, 0), (3, 3), (0, 0)))
    assert bool(jnp.allclose(got_mp, want_mp)), "maxpool mismatch"

    # --- full R1DNet forward at small shapes ----------------------------------------
    in_channel, mid_channel, feature_dim = 4, 4, 32
    layers = [1, 1, 1, 1]   # small config: 2 R1DBlocks per stage
    params, cfg = init_r1dnet_params(pkey, in_channel, mid_channel, feature_dim,
                                     layers=layers, kernel_size=7, stride=1)

    B, L = 2, 128
    x = jax.random.normal(xkey, (B, in_channel, L), jnp.float32)

    fwd = jax.jit(lambda p, xx: r1dnet_forward(p, cfg, xx))
    out = jax.block_until_ready(fwd(params, x))

    assert out.shape == (B, feature_dim), out.shape
    assert bool(jnp.all(jnp.isfinite(out)))
    print("KERNEL_OK")
</pallas_src>

<mosaic_0001>
module attributes {stable_mosaic.version = 11 : i64} {
  func.func @_conv_stats_kernel(%arg0: i32, %arg1: i32, %arg2: memref<2x1x512x8xbf16, #tpu.memory_space<vmem>>, %arg3: memref<2x1x8x8xbf16, #tpu.memory_space<vmem>>, %arg4: memref<56x16xbf16, #tpu.memory_space<vmem>>, %arg5: memref<1x512x16xbf16, #tpu.memory_space<vmem>>, %arg6: memref<1x8x16xf32, #tpu.memory_space<vmem>>, %arg7: memref<1x8x16xf32, #tpu.memory_space<vmem>>) attributes {dimension_semantics = [#tpu.dimension_semantics<parallel>, #tpu.dimension_semantics<arbitrary>], iteration_bounds = array<i64: 2, 2>, scalar_prefetch = 0 : i64, scratch_operands = 0 : i64, tpu.core_type = #tpu.core_type<tc>, window_params = [{transform_indices = @transform_0, window_bounds = array<i64: 2, 1, 512, 8>}, {transform_indices = @transform_1, window_bounds = array<i64: 2, 1, 8, 8>}, {pipeline_mode = #tpu.pipeline_mode<synchronous>, transform_indices = @transform_2, window_bounds = array<i64: 56, 16>}, {transform_indices = @transform_3, window_bounds = array<i64: 1, 512, 16>}, {transform_indices = @transform_4, window_bounds = array<i64: 1, 8, 16>}, {transform_indices = @transform_5, window_bounds = array<i64: 1, 8, 16>}]} {
    %c0 = arith.constant 0 : index
    %c0_0 = arith.constant 0 : index
    %c0_1 = arith.constant 0 : index
    %c0_2 = arith.constant 0 : index
    %0 = vector.load %arg2[%c0, %c0_0, %c0_1, %c0_2] : memref<2x1x512x8xbf16, #tpu.memory_space<vmem>>, vector<1x1x512x8xbf16>
    %1 = vector.shape_cast %0 : vector<1x1x512x8xbf16> to vector<512x8xbf16>
    %c0_3 = arith.constant 0 : index
    %c0_4 = arith.constant 0 : index
    %c0_5 = arith.constant 0 : index
    %c0_6 = arith.constant 0 : index
    %2 = vector.load %arg3[%c0_3, %c0_4, %c0_5, %c0_6] : memref<2x1x8x8xbf16, #tpu.memory_space<vmem>>, vector<1x1x8x8xbf16>
    %3 = vector.shape_cast %2 : vector<1x1x8x8xbf16> to vector<8x8xbf16>
    %4 = tpu.concatenate %1, %3 in 0 : vector<512x8xbf16>, vector<8x8xbf16> -> vector<520x8xbf16>
    %c1 = arith.constant 1 : index
    %c0_7 = arith.constant 0 : index
    %c0_8 = arith.constant 0 : index
    %c0_9 = arith.constant 0 : index
    %5 = vector.load %arg2[%c1, %c0_7, %c0_8, %c0_9] : memref<2x1x512x8xbf16, #tpu.memory_space<vmem>>, vector<1x1x512x8xbf16>
    %6 = vector.shape_cast %5 : vector<1x1x512x8xbf16> to vector<512x8xbf16>
    %c1_10 = arith.constant 1 : index
    %c0_11 = arith.constant 0 : index
    %c0_12 = arith.constant 0 : index
    %c0_13 = arith.constant 0 : index
    %7 = vector.load %arg3[%c1_10, %c0_11, %c0_12, %c0_13] : memref<2x1x8x8xbf16, #tpu.memory_space<vmem>>, vector<1x1x8x8xbf16>
    %8 = vector.shape_cast %7 : vector<1x1x8x8xbf16> to vector<8x8xbf16>
    %9 = tpu.concatenate %6, %8 in 0 : vector<512x8xbf16>, vector<8x8xbf16> -> vector<520x8xbf16>
    %10 = vector.extract_strided_slice %4 {offsets = [0, 0], sizes = [512, 8], strides = [1, 1]} : vector<520x8xbf16> to vector<512x8xbf16>
    %11 = vector.extract_strided_slice %9 {offsets = [0, 0], sizes = [512, 8], strides = [1, 1]} : vector<520x8xbf16> to vector<512x8xbf16>
    %12 = vector.extract_strided_slice %4 {offsets = [1, 0], sizes = [512, 8], strides = [1, 1]} : vector<520x8xbf16> to vector<512x8xbf16>
    %13 = vector.extract_strided_slice %9 {offsets = [1, 0], sizes = [512, 8], strides = [1, 1]} : vector<520x8xbf16> to vector<512x8xbf16>
    %14 = vector.extract_strided_slice %4 {offsets = [2, 0], sizes = [512, 8], strides = [1, 1]} : vector<520x8xbf16> to vector<512x8xbf16>
    %15 = vector.extract_strided_slice %9 {offsets = [2, 0], sizes = [512, 8], strides = [1, 1]} : vector<520x8xbf16> to vector<512x8xbf16>
    %16 = vector.extract_strided_slice %4 {offsets = [3, 0], sizes = [512, 8], strides = [1, 1]} : vector<520x8xbf16> to vector<512x8xbf16>
    %17 = tpu.concatenate %10, %11, %12, %13, %14, %15, %16 in 1 : vector<512x8xbf16>, vector<512x8xbf16>, vector<512x8xbf16>, vector<512x8xbf16>, vector<512x8xbf16>, vector<512x8xbf16>, vector<512x8xbf16> -> vector<512x56xbf16>
    %c0_14 = arith.constant 0 : index
    %c0_15 = arith.constant 0 : index
    %18 = vector.load %arg4[%c0_14, %c0_15] : memref<56x16xbf16, #tpu.memory_space<vmem>>, vector<56x16xbf16>
    %cst = arith.constant dense<0.000000e+00> : vector<512x16xf32>
    %19 = tpu.matmul %17, %18, %cst {dimension_numbers = #tpu.dot_dimension_numbers<[1], [0], [0], [1], [0, 0, 1, 1], [], []>} : vector<512x56xbf16>, vector<56x16xbf16>, vector<512x16xf32> -> vector<512x16xf32>
    %20 = arith.truncf %19 : vector<512x16xf32> to vector<512x16xbf16>
    %c0_16 = arith.constant 0 : index
    %c0_17 = arith.constant 0 : index
    %c0_18 = arith.constant 0 : index
    %21 = vector.load %arg5[%c0_16, %c0_17, %c0_18] : memref<1x512x16xbf16, #tpu.memory_space<vmem>>, vector<1x512x16xbf16>
    %22 = vector.shape_cast %21 : vector<1x512x16xbf16> to vector<512x16xbf16>
    %23 = vector.shape_cast %20 : vector<512x16xbf16> to vector<1x512x16xbf16>
    tpu.vector_store %arg5[%c0_16, %c0_17, %c0_18], %23 {strides = array<i32>} : memref<1x512x16xbf16, #tpu.memory_space<vmem>>, vector<1x512x16xbf16>,
    %24 = vector.shape_cast %19 : vector<512x16xf32> to vector<64x8x16xf32>
    %cst_19 = arith.constant dense<0.000000e+00> : vector<8x16xf32>
    %25 = vector.multi_reduction <add>, %24, %cst_19 [0] : vector<64x8x16xf32> to vector<8x16xf32>
    %26 = arith.mulf %19, %19 : vector<512x16xf32>
    %27 = vector.shape_cast %26 : vector<512x16xf32> to vector<64x8x16xf32>
    %cst_20 = arith.constant dense<0.000000e+00> : vector<8x16xf32>
    %28 = vector.multi_reduction <add>, %27, %cst_20 [0] : vector<64x8x16xf32> to vector<8x16xf32>
    %c0_i32 = arith.constant 0 : i32
    %29 = arith.cmpi eq, %arg1, %c0_i32 : i32
    %30 = arith.extui %29 : i1 to i32
    %c0_i32_21 = arith.constant 0 : i32
    %31 = arith.cmpi ne, %30, %c0_i32_21 : i32
    scf.if %31 {
      %cst_34 = arith.constant 0.000000e+00 : f32
      %44 = vector.broadcast %cst_34 : f32 to vector<1x8x16xf32>
      %c0_35 = arith.constant 0 : index
      %c0_36 = arith.constant 0 : index
      %c0_37 = arith.constant 0 : index
      %45 = vector.load %arg6[%c0_35, %c0_36, %c0_37] : memref<1x8x16xf32, #tpu.memory_space<vmem>>, vector<1x8x16xf32>
      tpu.vector_store %arg6[%c0_35, %c0_36, %c0_37], %44 {strides = array<i32>} : memref<1x8x16xf32, #tpu.memory_space<vmem>>, vector<1x8x16xf32>,
      %cst_38 = arith.constant 0.000000e+00 : f32
      %46 = vector.broadcast %cst_38 : f32 to vector<1x8x16xf32>
      %c0_39 = arith.constant 0 : index
      %c0_40 = arith.constant 0 : index
      %c0_41 = arith.constant 0 : index
      %47 = vector.load %arg7[%c0_39, %c0_40, %c0_41] : memref<1x8x16xf32, #tpu.memory_space<vmem>>, vector<1x8x16xf32>
      tpu.vector_store %arg7[%c0_39, %c0_40, %c0_41], %46 {strides = array<i32>} : memref<1x8x16xf32, #tpu.memory_space<vmem>>, vector<1x8x16xf32>,
    } else {
    }
    %c0_22 = arith.constant 0 : index
    %c0_23 = arith.constant 0 : index
    %c0_24 = arith.constant 0 : index
    %32 = vector.load %arg6[%c0_22, %c0_23, %c0_24] : memref<1x8x16xf32, #tpu.memory_space<vmem>>, vector<1x8x16xf32>
    %33 = vector.shape_cast %32 : vector<1x8x16xf32> to vector<8x16xf32>
    %34 = arith.addf %33, %25 : vector<8x16xf32>
    %c0_25 = arith.constant 0 : index
    %c0_26 = arith.constant 0 : index
    %c0_27 = arith.constant 0 : index
    %35 = vector.load %arg6[%c0_25, %c0_26, %c0_27] : memref<1x8x16xf32, #tpu.memory_space<vmem>>, vector<1x8x16xf32>
    %36 = vector.shape_cast %35 : vector<1x8x16xf32> to vector<8x16xf32>
    %37 = vector.shape_cast %34 : vector<8x16xf32> to vector<1x8x16xf32>
    tpu.vector_store %arg6[%c0_25, %c0_26, %c0_27], %37 {strides = array<i32>} : memref<1x8x16xf32, #tpu.memory_space<vmem>>, vector<1x8x16xf32>,
    %c0_28 = arith.constant 0 : index
    %c0_29 = arith.constant 0 : index
    %c0_30 = arith.constant 0 : index
    %38 = vector.load %arg7[%c0_28, %c0_29, %c0_30] : memref<1x8x16xf32, #tpu.memory_space<vmem>>, vector<1x8x16xf32>
    %39 = vector.shape_cast %38 : vector<1x8x16xf32> to vector<8x16xf32>
    %40 = arith.addf %39, %28 : vector<8x16xf32>
    %c0_31 = arith.constant 0 : index
    %c0_32 = arith.constant 0 : index
    %c0_33 = arith.constant 0 : index
    %41 = vector.load %arg7[%c0_31, %c0_32, %c0_33] : memref<1x8x16xf32, #tpu.memory_space<vmem>>, vector<1x8x16xf32>
    %42 = vector.shape_cast %41 : vector<1x8x16xf32> to vector<8x16xf32>
    %43 = vector.shape_cast %40 : vector<8x16xf32> to vector<1x8x16xf32>
    tpu.vector_store %arg7[%c0_31, %c0_32, %c0_33], %43 {strides = array<i32>} : memref<1x8x16xf32, #tpu.memory_space<vmem>>, vector<1x8x16xf32>,
    return
  }
  func.func @transform_0(%arg0: i32, %arg1: i32) -> (i32, i32, i32, i32) {
    %c0_i32 = arith.constant 0 : i32
    %c0_i32_0 = arith.constant 0 : i32
    %c0_i32_1 = arith.constant 0 : i32
    return %c0_i32, %arg0, %arg1, %c0_i32_0 : i32, i32, i32, i32
  }
  func.func @transform_1(%arg0: i32, %arg1: i32) -> (i32, i32, i32, i32) {
    %c1_i32 = arith.constant 1 : i32
    %0 = arith.addi %arg1, %c1_i32 : i32
    %c64_i32 = arith.constant 64 : i32
    %1 = arith.muli %0, %c64_i32 : i32
    %c0_i32 = arith.constant 0 : i32
    %c0_i32_0 = arith.constant 0 : i32
    %c0_i32_1 = arith.constant 0 : i32
    return %c0_i32, %arg0, %1, %c0_i32_0 : i32, i32, i32, i32
  }
  func.func @transform_2(%arg0: i32, %arg1: i32) -> (i32, i32) {
    %c0_i32 = arith.constant 0 : i32
    %c0_i32_0 = arith.constant 0 : i32
    %c0_i32_1 = arith.constant 0 : i32
    return %c0_i32, %c0_i32_0 : i32, i32
  }
  func.func @transform_3(%arg0: i32, %arg1: i32) -> (i32, i32, i32) {
    %c0_i32 = arith.constant 0 : i32
    %c0_i32_0 = arith.constant 0 : i32
    return %arg0, %arg1, %c0_i32 : i32, i32, i32
  }
  func.func @transform_4(%arg0: i32, %arg1: i32) -> (i32, i32, i32) {
    %c0_i32 = arith.constant 0 : i32
    %c0_i32_0 = arith.constant 0 : i32
    %c0_i32_1 = arith.constant 0 : i32
    return %arg0, %c0_i32, %c0_i32_0 : i32, i32, i32
  }
  func.func @transform_5(%arg0: i32, %arg1: i32) -> (i32, i32, i32) {
    %c0_i32 = arith.constant 0 : i32
    %c0_i32_0 = arith.constant 0 : i32
    %c0_i32_1 = arith.constant 0 : i32
    return %arg0, %c0_i32, %c0_i32_0 : i32, i32, i32
  }
}

</mosaic_0001>

<bundles_post_ra>
// kernel: tpu_custom_call.1
= control target key start
LH: loop header
LB: loop body
LE: loop exit
PB: predicated region body
PF: predicated region fallthrough
CT: control target
= control target key end

     0   :  { %s6955_s0 = inlined_call_operand.vmem [shape: bf16[2,2,1032,8], index: 0, kind: input, shape index: {}]   ;;  %s6956_s1 = inlined_call_operand.vmem [shape: bf16[2,2,1032,8], index: 1, kind: input, shape index: {}]   ;;  %s6957_s2 = inlined_call_operand.vmem [shape: bf16[56,16], index: 2, kind: input, shape index: {}]   ;;  %s6958_s3 = inlined_call_operand.vmem [shape: bf16[2,1024,16], index: 3, kind: output, shape index: {0}]   ;;  %s6959_s4 = inlined_call_operand.hbm [shape: f32[2,8,16], index: 4, kind: output, shape index: {1}]   ;;  %s6960_s5 = inlined_call_operand.hbm [shape: f32[2,8,16], index: 5, kind: output, shape index: {2}]  }
   0x1   :  { %6968 = sst [smem:[#allocation18_spill]] %s6955_s0 }
   0x2   :  { %6969 = sst [smem:[#allocation19_spill]] %s6958_s3 }
   0x3   :  { %6970 = sst [smem:[#allocation20_spill]] %s6959_s4 }
   0x4   :  { %6971 = sst [smem:[#allocation21_spill]] %s6960_s5 }
   0x5   :  { %11 = vsyncpa [#allocation5], 0 }
   0x6   :  { %13 = vsyncpa [#allocation5 + $0x1], 0 }
   0x7   :  { %14 = vsyncpa [#allocation7], 0 }
   0x8   :  { %16 = vsyncpa [#allocation7 + $0x1], 0  ;;  %s5050_s18 = smov 0   ;;  %s5052_s19 = smov 0  }
   0x9   :  { %s5054_s20 = smov 0   ;;  %s5056_s21 = smov 0  }
   0xa   :  { %s5058_s22 = smov 0   ;;  %s5060_s23 = smov 0  }
   0xb   :  { %s5062_s24 = smov 0   ;;  %s5064_s25 = smov 0  }
   0xc   :  { %s5066_s26 = smov 0   ;;  %s5068_s27 = smov 0  }
   0xd   :  { %s5070_s28 = smov 0   ;;  %s5072_s29 = smov 0  }
   0xe LB: > { %6972 = sst [smem:[#allocation10_spill]] %s4957_s20  ;;  %s31_s7 = sadd.s32 1, %s4985_s27  ;;  %s4993_s29 = sphi %s5072_s29, %s22_s29   ;;  %s4989_s28 = sphi %s5070_s28, %s7009_s28   ;;  %s4985_s27 = sphi %s5068_s27, %s7008_s27   ;;  %s4981_s26 = sphi %s5066_s26, %s7007_s26   ;;  %s4977_s25 = sphi %s5064_s25, %s7000_s25   ;;  %s4973_s24 = sphi %s5062_s24, %s6999_s24   ;;  %s4969_s23 = sphi %s5060_s23, %s6998_s23   ;;  %s4965_s22 = sphi %s5058_s22, %s7006_s22   ;;  %s4961_s21 = sphi %s5056_s21, %s7005_s21   ;;  %s4957_s20 = sphi %s5054_s20, %s6996_s20   ;;  %s4953_s19 = sphi %s5052_s19, %s7004_s19   ;;  %s4949_s18 = sphi %s5050_s18, %s7003_s18  }
   0xf   : > { %6973 = sst [smem:[#allocation11_spill]] %s4973_s24  ;;  %s34_s8 = sadd.s32 1, %s4989_s28 }
  0x10   : > { %6974 = sst [smem:[#allocation12_spill]] %s4985_s27  ;;  %p32_p0 = scmp.ge.s32.totalorder %s31_s7, 2 }
  0x11   : > { %s43_s9 = sadd.s32 1, %s4973_s24  ;;  %p50_p1 = scmp.ne.s32.totalorder %s4973_s24, %s4969_s23 }
  0x12   : > { %p51_p2 = scmp.eq.s32.totalorder %s4993_s29, 0  ;;  %s7011_s7 = smov (%p32_p0, %s31_s7), 0 }
  0x13   : > { %6975 = sst [smem:[#allocation13_spill]] %s7011_s7  ;;  %s7013_s8 = smov (!%p32_p0, %s34_s8), %s4989_s28 }
  0x14   : > { %s39_s10 = ssub.s32 %s4985_s27, %s7011_s7  ;;  %p5125_p3 = por %p51_p2, %p50_p1 }
  0x15   : > { %p36_p4 = scmp.ge.s32.totalorder %s7013_s8, 2  ;;  %s5130_s12 = sshll.u32 %s4985_s27, 6 }
  0x16   : > { %s4357_s13 = sadd.s32 64, %s5130_s12  ;;  %s4358_s14 = sshll.u32 %s7011_s7, 6 }
  0x17   : > { %s7015_s8 = smov (%p36_p4, %s7013_s8), 0  ;;  %s4359_s15 = sadd.s32 64, %s4358_s14 }
  0x18   : > { %6977 = sst [smem:[#allocation14_spill]] %s7015_s8  ;;  %s75_s16 = sadd.s32 1, %s4965_s22 }
  0x19   : > { %s38_s17 = ssub.s32 %s4989_s28, %s7015_s8  ;;  %s71_s6 = ssub.s32 %s4357_s13, %s4359_s15 }
  0x1a   : > { %s40_s30 = sor.u32 %s39_s10, %s38_s17  ;;  %s72_s27 = sor.u32 %s71_s6, %s38_s17 }
  0x1b   : > { %p41_p5 = scmp.eq.s32.totalorder %s40_s30, 0  ;;  %p73_p6 = scmp.eq.s32.totalorder %s72_s27, 0 }
  0x1c   : > { %p82_p7 = scmp.ne.s32.totalorder %s4965_s22, %s4961_s21  ;;  %p148_p8 = scmp.eq.s32.totalorder %s38_s17, 0 }
  0x1d   : > { %s5142_s7 = scalar_select %p41_p5, %s4973_s24, %s43_s9  }
  0x1e   : > { %s5145_s5 = scalar_select %p73_p6, %s4965_s22, %s75_s16  }
  0x1f   : > { %6978 = sst [smem:[#allocation15_spill]] %s5142_s7  ;;  %p5149_p9 = por %p82_p7, %p51_p2 }
  0x20   : > { %6979 = sst [smem:[#allocation16_spill]] %s5145_s5  ;;  %s150_s4 = sadd.s32 1, %s4957_s20 }
  0x21   : > { %s5155_s3 = scalar_select %p148_p8, %s4957_s20, %s150_s4  }
  0x22   : > { %p160_p10 = scmp.ne.s32.totalorder %s4957_s20, %s4953_s19  ;;  %s6982_s13 = sadd.s32 4294967295, %s4993_s29  }
  0x23   : > { %6981 = sst [smem:[#allocation17_spill]] %s5155_s3  ;;  %p161_p11 = scmp.eq.s32.totalorder %s6982_s13, 3 }
  0x24   : > { %p166_p12 = scmp.ne.s32.totalorder %s4953_s19, %s4949_s18  ;;  %s6983_s30 = sadd.s32 4294967294, %s4993_s29  }
  0x25   : > { %p167_p13 = scmp.eq.s32.totalorder %s6983_s30, 3  ;;  %p5165_p0 = por %p161_p11, %p160_p10 }
  0x26   : > { %p4091_p2 = scmp.ge.s32.totalorder %s4993_s29, 4 }
  0x27   : > { %p5169_p1 = por %p167_p13, %p166_p12 }
  0x28   : > { %212 = sbr.rel (%p4091_p2) target bundleno = 119 (0x77), region = 20 }
  0x2f   : > { %215 = sbr.rel (!%p5125_p3) target bundleno = 111 (0x6f), region = 24  ;;  %s217_s4 = sand.u32 (%p5125_p3), 1, %s4973_s24  }
  0x30   : > { %s5177_s9 = sshll.u32 (%p5125_p3), %s217_s4, 9  ;;  %s4544_s10 = smul.u32 (%p5125_p3), 129, %s4989_s28 }
  0x31   : > { %s6986_s0 = sld [smem:[#allocation18_spill]] (%p5125_p3)  ;;  %s219_s8 = scalar_lea.vmem (%p5125_p3), [#allocation2], %s5177_s9  }
  0x32   : > { %s227_s15 = sadd.s32 (%p5125_p3), %s4544_s10, %s5130_s12  ;;  %s6987_s11 = smov (%p5125_p3), %s219_s8 }
  0x33   : > { %s4096_s16 = sshll.u32 (%p5125_p3), %s227_s15, 2  ;;  %s5194_s24 = smov (%p5125_p3), 0  }
  0x34   : > { %s5196_s4 = smov (%p5125_p3), 0  }
  0x37   : > { %s5184_s30 = scalar_lea.vmem %s6986_s0, %s4096_s16  }
  0x38   : > { %s6988_s7 = smov %s5184_s30 }
  0x39 LB: >> { %v248_v0 = vld [vmem:[%s5001_s7] sm:$0xf]  ;;  %v250_v1 = vld [vmem:[%s5001_s7 + $0x4] sm:$0xf]  ;;  %v252_v2 = vld [vmem:[%s5001_s7 + $0x8] sm:$0xf]  ;;  %s5009_s4 = sphi %s5196_s4, %s242_s4   ;;  %s5005_s24 = sphi %s5194_s24, %s6989_s24   ;;  %s5001_s7 = sphi %s6988_s7, %s381_s7   ;;  %s4997_s11 = sphi %s6987_s11, %s382_s11  }
  0x3a   : >> { %249 = vst [vmem:[%s4997_s11] sm:$0xf] %v248_v0  ;;  %251 = vst [vmem:[%s4997_s11 + $0x4] sm:$0xf] %v250_v1  ;;  %v254_v3 = vld [vmem:[%s5001_s7 + $0xc] sm:$0xf]  ;;  %s376_s10 = sadd.s32 1, %s5005_s24 }
  0x3b   : >> { %253 = vst [vmem:[%s4997_s11 + $0x8] sm:$0xf] %v252_v2  ;;  %v256_v4 = vld [vmem:[%s5001_s7 + $0x10] sm:$0xf]  ;;  %v258_v5 = vld [vmem:[%s5001_s7 + $0x14] sm:$0xf] }
  0x3c   : >> { %255 = vst [vmem:[%s4997_s11 + $0xc] sm:$0xf] %v254_v3  ;;  %257 = vst [vmem:[%s4997_s11 + $0x10] sm:$0xf] %v256_v4  ;;  %v260_v6 = vld [vmem:[%s5001_s7 + $0x18] sm:$0xf] }
  0x3d   : >> { %259 = vst [vmem:[%s4997_s11 + $0x14] sm:$0xf] %v258_v5  ;;  %v262_v7 = vld [vmem:[%s5001_s7 + $0x1c] sm:$0xf]  ;;  %v264_v8 = vld [vmem:[%s5001_s7 + $0x20] sm:$0xf] }
  0x3e   : >> { %261 = vst [vmem:[%s4997_s11 + $0x18] sm:$0xf] %v260_v6  ;;  %263 = vst [vmem:[%s4997_s11 + $0x1c] sm:$0xf] %v262_v7  ;;  %v266_v9 = vld [vmem:[%s5001_s7 + $0x24] sm:$0xf] }
  0x3f   : >> { %265 = vst [vmem:[%s4997_s11 + $0x20] sm:$0xf] %v264_v8  ;;  %v268_v10 = vld [vmem:[%s5001_s7 + $0x28] sm:$0xf]  ;;  %v270_v11 = vld [vmem:[%s5001_s7 + $0x2c] sm:$0xf] }
  0x40   : >> { %267 = vst [vmem:[%s4997_s11 + $0x24] sm:$0xf] %v266_v9  ;;  %269 = vst [vmem:[%s4997_s11 + $0x28] sm:$0xf] %v268_v10  ;;  %v272_v12 = vld [vmem:[%s5001_s7 + $0x30] sm:$0xf] }
  0x41   : >> { %271 = vst [vmem:[%s4997_s11 + $0x2c] sm:$0xf] %v270_v11  ;;  %v274_v13 = vld [vmem:[%s5001_s7 + $0x34] sm:$0xf]  ;;  %v276_v14 = vld [vmem:[%s5001_s7 + $0x38] sm:$0xf] }
  0x42   : >> { %273 = vst [vmem:[%s4997_s11 + $0x30] sm:$0xf] %v272_v12  ;;  %275 = vst [vmem:[%s4997_s11 + $0x34] sm:$0xf] %v274_v13  ;;  %v278_v15 = vld [vmem:[%s5001_s7 + $0x3c] sm:$0xf] }
  0x43   : >> { %277 = vst [vmem:[%s4997_s11 + $0x38] sm:$0xf] %v276_v14  ;;  %v280_v16 = vld [vmem:[%s5001_s7 + $0x40] sm:$0xf]  ;;  %v282_v17 = vld [vmem:[%s5001_s7 + $0x44] sm:$0xf] }
  0x44   : >> { %279 = vst [vmem:[%s4997_s11 + $0x3c] sm:$0xf] %v278_v15  ;;  %281 = vst [vmem:[%s4997_s11 + $0x40] sm:$0xf] %v280_v16  ;;  %v284_v18 = vld [vmem:[%s5001_s7 + $0x48] sm:$0xf] }
  0x45   : >> { %283 = vst [vmem:[%s4997_s11 + $0x44] sm:$0xf] %v282_v17  ;;  %v286_v19 = vld [vmem:[%s5001_s7 + $0x4c] sm:$0xf]  ;;  %v288_v20 = vld [vmem:[%s5001_s7 + $0x50] sm:$0xf] }
  0x46   : >> { %285 = vst [vmem:[%s4997_s11 + $0x48] sm:$0xf] %v284_v18  ;;  %287 = vst [vmem:[%s4997_s11 + $0x4c] sm:$0xf] %v286_v19  ;;  %v290_v21 = vld [vmem:[%s5001_s7 + $0x54] sm:$0xf] }
  0x47   : >> { %289 = vst [vmem:[%s4997_s11 + $0x50] sm:$0xf] %v288_v20  ;;  %v292_v22 = vld [vmem:[%s5001_s7 + $0x58] sm:$0xf]  ;;  %v294_v23 = vld [vmem:[%s5001_s7 + $0x5c] sm:$0xf] }
  0x48   : >> { %291 = vst [vmem:[%s4997_s11 + $0x54] sm:$0xf] %v290_v21  ;;  %293 = vst [vmem:[%s4997_s11 + $0x58] sm:$0xf] %v292_v22  ;;  %v296_v24 = vld [vmem:[%s5001_s7 + $0x60] sm:$0xf] }
  0x49   : >> { %295 = vst [vmem:[%s4997_s11 + $0x5c] sm:$0xf] %v294_v23  ;;  %v298_v25 = vld [vmem:[%s5001_s7 + $0x64] sm:$0xf]  ;;  %v300_v26 = vld [vmem:[%s5001_s7 + $0x68] sm:$0xf] }
  0x4a   : >> { %297 = vst [vmem:[%s4997_s11 + $0x60] sm:$0xf] %v296_v24  ;;  %299 = vst [vmem:[%s4997_s11 + $0x64] sm:$0xf] %v298_v25  ;;  %v302_v27 = vld [vmem:[%s5001_s7 + $0x6c] sm:$0xf] }
  0x4b   : >> { %301 = vst [vmem:[%s4997_s11 + $0x68] sm:$0xf] %v300_v26  ;;  %v304_v28 = vld [vmem:[%s5001_s7 + $0x70] sm:$0xf]  ;;  %v306_v29 = vld [vmem:[%s5001_s7 + $0x74] sm:$0xf] }
  0x4c   : >> { %303 = vst [vmem:[%s4997_s11 + $0x6c] sm:$0xf] %v302_v27  ;;  %305 = vst [vmem:[%s4997_s11 + $0x70] sm:$0xf] %v304_v28  ;;  %v308_v30 = vld [vmem:[%s5001_s7 + $0x78] sm:$0xf] }
  0x4d   : >> { %307 = vst [vmem:[%s4997_s11 + $0x74] sm:$0xf] %v306_v29  ;;  %v310_v31 = vld [vmem:[%s5001_s7 + $0x7c] sm:$0xf]  ;;  %v312_v32 = vld [vmem:[%s5001_s7 + $0x408] sm:$0xf] }
  0x4e   : >> { %309 = vst [vmem:[%s4997_s11 + $0x78] sm:$0xf] %v308_v30  ;;  %311 = vst [vmem:[%s4997_s11 + $0x7c] sm:$0xf] %v310_v31  ;;  %v314_v33 = vld [vmem:[%s5001_s7 + $0x40c] sm:$0xf] }
  0x4f   : >> { %313 = vst [vmem:[%s4997_s11 + $0x100] sm:$0xf] %v312_v32  ;;  %v316_v34 = vld [vmem:[%s5001_s7 + $0x410] sm:$0xf]  ;;  %v318_v35 = vld [vmem:[%s5001_s7 + $0x414] sm:$0xf] }
  0x50   : >> { %315 = vst [vmem:[%s4997_s11 + $0x104] sm:$0xf] %v314_v33  ;;  %317 = vst [vmem:[%s4997_s11 + $0x108] sm:$0xf] %v316_v34  ;;  %v320_v36 = vld [vmem:[%s5001_s7 + $0x418] sm:$0xf] }
  0x51   : >> { %319 = vst [vmem:[%s4997_s11 + $0x10c] sm:$0xf] %v318_v35  ;;  %v322_v37 = vld [vmem:[%s5001_s7 + $0x41c] sm:$0xf]  ;;  %v324_v38 = vld [vmem:[%s5001_s7 + $0x420] sm:$0xf] }
  0x52   : >> { %321 = vst [vmem:[%s4997_s11 + $0x110] sm:$0xf] %v320_v36  ;;  %323 = vst [vmem:[%s4997_s11 + $0x114] sm:$0xf] %v322_v37  ;;  %v326_v39 = vld [vmem:[%s5001_s7 + $0x424] sm:$0xf] }
  0x53   : >> { %325 = vst [vmem:[%s4997_s11 + $0x118] sm:$0xf] %v324_v38  ;;  %v328_v40 = vld [vmem:[%s5001_s7 + $0x428] sm:$0xf]  ;;  %v330_v41 = vld [vmem:[%s5001_s7 + $0x42c] sm:$0xf] }
  0x54   : >> { %327 = vst [vmem:[%s4997_s11 + $0x11c] sm:$0xf] %v326_v39  ;;  %329 = vst [vmem:[%s4997_s11 + $0x120] sm:$0xf] %v328_v40  ;;  %v332_v42 = vld [vmem:[%s5001_s7 + $0x430] sm:$0xf] }
  0x55   : >> { %331 = vst [vmem:[%s4997_s11 + $0x124] sm:$0xf] %v330_v41  ;;  %v334_v43 = vld [vmem:[%s5001_s7 + $0x434] sm:$0xf]  ;;  %v336_v44 = vld [vmem:[%s5001_s7 + $0x438] sm:$0xf] }
  0x56   : >> { %333 = vst [vmem:[%s4997_s11 + $0x128] sm:$0xf] %v332_v42  ;;  %335 = vst [vmem:[%s4997_s11 + $0x12c] sm:$0xf] %v334_v43  ;;  %v338_v45 = vld [vmem:[%s5001_s7 + $0x43c] sm:$0xf] }
  0x57   : >> { %337 = vst [vmem:[%s4997_s11 + $0x130] sm:$0xf] %v336_v44  ;;  %v340_v46 = vld [vmem:[%s5001_s7 + $0x440] sm:$0xf]  ;;  %v342_v47 = vld [vmem:[%s5001_s7 + $0x444] sm:$0xf] }
  0x58   : >> { %339 = vst [vmem:[%s4997_s11 + $0x134] sm:$0xf] %v338_v45  ;;  %341 = vst [vmem:[%s4997_s11 + $0x138] sm:$0xf] %v340_v46  ;;  %v344_v48 = vld [vmem:[%s5001_s7 + $0x448] sm:$0xf] }
  0x59   : >> { %343 = vst [vmem:[%s4997_s11 + $0x13c] sm:$0xf] %v342_v47  ;;  %v346_v49 = vld [vmem:[%s5001_s7 + $0x44c] sm:$0xf]  ;;  %v348_v50 = vld [vmem:[%s5001_s7 + $0x450] sm:$0xf] }
  0x5a   : >> { %345 = vst [vmem:[%s4997_s11 + $0x140] sm:$0xf] %v344_v48  ;;  %347 = vst [vmem:[%s4997_s11 + $0x144] sm:$0xf] %v346_v49  ;;  %v350_v51 = vld [vmem:[%s5001_s7 + $0x454] sm:$0xf] }
  0x5b   : >> { %349 = vst [vmem:[%s4997_s11 + $0x148] sm:$0xf] %v348_v50  ;;  %v352_v52 = vld [vmem:[%s5001_s7 + $0x458] sm:$0xf]  ;;  %v354_v53 = vld [vmem:[%s5001_s7 + $0x45c] sm:$0xf] }
  0x5c   : >> { %351 = vst [vmem:[%s4997_s11 + $0x14c] sm:$0xf] %v350_v51  ;;  %353 = vst [vmem:[%s4997_s11 + $0x150] sm:$0xf] %v352_v52  ;;  %v356_v54 = vld [vmem:[%s5001_s7 + $0x460] sm:$0xf] }
  0x5d   : >> { %355 = vst [vmem:[%s4997_s11 + $0x154] sm:$0xf] %v354_v53  ;;  %v358_v55 = vld [vmem:[%s5001_s7 + $0x464] sm:$0xf]  ;;  %v360_v56 = vld [vmem:[%s5001_s7 + $0x468] sm:$0xf] }
  0x5e   : >> { %357 = vst [vmem:[%s4997_s11 + $0x158] sm:$0xf] %v356_v54  ;;  %359 = vst [vmem:[%s4997_s11 + $0x15c] sm:$0xf] %v358_v55  ;;  %v362_v57 = vld [vmem:[%s5001_s7 + $0x46c] sm:$0xf] }
  0x5f   : >> { %361 = vst [vmem:[%s4997_s11 + $0x160] sm:$0xf] %v360_v56  ;;  %v364_v58 = vld [vmem:[%s5001_s7 + $0x470] sm:$0xf]  ;;  %v366_v59 = vld [vmem:[%s5001_s7 + $0x474] sm:$0xf] }
  0x60   : >> { %363 = vst [vmem:[%s4997_s11 + $0x164] sm:$0xf] %v362_v57  ;;  %365 = vst [vmem:[%s4997_s11 + $0x168] sm:$0xf] %v364_v58  ;;  %v368_v60 = vld [vmem:[%s5001_s7 + $0x478] sm:$0xf] }
  0x61   : >> { %367 = vst [vmem:[%s4997_s11 + $0x16c] sm:$0xf] %v366_v59  ;;  %v370_v61 = vld [vmem:[%s5001_s7 + $0x47c] sm:$0xf]  ;;  %v372_v62 = vld [vmem:[%s5001_s7 + $0x480] sm:$0xf] }
  0x62   : >> { %369 = vst [vmem:[%s4997_s11 + $0x170] sm:$0xf] %v368_v60  ;;  %371 = vst [vmem:[%s4997_s11 + $0x174] sm:$0xf] %v370_v61  ;;  %v374_v63 = vld [vmem:[%s5001_s7 + $0x484] sm:$0xf] }
  0x63   : >> { %373 = vst [vmem:[%s4997_s11 + $0x178] sm:$0xf] %v372_v62  ;;  %375 = vst [vmem:[%s4997_s11 + $0x17c] sm:$0xf] %v374_v63  ;;  %p377_p3 = scmp.ge.s32.totalorder %s376_s10, 2  ;;  %s242_s4 = sadd.s32 1, %s5009_s4  }
  0x64   : >> { %p241_p4 = scmp.ge.s32.totalorder %s242_s4, 2 }
  0x65   : >> { %s7017_s10 = smov (%p377_p3, %s376_s10), 0 }
  0x66   : >> { %s4099_s15 = sshll.u32 %s7017_s10, 7  ;;  %s6989_s24 = smov %s7017_s10 }
  0x67   : >> { %s381_s7 = scalar_lea.vmem %s5184_s30, %s4099_s15   ;;  %s382_s11 = scalar_lea.vmem %s219_s8, %s4099_s15 [#allocation2]  }
  0x68   : > { %244 = sbr.rel (!%p241_p4) target bundleno = 57 (0x39), region = 232 }
  0x6f PF: > { %628 = sbr.rel (!%p5149_p9) target bundleno = 119 (0x77), region = 86  ;;  %s630_s16 = sand.u32 (%p5149_p9), 1, %s4965_s22  }
  0x70   : > { %s3947_s17 = smul.u32 (%p5149_p9), 129, %s4989_s28  ;;  %s4107_s13 = sshll.u32 (%p5149_p9), %s630_s16, 3 }
  0x71   : > { %s632_s4 = scalar_lea.vmem (%p5149_p9), [#allocation3], %s4107_s13 }
  0x72   : > { %s3948_s15 = sadd.s32 (%p5149_p9), %s5130_s12, %s3947_s17 }
  0x73   : > { %s4109_s0 = sshll.u32 (%p5149_p9), %s3948_s15, 2 }
  0x74   : > { %s3950_s20 = scalar_lea.vmem (%p5149_p9), %s6956_s1, %s4109_s0 }
  0x75   : > { %v4110_v0 = vld [vmem:[%s3950_s20 + $0x100] sm:$0xf] (%p5149_p9)  ;;  %v4111_v1 = vld [vmem:[%s3950_s20 + $0x508] sm:$0xf] (%p5149_p9) }
  0x76   : > { %655 = vst [vmem:[%s632_s4] sm:$0xf] %v4110_v0  ;;  %657 = vst [vmem:[%s632_s4 + $0x4] sm:$0xf] %v4111_v1 }
  0x77 PF: > { %p4112_p5 = scmp.ge.s32.totalorder %s4993_s29, 1  ;;  %p683_p6 = scmp.lt.s32.totalorder %s4993_s29, 5 }
  0x79   : > { %p684_p7 = pnand %p4112_p5, %p683_p6 }
  0x7a   : > { %s690_s24 = sand.u32 (!%p684_p7), 1, %s4969_s23   ;;  %vm1926_vm0 = vcmask (!%p684_p7), 1046528   ;;  %s5011_s0 = smov (!%p684_p7), 8   ;;  %vm1276_vm1 = vsmask.f32 (!%p684_p7), 7424  ;;  %vm2867_vm3 = vcmask (!%p684_p7), 1043456  }
  0x7b   : > { %687 = sbr.rel (%p684_p7) target bundleno = 901 (0x385), region = 127  ;;  %s4113_s7 = sshll.u32 (!%p684_p7), %s690_s24, 9  ;;  %vm2186_vm2 = vsmask.f32 (!%p684_p7), 6400  ;;  %vm2384_vm4 = vcmask (!%p684_p7), 64512   ;;  %vm2449_vm5 = vcmask (!%p684_p7), 130048  }
  0x7c   : > { %s5362_s8 = scalar_lea.vmem (!%p684_p7), [#allocation2], %s4113_s7  ;;  %s5012_s3 = smov (!%p684_p7), 32   ;;  %vm2514_vm6 = vcmask (!%p684_p7), 195584   ;;  %vm2579_vm7 = vcmask (!%p684_p7), 261120   ;;  %vm2644_vm8 = vcmask (!%p684_p7), 326656   ;;  %vm2709_vm9 = vcmask (!%p684_p7), 392192  }
  0x7d   : > { %v4724_v2 = vld [vmem:[%s5362_s8 + $0x100] sm:$0xff] (!%p684_p7)   ;;  %v5367_v3 = vld [vmem:[%s5362_s8 + $0x8] sm:$0xff] (!%p684_p7)   ;;  %v5370_v4 = vld [vmem:[%s5362_s8 + $0x10] sm:$0xff] (!%p684_p7)   ;;  %s5013_s5 = smov (!%p684_p7), 16   ;;  %s5014_s20 = smov (!%p684_p7), 24   ;;  %vm2802_vm10 = vcmask (!%p684_p7), 457728  }
  0x7e   : > { %1212 = vrot.lane.b32.xlu0 (!%p684_p7), %v4724_v2, %s5011_s0  ;;  %v1604_v5 = vshll.u32 (!%p684_p7), %v4724_v2, 16  ;;  %v5373_v6 = vld [vmem:[%s5362_s8 + $0x108] sm:$0xff] (!%p684_p7)   ;;  %v1602_v7 = vshrl.u32 (!%p684_p7), %v4724_v2, 16  ;;  %v1928_v8 = vrot.slane (!%p684_p7), %v5367_v3, 1  ;;  %v1930_v9 = vrot.slane (!%p684_p7), %v5370_v4, 1  ;;  %v5378_v10 = vld [vmem:[%s5362_s8] sm:$0xff] (!%p684_p7)  }
  0x7f   : > { %v1285_v11 = vshll.u32 (!%p684_p7), %v5367_v3, 16  ;;  %v1289_v12 = vshrl.u32 (!%p684_p7), %v5367_v3, 16  ;;  %v1293_v13 = vshll.u32 (!%p684_p7), %v5370_v4, 16  ;;  %v1609_v16 = vshll.u32 (!%p684_p7), %v5373_v6, 16  ;;  %v5390_v17 = vld [vmem:[%s5362_s8 + $0x110] sm:$0xff] (!%p684_p7)   ;;  %v5409_v46 = vld [vmem:[%s5362_s8 + $0x18] sm:$0xff] (!%p684_p7)  }
  0x80   : > { %v1606_v14 = vrot.slane (!%p684_p7), %v1604_v5, 1  ;;  %v1931_v15 = vsel (!%p684_p7), %vm1926_vm0, %v1928_v8, %v1930_v9  ;;  %v1278_v18 = vshrl.u32 (!%p684_p7), %v5378_v10, 16  ;;  %v1280_v19 = vshll.u32 (!%p684_p7), %v5378_v10, 16  ;;  %s5015_s23 = smov (!%p684_p7), 40   ;;  %v5417_v52 = vld [vmem:[%s5362_s8 + $0x118] sm:$0xff] (!%p684_p7)   ;;  %s5016_s12 = smov (!%p684_p7), 48  }
  0x81   : > { %1994 = vrot.lane.b32.xlu1 (!%p684_p7), %v1931_v15, %s5012_s3  ;;  %v1927_v20 = vrot.slane (!%p684_p7), %v5378_v10, 1  ;;  %v1287_v21 = vrot.slane (!%p684_p7), %v1285_v11, 1  ;;  %v1611_v23 = vrot.slane (!%p684_p7), %v1609_v16, 1  ;;  %v2057_v26 = vrot.slane (!%p684_p7), %v4724_v2, 1  ;;  %v5424_v56 = vld [vmem:[%s5362_s8 + $0x20] sm:$0xff] (!%p684_p7)   ;;  %s5429_s14 = sand.u32 (!%p684_p7), 1, %s4953_s19  }
  0x82   : > { %1214 = vrot.lane.b32.xlu0 %v5373_v6, %s5011_s0  ;;  %v1607_v22 = vor.u32 %v1606_v14, %v1602_v7  ;;  %v1282_v24 = vrot.slane %v1280_v19, 1  ;;  %v1295_v28 = vrot.slane %v1293_v13, 1  ;;  %v1613_v29 = vshrl.u32 %v5373_v6, 16  ;;  %v5433_v62 = vld [vmem:[%s5362_s8 + $0x120] sm:$0xff]   ;;  %s4115_s9 = sshll.u32 %s5429_s14, 3  ;;  %s4117_s24 = sshll.u32 %s4977_s25, 6 }
  0x83   : > { %v1929_v25 = vsel %vm1926_vm0, %v1927_v20, %v1928_v8  ;;  %v1291_v27 = vor.u32 %v1289_v12, %v1287_v21  ;;  %v1617_v30 = vshll.u32 %v5390_v17, 16  ;;  %v2058_v33 = vrot.slane %v5373_v6, 1  ;;  %v4746_v8 = vld [vmem:[%s6957_s2] sm:$0xff]   ;;  %p750_p8 = scmp.lt.s32.totalorder %s4981_s26, 1  ;;  %p752_p9 = scmp.lt.s32.totalorder %s4117_s24, 127 }
  0x84   : > { %v1283_v31 = vor.u32 %v1282_v24, %v1278_v18  ;;  %v1612_v32 = vsel %vm1276_vm1, %v1607_v22, %v1611_v23  ;;  %v2187_v34 = vrot.slane %v1278_v18, 1  ;;  %v2188_v35 = vrot.slane %v1280_v19, 2  ;;  %4462 = vmatprep.subr.bf16.mxu0 %v4746_v8  ;;  %4534 = vmatprep.subr.bf16.mxu1 %v4746_v8  ;;  %v4749_v22 = vld [vmem:[%s6957_s2 + $0x8] sm:$0xff]   ;;  %s697_s11 = sand.u32 1, %s4961_s21   ;;  %s6990_s15 = sld [smem:[#allocation19_spill]] }
  0x85   : > { %v2190_v36 = vrot.slane %v1289_v12, 1  ;;  %v2191_v38 = vrot.slane %v1285_v11, 2  ;;  %v1296_v39 = vsel %vm1276_vm1, %v1291_v27, %v1295_v28  ;;  %v1615_v40 = vor.u32 %v1613_v29, %v1611_v23  ;;  %4463 = vmatpush3.bf16.msra.mxu0 %v4746_v8  ;;  %4538 = vmatpush3.bf16.msra.mxu1 %v4746_v8  ;;  %v4751_v23 = vld [vmem:[%s6957_s2 + $0x10] sm:$0xff]   ;;  %v5466_v24 = vld [vmem:[%s5362_s8 + $0x28] sm:$0xff]   ;;  %v5523_v8 = vld [vmem:[%s5362_s8 + $0x38] sm:$0xff]   ;;  %s751_s7 = scalar_select %p750_p8, %s4981_s26, 1 }
  0x86   : > { %1992 = vrot.lane.b32.xlu0 %v1929_v25, %s5012_s3  ;;  %v1288_v37 = vsel %vm1276_vm1, %v1283_v31, %v1287_v21  ;;  %v1619_v41 = vrot.slane %v1617_v30, 1  ;;  %v2059_v42 = vsel %vm1926_vm0, %v2057_v26, %v2058_v33  ;;  %v2189_v43 = vor.u32 %v2188_v35, %v2187_v34  ;;  %4464 = vmatprep.subr.bf16.mxu0 %v4749_v22  ;;  %v5478_v29 = vld [vmem:[%s5362_s8 + $0x128] sm:$0xff]   ;;  %s7019_s24 = smov (!%p752_p9, %s4117_s24), 127  ;;  %s6388_s21 = sshll.u32 %s697_s11, 3 }
  0x87   : > { %1537 = vrot.lane.b32.xlu1 %v1288_v37, %s5013_s5  ;;  %v2192_v44 = vor.u32 %v2191_v38, %v2190_v36  ;;  %v1297_v45 = vshrl.u32 %v5370_v4, 16  ;;  %v2060_v48 = vrot.slane %v5390_v17, 1  ;;  %v2195_v51 = vrot.slane %v1293_v13, 2  ;;  %4535 = vmatprep.subr.bf16.mxu1 %v4749_v22  ;;  %v5486_v36 = vld [vmem:[%s5362_s8 + $0x30] sm:$0xff]   ;;  %s4118_s30 = sshll.u32 %s751_s7, 7  ;;  %p4349_p10 = scmp.ne.s32.totalorder %s4977_s25, 0 }
  0x88   : > { %v1620_v47 = vsel %vm1276_vm1, %v1615_v40, %v1619_v41  ;;  %v1301_v53 = vshll.u32 %v5409_v46, 16  ;;  %v1621_v59 = vshrl.u32 %v5390_v17, 16  ;;  %v1625_v60 = vshll.u32 %v5417_v52, 16  ;;  %s755_s10 = sadd.s32 %s4118_s30, %s7019_s24  ;;  %s699_s24 = scalar_lea.vmem [#allocation3], %s6388_s21 }
  0x89   : > { %v2193_v49 = vsel %vm2186_vm2, %v2189_v43, %v2192_v44  ;;  %v2194_v50 = vrot.slane %v1297_v45, 1  ;;  %v2061_v54 = vsel %vm1926_vm0, %v2058_v33, %v2060_v48  ;;  %v1299_v55 = vor.u32 %v1297_v45, %v1295_v28  ;;  %4465 = vmatpush3.bf16.msra.mxu0 %v4749_v22  ;;  %4539 = vmatpush3.bf16.msra.mxu1 %v4749_v22  ;;  %s4119_s16 = sshll.u32 %s755_s10, 2 }
  0x8a   : > { %1861 = vrot.lane.b32.xlu0 %v1612_v32, %s5014_s20  ;;  %v1303_v58 = vrot.slane %v1301_v53, 1  ;;  %v1305_v61 = vshrl.u32 %v5409_v46, 16  ;;  %v1309_v63 = vshll.u32 %v5424_v56, 16  ;;  %v1623_v2 = vor.u32 %v1621_v59, %v1619_v41  ;;  %4466 = vmatprep.subr.bf16.mxu0 %v4751_v23  ;;  %s6409_s4 = scalar_lea.vmem %s6990_s15, %s4119_s16 }
  0x8b   : > { %1539 = vrot.lane.b32.xlu1 %v1296_v39, %s5013_s5  ;;  %v2196_v57 = vor.u32 %v2195_v51, %v2194_v50  ;;  %v1627_v5 = vrot.slane %v1625_v60, 1  ;;  %v1633_v7 = vshll.u32 %v5433_v62, 16  ;;  %v1629_v13 = vshrl.u32 %v5417_v52, 16  ;;  %4536 = vmatprep.subr.bf16.mxu1 %v4751_v23  ;;  %v4753_v50 = vld [vmem:[%s6957_s2 + $0x18] ss:$0 sps:$4 sm:$0xff]  }
  0x8c   : > { %v1304_v1 = vsel %vm1276_vm1, %v1299_v55, %v1303_v58  ;;  %v1311_v6 = vrot.slane %v1309_v63, 1  ;;  %v1307_v11 = vor.u32 %v1305_v61, %v1303_v58  ;;  %v1932_v14 = vrot.slane %v5409_v46, 1 }
  0x8d   : > { %v2197_v0 = vsel %vm2186_vm2, %v2192_v44, %v2196_v57  ;;  %v1628_v12 = vsel %vm1276_vm1, %v1623_v2, %v1627_v5  ;;  %v1635_v15 = vrot.slane %v1633_v7, 1  ;;  %v2062_v16 = vrot.slane %v5417_v52, 1  ;;  %4467 = vmatpush3.bf16.msra.mxu0 %v4751_v23  ;;  %4540 = vmatpush3.bf16.msra.mxu1 %v4751_v23  ;;  %v5497_v44 = vld [vmem:[%s5362_s8 + $0x130] sm:$0xff]  }
  0x8e   : > { %2122 = vrot.lane.b32.xlu0 %v2059_v42, %s5015_s23  ;;  %v1312_v18 = vsel %vm1276_vm1, %v1307_v11, %v1311_v6  ;;  %v1631_v19 = vor.u32 %v1629_v13, %v1627_v5  ;;  %v1933_v20 = vsel %vm1926_vm0, %v1930_v9, %v1932_v14  ;;  %v2199_v21 = vrot.slane %v1301_v53, 2  ;;  %4542 = vmatprep.subr.msk.bf16.mxu0 %vm2867_vm3, %v4753_v50  ;;  %v5526_v11 = vld [vmem:[%s5362_s8 + $0x138] sm:$0xff]  }
  0x8f   : > { %1863 = vrot.lane.b32.xlu1 %v1620_v47, %s5014_s20  ;;  %v1934_v4 = vrot.slane %v5424_v56, 1  ;;  %v2063_v25 = vsel %vm1926_vm0, %v2060_v48, %v2062_v16  ;;  %v1313_v27 = vshrl.u32 %v5424_v56, 16  ;;  %v1317_v30 = vshll.u32 %v5466_v24, 16  ;;  %4543 = vmatprep.subr.msk.bf16.mxu1 %vm2867_vm3, %v4753_v50 }
  0x90   : > { %v1636_v9 = vsel %vm1276_vm1, %v1631_v19, %v1635_v15  ;;  %v2064_v31 = vrot.slane %v5433_v62, 1  ;;  %v2203_v34 = vrot.slane %v1309_v63, 2  ;;  %v1637_v37 = vshrl.u32 %v5433_v62, 16 }
  0x91   : > { %v1935_v28 = vsel %vm1926_vm0, %v1932_v14, %v1934_v4  ;;  %v2202_v33 = vrot.slane %v1313_v27, 1  ;;  %v1319_v35 = vrot.slane %v1317_v30, 1  ;;  %v1641_v38 = vshll.u32 %v5478_v29, 16 }
  0x92   : > { %2320 = vrot.lane.b32.xlu0 %v2193_v49, %s5016_s12  ;;  %v2065_v39 = vsel %vm1926_vm0, %v2062_v16, %v2064_v31  ;;  %v1315_v41 = vor.u32 %v1313_v27, %v1311_v6  ;;  %v1321_v42 = vshrl.u32 %v5466_v24, 16  ;;  %v1325_v43 = vshll.u32 %v5486_v36, 16 }
  0x93   : > { %2124 = vrot.lane.b32.xlu1 %v2061_v54, %s5015_s23  ;;  %v2204_v40 = vor.u32 %v2203_v34, %v2202_v33  ;;  %v1639_v48 = vor.u32 %v1637_v37, %v1635_v15  ;;  %v1643_v49 = vrot.slane %v1641_v38, 1  ;;  %v1649_v53 = vshll.u32 %v5497_v44, 16 }
  0x94   : > { %v1320_v47 = vsel %vm1276_vm1, %v1315_v41, %v1319_v35  ;;  %v1323_v51 = vor.u32 %v1321_v42, %v1319_v35  ;;  %v1645_v55 = vshrl.u32 %v5478_v29, 16  ;;  %v1936_v56 = vrot.slane %v5466_v24, 1 }
  0x95   : > { %v1644_v54 = vsel %vm1276_vm1, %v1639_v48, %v1643_v49  ;;  %v1651_v59 = vrot.slane %v1649_v53, 1  ;;  %v2066_v60 = vrot.slane %v5478_v29, 1  ;;  %v2206_v63 = vrot.slane %v1321_v42, 1 }
  0x96   : > { %1216 = vrot.lane.b32.xlu0 %v5390_v17, %s5011_s0  ;;  %v2198_v17 = vrot.slane %v1305_v61, 1  ;;  %v1647_v61 = vor.u32 %v1645_v55, %v1643_v49  ;;  %v1329_v7 = vshrl.u32 %v5486_v36, 16  ;;  %v2211_v13 = vrot.slane %v1325_v43, 2 }
  0x97   : > { %2322 = vrot.lane.b32.xlu1 %v2197_v0, %s5016_s12  ;;  %v2207_v0 = vrot.slane %v1317_v30, 2  ;;  %v2067_v5 = vsel %vm1926_vm0, %v2064_v31, %v2066_v60  ;;  %v1653_v23 = vshrl.u32 %v5497_v44, 16  ;;  %v1661_v35 = vshrl.u32 %v5526_v11, 16 }
  0x98   : > { %v2200_v26 = vor.u32 %v2199_v21, %v2198_v17  ;;  %v1652_v2 = vsel %vm1276_vm1, %v1647_v61, %v1651_v59  ;;  %v2210_v16 = vrot.slane %v1329_v7, 1  ;;  %v1333_v17 = vshll.u32 %v5523_v8, 16  ;;  %v5584_v61 = vld [vmem:[%s5362_s8 + $0x50] sm:$0xff]  }
  0x99   : > { %v2208_v6 = vor.u32 %v2207_v0, %v2206_v63  ;;  %v1940_v37 = vrot.slane %v5523_v8, 1  ;;  %vm3416_vm11 = vcmask 125952  }
  0x9a   : > { %1541 = vrot.lane.b32.xlu0 %v1304_v1, %s5013_s5  ;;  %v2201_v32 = vsel %vm2186_vm2, %v2196_v57, %v2200_v26  ;;  %v2205_v45 = vsel %vm2186_vm2, %v2200_v26, %v2204_v40  ;;  %v2869_v57 = vsel %vm2867_vm3, %v4753_v50, 0  ;;  %v1938_v1 = vrot.slane %v5486_v36, 1 }
  0x9b   : > { %1218 = vrot.lane.b32.xlu1 %v5417_v52, %s5011_s0  ;;  %v1327_v52 = vrot.slane %v1325_v43, 1  ;;  %4469 = vmatpush3.bf16.msra.mxu0 %v2869_v57  ;;  %v2209_v15 = vsel %vm2186_vm2, %v2204_v40, %v2208_v6  ;;  %v2212_v21 = vor.u32 %v2211_v13, %v2210_v16  ;;  %v1335_v22 = vrot.slane %v1333_v17, 1 }
  0x9c   : > { %4541 = vmatpush3.bf16.msra.mxu1 %v2869_v57  ;;  %v1939_v14 = vsel %vm1926_vm0, %v1936_v56, %v1938_v1  ;;  %v2070_v40 = vrot.slane %v5526_v11, 1  ;;  %v1941_v42 = vsel %vm1926_vm0, %v1938_v1, %v1940_v37  ;;  %v4742_v57 = vld [vmem:[%s5362_s8 + $0x148] sm:$0xff]  }
  0x9d   : > { %v1328_v58 = vsel %vm1276_vm1, %v1323_v51, %v1327_v52  ;;  %v1331_v19 = vor.u32 %v1329_v7, %v1327_v52  ;;  %v2213_v27 = vsel %vm2186_vm2, %v2208_v6, %v2212_v21  ;;  %v5571_v51 = vld [vmem:[%s5362_s8 + $0x48] sm:$0xff]   ;;  %v1673_v1 = vshll.u32 %v4742_v57, 16  ;;  %v5593_v6 = vld [vmem:[%s5362_s8 + $0x150] sm:$0xff]  }
  0x9e   : > { %1865 = vrot.lane.b32.xlu0 %v1628_v12, %s5014_s20  ;;  %v2068_v12 = vrot.slane %v5497_v44, 1  ;;  %v1681_v16 = vshll.u32 %v5593_v6, 16 }
  0x9f   : > { %1543 = vrot.lane.b32.xlu1 %v1312_v18, %s5013_s5  ;;  %v1675_v13 = vrot.slane %v1673_v1, 1 }
  0xa0   : > { %v2069_v18 = vsel %vm1926_vm0, %v2066_v60, %v2068_v12  ;;  %v2071_v48 = vsel %vm1926_vm0, %v2068_v12, %v2070_v40 }
  0xa2   : > { %1996 = vrot.lane.b32.xlu0 %v1933_v20, %s5012_s3  ;;  %v5538_v20 = vld [vmem:[%s5362_s8 + $0x40] sm:$0xff]  }
  0xa3   : > { %1867 = vrot.lane.b32.xlu1 %v1636_v9, %s5014_s20  ;;  %v5543_v9 = vld [vmem:[%s5362_s8 + $0x140] sm:$0xff]   ;;  %v1341_v26 = vshll.u32 %v5538_v20, 16  ;;  %v1345_v50 = vshrl.u32 %v5538_v20, 16 }
  0xa4   : > { %v1665_v33 = vshll.u32 %v5543_v9, 16  ;;  %v2072_v53 = vrot.slane %v5543_v9, 1  ;;  %v1669_v0 = vshrl.u32 %v5543_v9, 16 }
  0xa5   : > { %v2218_v55 = vrot.slane %v1345_v50, 1 }
  0xa6   : > { %2126 = vrot.lane.b32.xlu0 %v2063_v25, %s5015_s23  ;;  %v1337_v25 = vshrl.u32 %v5523_v8, 16 }
  0xa7   : > { %1998 = vrot.lane.b32.xlu1 %v1935_v28, %s5012_s3  ;;  %v1336_v28 = vsel %vm1276_vm1, %v1331_v19, %v1335_v22  ;;  %v1944_v19 = vrot.slane %v5571_v51, 1 }
  0xa8   : > { %v1339_v31 = vor.u32 %v1337_v25, %v1335_v22  ;;  %v2214_v43 = vrot.slane %v1337_v25, 1  ;;  %v1683_v22 = vrot.slane %v1681_v16, 1 }
  0xaa   : > { %2324 = vrot.lane.b32.xlu0 %v2201_v32, %s5016_s12  ;;  %v1343_v32 = vrot.slane %v1341_v26, 1 }
  0xab   : > { %2128 = vrot.lane.b32.xlu1 %v2065_v39, %s5015_s23  ;;  %v1667_v39 = vrot.slane %v1665_v33, 1 }
  0xac   : > { %v1344_v38 = vsel %vm1276_vm1, %v1339_v31, %v1343_v32  ;;  %v1347_v60 = vor.u32 %v1345_v50, %v1343_v32  ;;  %v1361_v31 = vshrl.u32 %v5584_v61, 16  ;;  %v5613_v32 = vld [vmem:[%s5362_s8 + $0x58] sm:$0xff]  }
  0xad   : > { %v1671_v12 = vor.u32 %v1669_v0, %v1667_v39 }
  0xae   : > { %1220 = vrot.lane.b32.xlu0 %v5433_v62, %s5011_s0  ;;  %v1937_v62 = vsel %vm1926_vm0, %v1934_v4, %v1936_v56  ;;  %v1657_v4 = vshll.u32 %v5526_v11, 16  ;;  %v2219_v56 = vrot.slane %v1341_v26, 2 }
  0xaf   : > { %2326 = vrot.lane.b32.xlu1 %v2205_v45, %s5016_s12  ;;  %v1942_v45 = vrot.slane %v5538_v20, 1 }
  0xb0   : > { %v1659_v30 = vrot.slane %v1657_v4, 1 }
  0xb1   : > { %v1943_v52 = vsel %vm1926_vm0, %v1940_v37, %v1942_v45  ;;  %v2226_v37 = vrot.slane %v1361_v31, 1 }
  0xb2   : > { %1545 = vrot.lane.b32.xlu0 %v1320_v47, %s5013_s5  ;;  %v1663_v41 = vor.u32 %v1661_v35, %v1659_v30 }
  0xb3   : > { %1222 = vrot.lane.b32.xlu1 %v5478_v29, %s5011_s0  ;;  %v1655_v29 = vor.u32 %v1653_v23, %v1651_v59  ;;  %v2073_v59 = vsel %vm1926_vm0, %v2070_v40, %v2072_v53  ;;  %v2074_v23 = vrot.slane %v4742_v57, 1  ;;  %v1365_v40 = vshll.u32 %v5613_v32, 16 }
  0xb4   : > { %v1668_v47 = vsel %vm1276_vm1, %v1663_v41, %v1667_v39  ;;  %v5621_v39 = vld [vmem:[%s5362_s8 + $0x158] sm:$0xff]  }
  0xb5   : > { %v1660_v34 = vsel %vm1276_vm1, %v1655_v29, %v1659_v30  ;;  %v2075_v29 = vsel %vm1926_vm0, %v2072_v53, %v2074_v23  ;;  %v1693_v0 = vshrl.u32 %v5621_v39, 16 }
  0xb6   : > { %1869 = vrot.lane.b32.xlu0 %v1644_v54, %s5014_s20 }
  0xb7   : > { %1547 = vrot.lane.b32.xlu1 %v1328_v58, %s5013_s5  ;;  %v1349_v58 = vshll.u32 %v5571_v51, 16 }
  0xb9   : > { %v1351_v63 = vrot.slane %v1349_v58, 1  ;;  %v2223_v26 = vrot.slane %v1349_v58, 2 }
  0xba   : > { %2000 = vrot.lane.b32.xlu0 %v1937_v62, %s5012_s3  ;;  %v2220_v62 = vor.u32 %v2219_v56, %v2218_v55  ;;  %v5644_v55 = vld [vmem:[%s5362_s8 + $0x160] sm:$0xff]  }
  0xbb   : > { %1871 = vrot.lane.b32.xlu1 %v1652_v2, %s5014_s20  ;;  %v1353_v2 = vshrl.u32 %v5571_v51, 16  ;;  %v1697_v1 = vshll.u32 %v5644_v55, 16 }
  0xbd   : > { %v2222_v25 = vrot.slane %v1353_v2, 1 }
  0xbe   : > { %2130 = vrot.lane.b32.xlu0 %v2067_v5, %s5015_s23  ;;  %v1357_v5 = vshll.u32 %v5584_v61, 16 }
  0xbf   : > { %2002 = vrot.lane.b32.xlu1 %v1939_v14, %s5012_s3  ;;  %v1355_v14 = vor.u32 %v1353_v2, %v1351_v63  ;;  %v2224_v30 = vor.u32 %v2223_v26, %v2222_v25  ;;  %v1948_v2 = vrot.slane %v5613_v32, 1 }
  0xc1   : > { %v2225_v35 = vsel %vm2186_vm2, %v2220_v62, %v2224_v30 }
  0xc2   : > { %2328 = vrot.lane.b32.xlu0 %v2209_v15, %s5016_s12  ;;  %v1359_v15 = vrot.slane %v1357_v5, 1 }
  0xc3   : > { %2132 = vrot.lane.b32.xlu1 %v2069_v18, %s5015_s23  ;;  %v1677_v18 = vshrl.u32 %v4742_v57, 16 }
  0xc5   : > { %v1679_v4 = vor.u32 %v1677_v18, %v1675_v13  ;;  %v2078_v18 = vrot.slane %v5621_v39, 1 }
  0xc6   : > { %1224 = vrot.lane.b32.xlu0 %v5497_v44, %s5011_s0  ;;  %v2215_v44 = vrot.slane %v1333_v17, 2  ;;  %v1676_v17 = vsel %vm1276_vm1, %v1671_v12, %v1675_v13 }
  0xc7   : > { %2330 = vrot.lane.b32.xlu1 %v2213_v27, %s5016_s12  ;;  %v1946_v27 = vrot.slane %v5584_v61, 1 }
  0xc8   : > { %v2216_v49 = vor.u32 %v2215_v44, %v2214_v43  ;;  %v1363_v44 = vor.u32 %v1361_v31, %v1359_v15 }
  0xc9   : > { %v1947_v33 = vsel %vm1926_vm0, %v1944_v19, %v1946_v27  ;;  %v1949_v16 = vsel %vm1926_vm0, %v1946_v27, %v1948_v2 }
  0xca   : > { %1549 = vrot.lane.b32.xlu0 %v1336_v28, %s5013_s5  ;;  %v2217_v54 = vsel %vm2186_vm2, %v2212_v21, %v2216_v49  ;;  %v2221_v7 = vsel %vm2186_vm2, %v2216_v49, %v2220_v62  ;;  %v1360_v21 = vsel %vm1276_vm1, %v1355_v14, %v1359_v15  ;;  %v1684_v28 = vsel %vm1276_vm1, %v1679_v4, %v1683_v22 }
  0xcb   : > { %1226 = vrot.lane.b32.xlu1 %v5526_v11, %s5011_s0  ;;  %v1352_v11 = vsel %vm1276_vm1, %v1347_v60, %v1351_v63  ;;  %v1689_v49 = vshll.u32 %v5621_v39, 16  ;;  %v5666_v15 = vrot.slane %v1697_v1, 1 }
  0xce   : > { %1873 = vrot.lane.b32.xlu0 %v1660_v34, %s5014_s20  ;;  %v2076_v34 = vrot.slane %v5593_v6, 1 }
  0xcf   : > { %1551 = vrot.lane.b32.xlu1 %v1344_v38, %s5013_s5  ;;  %v2227_v38 = vrot.slane %v1357_v5, 2 }
  0xd0   : > { %v2077_v43 = vsel %vm1926_vm0, %v2074_v23, %v2076_v34  ;;  %v2079_v26 = vsel %vm1926_vm0, %v2076_v34, %v2078_v18  ;;  %v2080_v34 = vrot.slane %v5644_v55, 1 }
  0xd2   : > { %2004 = vrot.lane.b32.xlu0 %v1941_v42, %s5012_s3  ;;  %v5625_v42 = vld [vmem:[%s5362_s8 + $0x60] sm:$0xff]  }
  0xd3   : > { %1875 = vrot.lane.b32.xlu1 %v1668_v47, %s5014_s20  ;;  %v1367_v47 = vrot.slane %v1365_v40, 1  ;;  %v1373_v53 = vshll.u32 %v5625_v42, 16 }
  0xd5   : > { %v5651_v63 = vrot.slane %v1373_v53, 1 }
  0xd6   : > { %2134 = vrot.lane.b32.xlu0 %v2071_v48, %s5015_s23  ;;  %v1685_v48 = vshrl.u32 %v5593_v6, 16 }
  0xd7   : > { %2006 = vrot.lane.b32.xlu1 %v1943_v52, %s5012_s3  ;;  %v1369_v52 = vshrl.u32 %v5613_v32, 16 }
  0xd8   : > { %v1687_v58 = vor.u32 %v1685_v48, %v1683_v22 }
  0xd9   : > { %v1371_v62 = vor.u32 %v1369_v52, %v1367_v47 }
  0xda   : > { %2332 = vrot.lane.b32.xlu0 %v2217_v54, %s5016_s12 }
  0xdb   : > { %2136 = vrot.lane.b32.xlu1 %v2073_v59, %s5015_s23  ;;  %v1691_v59 = vrot.slane %v1689_v49, 1  ;;  %v1376_v12 = vsel %vm1276_vm1, %v1371_v62, %v5651_v63 }
  0xdd   : > { %v1692_v5 = vsel %vm1276_vm1, %v1687_v58, %v1691_v59  ;;  %v1695_v14 = vor.u32 %v1693_v0, %v1691_v59 }
  0xde   : > { %1228 = vrot.lane.b32.xlu0 %v5543_v9, %s5011_s0  ;;  %v1945_v9 = vsel %vm1926_vm0, %v1942_v45, %v1944_v19  ;;  %v5632_v45 = vor.u32 %v2227_v38, %v2226_v37  ;;  %v2230_v19 = vrot.slane %v1369_v52, 1 }
  0xdf   : > { %2334 = vrot.lane.b32.xlu1 %v2221_v7, %s5016_s12  ;;  %v1700_v4 = vsel %vm1276_vm1, %v1695_v14, %v5666_v15 }
  0xe0   : > { %v2229_v56 = vsel %vm2186_vm2, %v2224_v30, %v5632_v45 }
  0xe2   : > { %1553 = vrot.lane.b32.xlu0 %v1352_v11, %s5013_s5 }
  0xe3   : > { %1230 = vrot.lane.b32.xlu1 %v4742_v57, %s5011_s0  ;;  %v1368_v57 = vsel %vm1276_vm1, %v1363_v44, %v1367_v47  ;;  %v5703_v47 = vld [vmem:[%s5362_s8 + $0x168] sm:$0xff]  }
  0xe6   : > { %1877 = vrot.lane.b32.xlu0 %v1676_v17, %s5014_s20 }
  0xe7   : > { %1555 = vrot.lane.b32.xlu1 %v1360_v21, %s5013_s5  ;;  %v2231_v21 = vrot.slane %v1365_v40, 2 }
  0xe9   : > { %v2232_v27 = vor.u32 %v2231_v21, %v2230_v19 }
  0xea   : > { %2008 = vrot.lane.b32.xlu0 %v1945_v9, %s5012_s3  ;;  %v1950_v9 = vrot.slane %v5625_v42, 1 }
  0xeb   : > { %1879 = vrot.lane.b32.xlu1 %v1684_v28, %s5014_s20  ;;  %v1377_v28 = vshrl.u32 %v5625_v42, 16 }
  0xed   : > { %v2234_v40 = vrot.slane %v1377_v28, 1  ;;  %v1379_v52 = vor.u32 %v1377_v28, %v5651_v63 }
  0xee   : > { %2138 = vrot.lane.b32.xlu0 %v2075_v29, %s5015_s23 }
  0xef   : > { %2010 = vrot.lane.b32.xlu1 %v1947_v33, %s5012_s3  ;;  %v5684_v33 = vld [vmem:[%s5362_s8 + $0x68] sm:$0xff]  }
  0xf0   : > { %v1213_v41 = vpop.permute.xlu0 %1212  ;;  %v1381_v48 = vshll.u32 %v5684_v33, 16  ;;  %v1385_v0 = vshrl.u32 %v5684_v33, 16 }
  0xf1   : > { %v2386_v13 = vsel %vm2384_vm4, %v5378_v10, %v1213_v41 }
  0xf2   : > { %2336 = vrot.lane.b32.xlu0 %v2225_v35, %s5016_s12  ;;  %v1383_v59 = vrot.slane %v1381_v48, 1 }
  0xf3   : > { %2140 = vrot.lane.b32.xlu1 %v2077_v43, %s5015_s23  ;;  %v5639_v54 = vpop.permute.xlu1 %1994 }
  0xf4   : > { %v1215_v50 = vpop.permute.xlu0 %1214  ;;  %v1387_v14 = vor.u32 %v1385_v0, %v1383_v59 }
  0xf5   : > { %v2388_v37 = vsel %vm2384_vm4, %v5367_v3, %v1215_v50  ;;  %v2235_v3 = vrot.slane %v1373_v53, 2  ;;  %v5717_v53 = vld [vmem:[%s5362_s8 + $0x70] sm:$0xff]  }
  0xf6   : > { %1232 = vrot.lane.b32.xlu0 %v5593_v6, %s5011_s0  ;;  %v1951_v6 = vsel %vm1926_vm0, %v1948_v2, %v1950_v9  ;;  %v1389_v1 = vshll.u32 %v5717_v53, 16  ;;  %v5732_v2 = vld [vmem:[%s5362_s8 + $0x170] sm:$0xff]  }
  0xf7   : > { %2338 = vrot.lane.b32.xlu1 %v2229_v56, %s5016_s12  ;;  %v5713_v50 = vor.u32 %v2235_v3, %v2234_v40  ;;  %v1954_v40 = vrot.slane %v5717_v53, 1 }
  0xf8   : > { %v1993_v60 = vpop.permute.xlu0 %1992 }
  0xf9   : > { %v1538_v7 = vpop.permute.xlu1 %1537  ;;  %v2237_v63 = vsel %vm2186_vm2, %v2232_v27, %v5713_v50 }
  0xfa   : > { %1557 = vrot.lane.b32.xlu0 %v1368_v57, %s5013_s5  ;;  %v2451_v17 = vsel %vm2449_vm5, %v2386_v13, %v1538_v7 }
  0xfb   : > { %1234 = vrot.lane.b32.xlu1 %v5621_v39, %s5011_s0  ;;  %v2233_v39 = vsel %vm2186_vm2, %v5632_v45, %v2232_v27  ;;  %v2081_v45 = vsel %vm1926_vm0, %v2078_v18, %v2080_v34  ;;  %v1713_v18 = vshll.u32 %v5732_v2, 16 }
  0xfc   : > { %v1862_v11 = vpop.permute.xlu0 %1861 }
  0xfd   : > { %v1540_v22 = vpop.permute.xlu1 %1539  ;;  %v2516_v23 = vsel %vm2514_vm6, %v2451_v17, %v1862_v11  ;;  %v1384_v11 = vsel %vm1276_vm1, %v1379_v52, %v1383_v59  ;;  %v1709_v17 = vshrl.u32 %v5703_v47, 16 }
  0xfe   : > { %1881 = vrot.lane.b32.xlu0 %v1692_v5, %s5014_s20  ;;  %v2581_v25 = vsel %vm2579_vm7, %v2516_v23, %v1993_v60  ;;  %v2453_v38 = vsel %vm2449_vm5, %v2388_v37, %v1540_v22  ;;  %v1701_v60 = vshrl.u32 %v5644_v55, 16  ;;  %v1952_v23 = vrot.slane %v5684_v33, 1 }
  0xff   : > { %1559 = vrot.lane.b32.xlu1 %v1376_v12, %s5013_s5 }
 0x100   : > { %v2123_v10 = vpop.permute.xlu0 %2122  ;;  %v1703_v12 = vor.u32 %v1701_v60, %v5666_v15  ;;  %v5780_v60 = vld [vmem:[%s5362_s8 + $0x178] sm:$0xff]  }
 0x101   : > { %v1864_v29 = vpop.permute.xlu1 %1863  ;;  %v2646_v30 = vsel %vm2644_vm8, %v2581_v25, %v2123_v10  ;;  %v4792_v10 = vld [vmem:[%s5362_s8 + $0x10] sm:$0xff]  }
 0x102   : > { %2012 = vrot.lane.b32.xlu0 %v1949_v16, %s5012_s3  ;;  %v2518_v41 = vsel %vm2514_vm6, %v2453_v38, %v1864_v29  ;;  %v1391_v16 = vrot.slane %v1389_v1, 1  ;;  %v1953_v29 = vsel %vm1926_vm0, %v1950_v9, %v1952_v23  ;;  %v1393_v9 = vshrl.u32 %v5717_v53, 16 }
 0x103   : > { %1883 = vrot.lane.b32.xlu1 %v1700_v4, %s5014_s20  ;;  %v2583_v49 = vsel %vm2579_vm7, %v2518_v41, %v5639_v54  ;;  %v1705_v54 = vshll.u32 %v5703_v47, 16 }
 0x104   : > { %v2321_v31 = vpop.permute.xlu0 %2320  ;;  %v1392_v4 = vsel %vm1276_vm1, %v1387_v14, %v1391_v16  ;;  %v2242_v52 = vrot.slane %v1393_v9, 1 }
 0x105   : > { %v2711_v35 = vsel %vm2709_vm9, %v2646_v30, %v2321_v31  ;;  %v2125_v43 = vpop.permute.xlu1 %2124  ;;  %v1707_v13 = vrot.slane %v1705_v54, 1  ;;  %v2082_v30 = vrot.slane %v5703_v47, 1  ;;  %v2238_v31 = vrot.slane %v1385_v0, 1 }
 0x106   : > { %2142 = vrot.lane.b32.xlu0 %v2079_v26, %s5015_s23  ;;  %4470 = vmatprep.mubr.msk.bf16.mxu0 %vm2802_vm10, %v2711_v35  ;;  %v2648_v56 = vsel %vm2644_vm8, %v2583_v49, %v2125_v43  ;;  %v1715_v26 = vrot.slane %v1713_v18, 1  ;;  %v2239_v35 = vrot.slane %v1381_v48, 2  ;;  %v5765_v48 = vld [vmem:[%s5362_s8 + $0x78] sm:$0xff]  }
 0x107   : > { %2014 = vrot.lane.b32.xlu1 %v1951_v6, %s5012_s3  ;;  %v1708_v22 = vsel %vm1276_vm1, %v1703_v12, %v1707_v13  ;;  %v1711_v25 = vor.u32 %v1709_v17, %v1707_v13  ;;  %v1397_v54 = vshll.u32 %v5765_v48, 16  ;;  %v1395_v13 = vor.u32 %v1393_v9, %v1391_v16  ;;  %v5809_v16 = vld [vmem:[%s5362_s8 + $0x180] sm:$0xff]  }
 0x108   : > { %v1217_v44 = vpop.permute.xlu0 %1216  ;;  %v1721_v17 = vshll.u32 %v5780_v60, 16 }
 0x109   : > { %v2323_v57 = vpop.permute.xlu1 %2322  ;;  %v2390_v15 = vsel %vm2384_vm4, %v4792_v10, %v1217_v44  ;;  %v2083_v44 = vsel %vm1926_vm0, %v2080_v34, %v2082_v30  ;;  %v2243_v34 = vrot.slane %v1389_v1, 2  ;;  %v1399_v14 = vrot.slane %v1397_v54, 1 }
 0x10a   : > { %2340 = vrot.lane.b32.xlu0 %v2233_v39, %s5016_s12  ;;  %v2713_v62 = vsel %vm2709_vm9, %v2648_v56, %v2323_v57  ;;  %v1716_v39 = vsel %vm1276_vm1, %v1711_v25, %v1715_v26  ;;  %v1723_v25 = vrot.slane %v1721_v17, 1  ;;  %v5856_v17 = vld [vmem:[%s5362_s8 + $0x188] sm:$0xff]  }
 0x10b   : > { %2144 = vrot.lane.b32.xlu1 %v2081_v45, %s5015_s23  ;;  %4471 = vmatmul.mubr.msk.bf16.vlgmr.msra.gmra.mrb[0].mxu0 %vm2802_vm10, %v2713_v62  ;;  %v1955_v45 = vsel %vm1926_vm0, %v1952_v23, %v1954_v40  ;;  %v5791_v1 = vor.u32 %v2243_v34, %v2242_v52 }
 0x10c   : > { %v1542_v58 = vpop.permute.xlu0 %1541 }
 0x10d   : > { %v1219_v5 = vpop.permute.xlu1 %1218  ;;  %v2455_v37 = vsel %vm2449_vm5, %v2390_v15, %v1542_v58  ;;  %v1400_v15 = vsel %vm1276_vm1, %v1395_v13, %v1399_v14 }
 0x10e   : > { %1236 = vrot.lane.b32.xlu0 %v5644_v55, %s5011_s0  ;;  %v2084_v55 = vrot.slane %v5732_v2, 1  ;;  %v2392_v56 = vsel %vm2384_vm4, %v5409_v46, %v1219_v5  ;;  %v1717_v5 = vshrl.u32 %v5732_v2, 16 }
 0x10f   : > { %2342 = vrot.lane.b32.xlu1 %v2237_v63, %s5016_s12 }
 0x110   : > { %v1866_v7 = vpop.permute.xlu0 %1865  ;;  %v2085_v46 = vsel %vm1926_vm0, %v2082_v30, %v2084_v55  ;;  %v1729_v30 = vshll.u32 %v5809_v16, 16 }
 0x111   : > { %v1544_v19 = vpop.permute.xlu1 %1543  ;;  %v2520_v6 = vsel %vm2514_vm6, %v2455_v37, %v1866_v7 }
 0x112   : > { %1561 = vrot.lane.b32.xlu0 %v1384_v11, %s5013_s5  ;;  %v2457_v62 = vsel %vm2449_vm5, %v2392_v56, %v1544_v19 }
 0x113   : > { %1238 = vrot.lane.b32.xlu1 %v5703_v47, %s5011_s0  ;;  %v2240_v47 = vor.u32 %v2239_v35, %v2238_v31 }
 0x114   : > { %v1997_v21 = vpop.permute.xlu0 %1996 }
 0x115   : > { %v1868_v27 = vpop.permute.xlu1 %1867  ;;  %v2585_v38 = vsel %vm2579_vm7, %v2520_v6, %v1997_v21  ;;  %v2241_v59 = vsel %vm2186_vm2, %v5713_v50, %v2240_v47  ;;  %v5794_v50 = vld [vmem:[%s5362_s8 + $0x80] sm:$0xff]   ;;  %v2245_v19 = vsel %vm2186_vm2, %v2240_v47, %v5791_v1  ;;  %v1401_v21 = vshrl.u32 %v5765_v48, 16 }
 0x116   : > { %1885 = vrot.lane.b32.xlu0 %v1708_v22, %s5014_s20  ;;  %v2522_v63 = vsel %vm2514_vm6, %v2457_v62, %v1868_v27  ;;  %v1405_v22 = vshll.u32 %v5794_v50, 16  ;;  %v1956_v6 = vrot.slane %v5765_v48, 1  ;;  %v2086_v47 = vrot.slane %v5780_v60, 1 }
 0x117   : > { %1563 = vrot.lane.b32.xlu1 %v1392_v4, %s5013_s5  ;;  %v1719_v4 = vor.u32 %v1717_v5, %v1715_v26  ;;  %v1403_v27 = vor.u32 %v1401_v21, %v1399_v14 }
 0x118   : > { %v2127_v28 = vpop.permute.xlu0 %2126  ;;  %v2087_v62 = vsel %vm1926_vm0, %v2084_v55, %v2086_v47  ;;  %v2251_v55 = vrot.slane %v1405_v22, 2 }
 0x119   : > { %v1999_v3 = vpop.permute.xlu1 %1998  ;;  %v2650_v41 = vsel %vm2644_vm8, %v2585_v38, %v2127_v28  ;;  %v1407_v28 = vrot.slane %v1405_v22, 1  ;;  %v1724_v37 = vsel %vm1276_vm1, %v1719_v4, %v1723_v25  ;;  %v4793_v38 = vld [vmem:[%s5362_s8 + $0x20] sm:$0xff]  }
 0x11a   : > { %2016 = vrot.lane.b32.xlu0 %v1953_v29, %s5012_s3  ;;  %v2587_v0 = vsel %vm2579_vm7, %v2522_v63, %v1999_v3  ;;  %v1725_v29 = vshrl.u32 %v5780_v60, 16  ;;  %v1731_v3 = vrot.slane %v1729_v30, 1  ;;  %v1737_v30 = vshll.u32 %v5856_v17, 16 }
 0x11b   : > { %1887 = vrot.lane.b32.xlu1 %v1716_v39, %s5014_s20  ;;  %v1408_v39 = vsel %vm1276_vm1, %v1403_v27, %v1407_v28 }
 0x11c   : > { %v2325_v43 = vpop.permute.xlu0 %2324  ;;  %v1727_v9 = vor.u32 %v1725_v29, %v1723_v25  ;;  %v1733_v29 = vshrl.u32 %v5809_v16, 16 }
 0x11d   : > { %v2715_v49 = vsel %vm2709_vm9, %v2650_v41, %v2325_v43  ;;  %v2129_v57 = vpop.permute.xlu1 %2128 }
 0x11e   : > { %4474 = vmatprep.mubr.msk.bf16.mxu0 %vm2802_vm10, %v2715_v49  ;;  %2146 = vrot.lane.b32.xlu0 %v2083_v44, %s5015_s23  ;;  %v2652_v7 = vsel %vm2644_vm8, %v2587_v0, %v2129_v57  ;;  %v1957_v44 = vsel %vm1926_vm0, %v1954_v40, %v1956_v6  ;;  %v2246_v49 = vrot.slane %v1401_v21, 1  ;;  %v1732_v57 = vsel %vm1276_vm1, %v1727_v9, %v1731_v3  ;;  %v5841_v0 = vld [vmem:[%s5362_s8 + $0x88] sm:$0xff]  }
 0x11f   : > { %2018 = vrot.lane.b32.xlu1 %v1955_v45, %s5012_s3  ;;  %v2247_v45 = vrot.slane %v1397_v54, 2  ;;  %v1409_v40 = vshrl.u32 %v5794_v50, 16  ;;  %v1735_v9 = vor.u32 %v1733_v29, %v1731_v3  ;;  %v5932_v29 = vld [vmem:[%s5362_s8 + $0x198] sm:$0xff]  }
 0x120   : > { %v1221_v58 = vpop.permute.xlu0 %1220 }
 0x121   : > { %v2327_v11 = vpop.permute.xlu1 %2326  ;;  %v2394_v26 = vsel %vm2384_vm4, %v4793_v38, %v1221_v58  ;;  %v1958_v58 = vrot.slane %v5794_v50, 1  ;;  %v2248_v63 = vor.u32 %v2247_v45, %v2246_v49 }
 0x122   : > { %2344 = vrot.lane.b32.xlu0 %v2241_v59, %s5016_s12  ;;  %v2717_v18 = vsel %vm2709_vm9, %v2652_v7, %v2327_v11  ;;  %v2250_v7 = vrot.slane %v1409_v40, 1 }
 0x123   : > { %2148 = vrot.lane.b32.xlu1 %v2085_v46, %s5015_s23  ;;  %4475 = vmatmul.mubr.msk.bf16.gmra.mrb[4].mxu0 %vm2802_vm10, %v2717_v18  ;;  %v1959_v5 = vsel %vm1926_vm0, %v1956_v6, %v1958_v58  ;;  %v2249_v14 = vsel %vm2186_vm2, %v5791_v1, %v2248_v63  ;;  %v1413_v18 = vshll.u32 %v5841_v0, 16  ;;  %v1411_v1 = vor.u32 %v1409_v40, %v1407_v28  ;;  %v5885_v6 = vld [vmem:[%s5362_s8 + $0x190] sm:$0xff]  }
 0x124   : > { %v1546_v12 = vpop.permute.xlu0 %1545  ;;  %v1745_v49 = vshll.u32 %v5885_v6, 16 }
 0x125   : > { %v1223_v23 = vpop.permute.xlu1 %1222  ;;  %v2459_v52 = vsel %vm2449_vm5, %v2394_v26, %v1546_v12  ;;  %v1415_v27 = vrot.slane %v1413_v18, 1 }
 0x126   : > { %1240 = vrot.lane.b32.xlu0 %v5732_v2, %s5011_s0  ;;  %v2088_v2 = vrot.slane %v5809_v16, 1  ;;  %v2396_v11 = vsel %vm2384_vm4, %v5466_v24, %v1223_v23  ;;  %v5867_v23 = vor.u32 %v2251_v55, %v2250_v7 }
 0x127   : > { %2346 = vrot.lane.b32.xlu1 %v2245_v19, %s5016_s12 }
 0x128   : > { %v1870_v10 = vpop.permute.xlu0 %1869  ;;  %v2089_v24 = vsel %vm1926_vm0, %v2086_v47, %v2088_v2  ;;  %v2253_v28 = vsel %vm2186_vm2, %v2248_v63, %v5867_v23  ;;  %v1741_v47 = vshrl.u32 %v5856_v17, 16  ;;  %v2090_v63 = vrot.slane %v5856_v17, 1 }
 0x129   : > { %v1548_v31 = vpop.permute.xlu1 %1547  ;;  %v2524_v34 = vsel %vm2514_vm6, %v2459_v52, %v1870_v10  ;;  %v5870_v10 = vld [vmem:[%s5362_s8 + $0x90] sm:$0xff]  }
 0x12a   : > { %1565 = vrot.lane.b32.xlu0 %v1400_v15, %s5013_s5  ;;  %v2461_v19 = vsel %vm2449_vm5, %v2396_v11, %v1548_v31 }
 0x12b   : > { %1242 = vrot.lane.b32.xlu1 %v5780_v60, %s5011_s0 }
 0x12c   : > { %v2001_v35 = vpop.permute.xlu0 %2000 }
 0x12d   : > { %v1872_v41 = vpop.permute.xlu1 %1871  ;;  %v2589_v56 = vsel %vm2579_vm7, %v2524_v34, %v2001_v35  ;;  %v1417_v35 = vshrl.u32 %v5841_v0, 16 }
 0x12e   : > { %1889 = vrot.lane.b32.xlu0 %v1724_v37, %s5014_s20  ;;  %v2526_v21 = vsel %vm2514_vm6, %v2461_v19, %v1872_v41  ;;  %v1421_v37 = vshll.u32 %v5870_v10, 16  ;;  %v1739_v41 = vrot.slane %v1737_v30, 1 }
 0x12f   : > { %1567 = vrot.lane.b32.xlu1 %v1408_v39, %s5013_s5  ;;  %v1416_v39 = vsel %vm1276_vm1, %v1411_v1, %v1415_v27 }
 0x130   : > { %v2131_v43 = vpop.permute.xlu0 %2130  ;;  %v1740_v34 = vsel %vm1276_vm1, %v1735_v9, %v1739_v41  ;;  %v1743_v40 = vor.u32 %v1741_v47, %v1739_v41  ;;  %v1753_v47 = vshll.u32 %v5932_v29, 16 }
 0x131   : > { %v2003_v59 = vpop.permute.xlu1 %2002  ;;  %v2654_v60 = vsel %vm2644_vm8, %v2589_v56, %v2131_v43  ;;  %v1419_v43 = vor.u32 %v1417_v35, %v1415_v27  ;;  %v1960_v56 = vrot.slane %v5841_v0, 1 }
 0x132   : > { %2020 = vrot.lane.b32.xlu0 %v1957_v44, %s5012_s3  ;;  %v2591_v22 = vsel %vm2579_vm7, %v2526_v21, %v2003_v59  ;;  %v1423_v44 = vrot.slane %v1421_v37, 1  ;;  %v1747_v59 = vrot.slane %v1745_v49, 1  ;;  %v5917_v21 = vld [vmem:[%s5362_s8 + $0x98] sm:$0xff]  }
 0x133   : > { %1891 = vrot.lane.b32.xlu1 %v1732_v57, %s5014_s20  ;;  %v1429_v30 = vshll.u32 %v5917_v21, 16 }
 0x134   : > { %v2329_v54 = vpop.permute.xlu0 %2328  ;;  %v1424_v57 = vsel %vm1276_vm1, %v1419_v43, %v1423_v44  ;;  %v1748_v11 = vsel %vm1276_vm1, %v1743_v40, %v1747_v59  ;;  %v1749_v43 = vshrl.u32 %v5885_v6, 16 }
 0x135   : > { %v2719_v46 = vsel %vm2709_vm9, %v2654_v60, %v2329_v54  ;;  %v2133_v12 = vpop.permute.xlu1 %2132  ;;  %v1431_v41 = vrot.slane %v1429_v30, 1 }
 0x136   : > { %4478 = vmatprep.mubr.msk.bf16.mxu0 %vm2802_vm10, %v2719_v46  ;;  %2150 = vrot.lane.b32.xlu0 %v2087_v62, %s5015_s23  ;;  %v2656_v15 = vsel %vm2644_vm8, %v2591_v22, %v2133_v12  ;;  %v1961_v62 = vsel %vm1926_vm0, %v1958_v58, %v1960_v56  ;;  %v2254_v46 = vrot.slane %v1417_v35, 1  ;;  %v1962_v12 = vrot.slane %v5870_v10, 1 }
 0x137   : > { %2022 = vrot.lane.b32.xlu1 %v1959_v5, %s5012_s3  ;;  %v1425_v58 = vshrl.u32 %v5870_v10, 16  ;;  %v1751_v40 = vor.u32 %v1749_v43, %v1747_v59  ;;  %v6008_v43 = vld [vmem:[%s5362_s8 + $0x1a8] sm:$0xff]  }
 0x138   : > { %v1225_v13 = vpop.permute.xlu0 %1224 }
 0x139   : > { %v2331_v4 = vpop.permute.xlu1 %2330  ;;  %v2398_v3 = vsel %vm2384_vm4, %v5486_v36, %v1225_v13  ;;  %v2255_v36 = vrot.slane %v1413_v18, 2  ;;  %v2091_v18 = vsel %vm1926_vm0, %v2088_v2, %v2090_v63  ;;  %v2258_v1 = vrot.slane %v1425_v58, 1 }
 0x13a   : > { %2348 = vrot.lane.b32.xlu0 %v2249_v14, %s5016_s12  ;;  %v2721_v31 = vsel %vm2709_vm9, %v2656_v15, %v2331_v4  ;;  %v2259_v2 = vrot.slane %v1421_v37, 2 }
 0x13b   : > { %2152 = vrot.lane.b32.xlu1 %v2089_v24, %s5015_s23  ;;  %4479 = vmatmul.mubr.msk.bf16.gmra.mrb[8].mxu0 %vm2802_vm10, %v2721_v31  ;;  %v2256_v19 = vor.u32 %v2255_v36, %v2254_v46  ;;  %v1963_v24 = vsel %vm1926_vm0, %v1960_v56, %v1962_v12 }
 0x13c   : > { %v1550_v25 = vpop.permute.xlu0 %1549  ;;  %v5943_v37 = vor.u32 %v2259_v2, %v2258_v1 }
 0x13d   : > { %v1227_v38 = vpop.permute.xlu1 %1226  ;;  %v2463_v5 = vsel %vm2449_vm5, %v2398_v3, %v1550_v25  ;;  %v2257_v27 = vsel %vm2186_vm2, %v5867_v23, %v2256_v19  ;;  %v1427_v23 = vor.u32 %v1425_v58, %v1423_v44 }
 0x13e   : > { %1244 = vrot.lane.b32.xlu0 %v5809_v16, %s5011_s0  ;;  %v2092_v16 = vrot.slane %v5885_v6, 1  ;;  %v2400_v15 = vsel %vm2384_vm4, %v5523_v8, %v1227_v38  ;;  %v5946_v38 = vld [vmem:[%s5362_s8 + $0xa0] sm:$0xff]   ;;  %v2261_v44 = vsel %vm2186_vm2, %v2256_v19, %v5943_v37  ;;  %v2094_v19 = vrot.slane %v5932_v29, 1 }
 0x13f   : > { %2350 = vrot.lane.b32.xlu1 %v2253_v28, %s5016_s12 }
 0x140   : > { %v1874_v26 = vpop.permute.xlu0 %1873  ;;  %v2093_v8 = vsel %vm1926_vm0, %v2090_v63, %v2092_v16  ;;  %v1757_v63 = vshrl.u32 %v5932_v29, 16 }
 0x141   : > { %v1552_v45 = vpop.permute.xlu1 %1551  ;;  %v2528_v7 = vsel %vm2514_vm6, %v2463_v5, %v1874_v26 }
 0x142   : > { %1569 = vrot.lane.b32.xlu0 %v1416_v39, %s5013_s5  ;;  %v2465_v31 = vsel %vm2449_vm5, %v2400_v15, %v1552_v45  ;;  %v1433_v45 = vshrl.u32 %v5917_v21, 16 }
 0x143   : > { %1246 = vrot.lane.b32.xlu1 %v5856_v17, %s5011_s0 }
 0x144   : > { %v2005_v52 = vpop.permute.xlu0 %2004 }
 0x145   : > { %v1876_v60 = vpop.permute.xlu1 %1875  ;;  %v2593_v55 = vsel %vm2579_vm7, %v2528_v7, %v2005_v52  ;;  %v1437_v52 = vshll.u32 %v5946_v38, 16 }
 0x146   : > { %1893 = vrot.lane.b32.xlu0 %v1740_v34, %s5014_s20  ;;  %v2530_v28 = vsel %vm2514_vm6, %v2465_v31, %v1876_v60  ;;  %v5961_v34 = vld [vmem:[%s5362_s8 + $0x1a0] sm:$0xff]   ;;  %v1755_v60 = vrot.slane %v1753_v47, 1 }
 0x147   : > { %1571 = vrot.lane.b32.xlu1 %v1424_v57, %s5013_s5  ;;  %v1432_v57 = vsel %vm1276_vm1, %v1427_v23, %v1431_v41  ;;  %v1761_v46 = vshll.u32 %v5961_v34, 16 }
 0x148   : > { %v2135_v54 = vpop.permute.xlu0 %2134  ;;  %v1756_v7 = vsel %vm1276_vm1, %v1751_v40, %v1755_v60  ;;  %v1759_v58 = vor.u32 %v1757_v63, %v1755_v60  ;;  %v1769_v63 = vshll.u32 %v6008_v43, 16 }
 0x149   : > { %v2007_v13 = vpop.permute.xlu1 %2006  ;;  %v2658_v14 = vsel %vm2644_vm8, %v2593_v55, %v2135_v54  ;;  %v1435_v54 = vor.u32 %v1433_v45, %v1431_v41  ;;  %v1964_v55 = vrot.slane %v5917_v21, 1 }
 0x14a   : > { %2024 = vrot.lane.b32.xlu0 %v1961_v62, %s5012_s3  ;;  %v2595_v35 = vsel %vm2579_vm7, %v2530_v28, %v2007_v13  ;;  %v1439_v62 = vrot.slane %v1437_v52, 1  ;;  %v1763_v13 = vrot.slane %v1761_v46, 1  ;;  %v5993_v28 = vld [vmem:[%s5362_s8 + $0xa8] sm:$0xff]  }
 0x14b   : > { %1895 = vrot.lane.b32.xlu1 %v1748_v11, %s5014_s20  ;;  %v1445_v47 = vshll.u32 %v5993_v28, 16 }
 0x14c   : > { %v2333_v17 = vpop.permute.xlu0 %2332  ;;  %v1440_v11 = vsel %vm1276_vm1, %v1435_v54, %v1439_v62  ;;  %v1764_v15 = vsel %vm1276_vm1, %v1759_v58, %v1763_v13  ;;  %v1765_v54 = vshrl.u32 %v5961_v34, 16 }
 0x14d   : > { %v2723_v22 = vsel %vm2709_vm9, %v2658_v14, %v2333_v17  ;;  %v2137_v4 = vpop.permute.xlu1 %2136  ;;  %v1447_v60 = vrot.slane %v1445_v47, 1 }
 0x14e   : > { %4482 = vmatprep.mubr.msk.bf16.mxu0 %vm2802_vm10, %v2723_v22  ;;  %2154 = vrot.lane.b32.xlu0 %v2091_v18, %s5015_s23  ;;  %v2660_v26 = vsel %vm2644_vm8, %v2595_v35, %v2137_v4  ;;  %v1965_v18 = vsel %vm1926_vm0, %v1962_v12, %v1964_v55  ;;  %v2262_v22 = vrot.slane %v1433_v45, 1  ;;  %v1966_v4 = vrot.slane %v5946_v38, 1 }
 0x14f   : > { %2026 = vrot.lane.b32.xlu1 %v1963_v24, %s5012_s3  ;;  %v1441_v12 = vshrl.u32 %v5946_v38, 16  ;;  %v1767_v58 = vor.u32 %v1765_v54, %v1763_v13 }
 0x150   : > { %v1229_v25 = vpop.permute.xlu0 %1228 }
 0x151   : > { %v2335_v39 = vpop.permute.xlu1 %2334  ;;  %v2402_v59 = vsel %vm2384_vm4, %v5538_v20, %v1229_v25  ;;  %v2263_v20 = vrot.slane %v1429_v30, 2  ;;  %v2095_v30 = vsel %vm1926_vm0, %v2092_v16, %v2094_v19  ;;  %v2266_v23 = vrot.slane %v1441_v12, 1 }
 0x152   : > { %2352 = vrot.lane.b32.xlu0 %v2257_v27, %s5016_s12  ;;  %v2725_v49 = vsel %vm2709_vm9, %v2660_v26, %v2335_v39  ;;  %v2267_v16 = vrot.slane %v1437_v52, 2 }
 0x153   : > { %2156 = vrot.lane.b32.xlu1 %v2093_v8, %s5015_s23  ;;  %4483 = vmatmul.mubr.msk.bf16.gmra.mrb[12].mxu0 %vm2802_vm10, %v2725_v49  ;;  %v2264_v31 = vor.u32 %v2263_v20, %v2262_v22  ;;  %v1967_v8 = vsel %vm1926_vm0, %v1964_v55, %v1966_v4 }
 0x154   : > { %v1554_v9 = vpop.permute.xlu0 %1553  ;;  %v6019_v52 = vor.u32 %v2267_v16, %v2266_v23 }
 0x155   : > { %v1231_v56 = vpop.permute.xlu1 %1230  ;;  %v2467_v24 = vsel %vm2449_vm5, %v2402_v59, %v1554_v9  ;;  %v2265_v41 = vsel %vm2186_vm2, %v5943_v37, %v2264_v31  ;;  %v1443_v37 = vor.u32 %v1441_v12, %v1439_v62 }
 0x156   : > { %1248 = vrot.lane.b32.xlu0 %v5885_v6, %s5011_s0  ;;  %v2096_v6 = vrot.slane %v5961_v34, 1  ;;  %v2404_v26 = vsel %vm2384_vm4, %v5571_v51, %v1231_v56  ;;  %v6022_v56 = vld [vmem:[%s5362_s8 + $0xb0] sm:$0xff]   ;;  %v2269_v62 = vsel %vm2186_vm2, %v2264_v31, %v6019_v52  ;;  %v2098_v31 = vrot.slane %v6008_v43, 1 }
 0x157   : > { %2354 = vrot.lane.b32.xlu1 %v2261_v44, %s5016_s12  ;;  %v1970_v38 = vrot.slane %v6022_v56, 1 }
 0x158   : > { %v1878_v3 = vpop.permute.xlu0 %1877  ;;  %v2097_v51 = vsel %vm1926_vm0, %v2094_v19, %v2096_v6  ;;  %v1773_v19 = vshrl.u32 %v6008_v43, 16 }
 0x159   : > { %v1556_v36 = vpop.permute.xlu1 %1555  ;;  %v2532_v1 = vsel %vm2514_vm6, %v2467_v24, %v1878_v3 }
 0x15a   : > { %1573 = vrot.lane.b32.xlu0 %v1432_v57, %s5013_s5  ;;  %v2469_v49 = vsel %vm2449_vm5, %v2404_v26, %v1556_v36  ;;  %v1449_v36 = vshrl.u32 %v5993_v28, 16 }
 0x15b   : > { %1250 = vrot.lane.b32.xlu1 %v5932_v29, %s5011_s0 }
 0x15c   : > { %v2009_v5 = vpop.permute.xlu0 %2008 }
 0x15d   : > { %v1880_v14 = vpop.permute.xlu1 %1879  ;;  %v2597_v2 = vsel %vm2579_vm7, %v2532_v1, %v2009_v5  ;;  %v1453_v5 = vshll.u32 %v6022_v56, 16 }
 0x15e   : > { %1897 = vrot.lane.b32.xlu0 %v1756_v7, %s5014_s20  ;;  %v2534_v44 = vsel %vm2514_vm6, %v2469_v49, %v1880_v14  ;;  %v6037_v7 = vld [vmem:[%s5362_s8 + $0x1b0] sm:$0xff]   ;;  %v1771_v14 = vrot.slane %v1769_v63, 1 }
 0x15f   : > { %1575 = vrot.lane.b32.xlu1 %v1440_v11, %s5013_s5  ;;  %v1448_v11 = vsel %vm1276_vm1, %v1443_v37, %v1447_v60  ;;  %v1777_v22 = vshll.u32 %v6037_v7, 16 }
 0x160   : > { %v2139_v17 = vpop.permute.xlu0 %2138  ;;  %v1772_v1 = vsel %vm1276_vm1, %v1767_v58, %v1771_v14  ;;  %v1775_v12 = vor.u32 %v1773_v19, %v1771_v14 }
 0x161   : > { %v2011_v25 = vpop.permute.xlu1 %2010  ;;  %v2662_v27 = vsel %vm2644_vm8, %v2597_v2, %v2139_v17  ;;  %v1451_v17 = vor.u32 %v1449_v36, %v1447_v60  ;;  %v1968_v2 = vrot.slane %v5993_v28, 1  ;;  %v2270_v28 = vrot.slane %v1449_v36, 1  ;;  %v6098_v36 = vld [vmem:[%s5362_s8 + $0xc0] sm:$0xff]  }
 0x162   : > { %2028 = vrot.lane.b32.xlu0 %v1965_v18, %s5012_s3  ;;  %v2599_v45 = vsel %vm2579_vm7, %v2534_v44, %v2011_v25  ;;  %v1455_v18 = vrot.slane %v1453_v5, 1  ;;  %v1779_v25 = vrot.slane %v1777_v22, 1  ;;  %v1469_v22 = vshll.u32 %v6098_v36, 16 }
 0x163   : > { %1899 = vrot.lane.b32.xlu1 %v1764_v15, %s5014_s20  ;;  %v1971_v44 = vsel %vm1926_vm0, %v1968_v2, %v1970_v38 }
 0x164   : > { %v2337_v29 = vpop.permute.xlu0 %2336  ;;  %v1456_v15 = vsel %vm1276_vm1, %v1451_v17, %v1455_v18  ;;  %v1780_v16 = vsel %vm1276_vm1, %v1775_v12, %v1779_v25 }
 0x165   : > { %v2727_v35 = vsel %vm2709_vm9, %v2662_v27, %v2337_v29  ;;  %v2141_v39 = vpop.permute.xlu1 %2140 }
 0x166   : > { %4486 = vmatprep.mubr.msk.bf16.mxu0 %vm2802_vm10, %v2727_v35  ;;  %2158 = vrot.lane.b32.xlu0 %v2095_v30, %s5015_s23  ;;  %v2664_v3 = vsel %vm2644_vm8, %v2599_v45, %v2141_v39  ;;  %v1969_v30 = vsel %vm1926_vm0, %v1966_v4, %v1968_v2  ;;  %v1457_v4 = vshrl.u32 %v6022_v56, 16  ;;  %v2100_v45 = vrot.slane %v6037_v7, 1 }
 0x167   : > { %2030 = vrot.lane.b32.xlu1 %v1967_v8, %s5012_s3  ;;  %v1974_v56 = vrot.slane %v6098_v36, 1 }
 0x168   : > { %v1233_v9 = vpop.permute.xlu0 %1232 }
 0x169   : > { %v2339_v57 = vpop.permute.xlu1 %2338  ;;  %v2406_v13 = vsel %vm2384_vm4, %v5584_v61, %v1233_v9  ;;  %v2271_v61 = vrot.slane %v1445_v47, 2  ;;  %v6069_v47 = vld [vmem:[%s5362_s8 + $0xb8] sm:$0xff]  }
 0x16a   : > { %2356 = vrot.lane.b32.xlu0 %v2265_v41, %s5016_s12  ;;  %v2729_v46 = vsel %vm2709_vm9, %v2664_v3, %v2339_v57  ;;  %v2099_v41 = vsel %vm1926_vm0, %v2096_v6, %v2098_v31  ;;  %v2275_v6 = vrot.slane %v1453_v5, 2  ;;  %v6084_v57 = vld [vmem:[%s5362_s8 + $0x1b8] sm:$0xff]   ;;  %v1465_v19 = vshrl.u32 %v6069_v47, 16 }
 0x16b   : > { %2160 = vrot.lane.b32.xlu1 %v2097_v51, %s5015_s23  ;;  %4487 = vmatmul.mubr.msk.bf16.gmra.mrb[16].mxu0 %vm2802_vm10, %v2729_v46  ;;  %v1785_v58 = vshll.u32 %v6084_v57, 16 }
 0x16c   : > { %v1558_v40 = vpop.permute.xlu0 %1557 }
 0x16d   : > { %v1235_v55 = vpop.permute.xlu1 %1234  ;;  %v2471_v35 = vsel %vm2449_vm5, %v2406_v13, %v1558_v40  ;;  %v1461_v40 = vshll.u32 %v6069_v47, 16  ;;  %v1787_v13 = vrot.slane %v1785_v58, 1 }
 0x16e   : > { %1252 = vrot.lane.b32.xlu0 %v5961_v34, %s5011_s0  ;;  %v2274_v34 = vrot.slane %v1457_v4, 1  ;;  %v2408_v51 = vsel %vm2384_vm4, %v5613_v32, %v1235_v55  ;;  %v2101_v32 = vsel %vm1926_vm0, %v2098_v31, %v2100_v45 }
 0x16f   : > { %2358 = vrot.lane.b32.xlu1 %v2269_v62, %s5016_s12  ;;  %v1459_v62 = vor.u32 %v1457_v4, %v1455_v18 }
 0x170   : > { %v1882_v59 = vpop.permute.xlu0 %1881 }
 0x171   : > { %v1560_v20 = vpop.permute.xlu1 %1559  ;;  %v2536_v8 = vsel %vm2514_vm6, %v2471_v35, %v1882_v59  ;;  %v1463_v59 = vrot.slane %v1461_v40, 1 }
 0x172   : > { %1577 = vrot.lane.b32.xlu0 %v1448_v11, %s5013_s5  ;;  %v2473_v60 = vsel %vm2449_vm5, %v2408_v51, %v1560_v20  ;;  %v1781_v11 = vshrl.u32 %v6037_v7, 16  ;;  %v6113_v20 = vld [vmem:[%s5362_s8 + $0x1c0] sm:$0xff]  }
 0x173   : > { %1254 = vrot.lane.b32.xlu1 %v6008_v43, %s5011_s0  ;;  %v2272_v43 = vor.u32 %v2271_v61, %v2270_v28  ;;  %v1467_v12 = vor.u32 %v1465_v19, %v1463_v59  ;;  %v1972_v61 = vrot.slane %v6069_v47, 1 }
 0x174   : > { %v2013_v24 = vpop.permute.xlu0 %2012  ;;  %v1783_v2 = vor.u32 %v1781_v11, %v1779_v25 }
 0x175   : > { %v1884_v27 = vpop.permute.xlu1 %1883  ;;  %v2601_v23 = vsel %vm2579_vm7, %v2536_v8, %v2013_v24  ;;  %v2273_v3 = vsel %vm2186_vm2, %v6019_v52, %v2272_v43  ;;  %v6095_v52 = vor.u32 %v2275_v6, %v2274_v34 }
 0x176   : > { %1901 = vrot.lane.b32.xlu0 %v1772_v1, %s5014_s20  ;;  %v2538_v63 = vsel %vm2514_vm6, %v2473_v60, %v1884_v27  ;;  %v1464_v1 = vsel %vm1276_vm1, %v1459_v62, %v1463_v59  ;;  %v1471_v27 = vrot.slane %v1469_v22, 1  ;;  %v1788_v28 = vsel %vm1276_vm1, %v1783_v2, %v1787_v13 }
 0x177   : > { %1579 = vrot.lane.b32.xlu1 %v1456_v15, %s5013_s5  ;;  %v2277_v18 = vsel %vm2186_vm2, %v2272_v43, %v6095_v52 }
 0x178   : > { %v2143_v29 = vpop.permute.xlu0 %2142  ;;  %v1472_v8 = vsel %vm1276_vm1, %v1467_v12, %v1471_v27 }
 0x179   : > { %v2015_v26 = vpop.permute.xlu1 %2014  ;;  %v2666_v39 = vsel %vm2644_vm8, %v2601_v23, %v2143_v29  ;;  %v1789_v29 = vshrl.u32 %v6084_v57, 16 }
 0x17a   : > { %2032 = vrot.lane.b32.xlu0 %v1969_v30, %s5012_s3  ;;  %v2603_v46 = vsel %vm2579_vm7, %v2538_v63, %v2015_v26  ;;  %v1793_v30 = vshll.u32 %v6113_v20, 16  ;;  %v1973_v26 = vsel %vm1926_vm0, %v1970_v38, %v1972_v61  ;;  %v1473_v38 = vshrl.u32 %v6098_v36, 16 }
 0x17b   : > { %1903 = vrot.lane.b32.xlu1 %v1780_v16, %s5014_s20  ;;  %v1791_v23 = vor.u32 %v1789_v29, %v1787_v13  ;;  %v2283_v63 = vrot.slane %v1469_v22, 2 }
 0x17c   : > { %v2341_v9 = vpop.permute.xlu0 %2340  ;;  %v1795_v16 = vrot.slane %v1793_v30, 1  ;;  %v6189_v30 = vld [vmem:[%s5362_s8 + $0x1d0] sm:$0xff]  }
 0x17d   : > { %v2731_v49 = vsel %vm2709_vm9, %v2666_v39, %v2341_v9  ;;  %v2145_v37 = vpop.permute.xlu1 %2144  ;;  %v2102_v39 = vrot.slane %v6084_v57, 1  ;;  %v2278_v9 = vrot.slane %v1465_v19, 1 }
 0x17e   : > { %4490 = vmatprep.mubr.msk.bf16.mxu0 %vm2802_vm10, %v2731_v49  ;;  %2162 = vrot.lane.b32.xlu0 %v2099_v41, %s5015_s23  ;;  %v2668_v5 = vsel %vm2644_vm8, %v2603_v46, %v2145_v37  ;;  %v2279_v41 = vrot.slane %v1461_v40, 2 }
 0x17f   : > { %2034 = vrot.lane.b32.xlu1 %v1971_v44, %s5012_s3  ;;  %v1796_v44 = vsel %vm1276_vm1, %v1791_v23, %v1795_v16  ;;  %v2103_v51 = vsel %vm1926_vm0, %v2100_v45, %v2102_v39  ;;  %v2282_v45 = vrot.slane %v1473_v38, 1 }
 0x180   : > { %v1237_v54 = vpop.permute.xlu0 %1236  ;;  %v2280_v37 = vor.u32 %v2279_v41, %v2278_v9 }
 0x181   : > { %v2343_v55 = vpop.permute.xlu1 %2342  ;;  %v2410_v25 = vsel %vm2384_vm4, %v5625_v42, %v1237_v54  ;;  %v1975_v54 = vsel %vm1926_vm0, %v1972_v61, %v1974_v56 }
 0x182   : > { %2360 = vrot.lane.b32.xlu0 %v2273_v3, %s5016_s12  ;;  %v2733_v14 = vsel %vm2709_vm9, %v2668_v5, %v2343_v55  ;;  %v6144_v3 = vld [vmem:[%s5362_s8 + $0xc8] sm:$0xff]   ;;  %v2281_v62 = vsel %vm2186_vm2, %v6095_v52, %v2280_v37  ;;  %v6171_v52 = vor.u32 %v2283_v63, %v2282_v45 }
 0x183   : > { %2164 = vrot.lane.b32.xlu1 %v2101_v32, %s5015_s23  ;;  %4491 = vmatmul.mubr.msk.bf16.gmra.mrb[20].mxu0 %vm2802_vm10, %v2733_v14  ;;  %v6160_v5 = vld [vmem:[%s5362_s8 + $0x1c8] sm:$0xff]   ;;  %v1477_v55 = vshll.u32 %v6144_v3, 16  ;;  %v1976_v41 = vrot.slane %v6144_v3, 1 }
 0x184   : > { %v1562_v17 = vpop.permute.xlu0 %1561  ;;  %v1801_v2 = vshll.u32 %v6160_v5, 16  ;;  %v2285_v12 = vsel %vm2186_vm2, %v2280_v37, %v6171_v52 }
 0x185   : > { %v1239_v24 = vpop.permute.xlu1 %1238  ;;  %v2475_v49 = vsel %vm2449_vm5, %v2410_v25, %v1562_v17  ;;  %v1475_v17 = vor.u32 %v1473_v38, %v1471_v27  ;;  %v1481_v27 = vshrl.u32 %v6144_v3, 16  ;;  %v2287_v37 = vrot.slane %v1477_v55, 2 }
 0x186   : > { %1256 = vrot.lane.b32.xlu0 %v6037_v7, %s5011_s0  ;;  %v2104_v7 = vrot.slane %v6113_v20, 1  ;;  %v2412_v46 = vsel %vm2384_vm4, %v5684_v33, %v1239_v24  ;;  %v1479_v24 = vrot.slane %v1477_v55, 1 }
 0x187   : > { %2362 = vrot.lane.b32.xlu1 %v2277_v18, %s5016_s12  ;;  %v6174_v18 = vld [vmem:[%s5362_s8 + $0xd0] sm:$0xff]  }
 0x188   : > { %v1886_v15 = vpop.permute.xlu0 %1885  ;;  %v2105_v33 = vsel %vm1926_vm0, %v2102_v39, %v2104_v7  ;;  %v1485_v29 = vshll.u32 %v6174_v18, 16  ;;  %v1978_v36 = vrot.slane %v6174_v18, 1 }
 0x189   : > { %v1564_v31 = vpop.permute.xlu1 %1563  ;;  %v2540_v42 = vsel %vm2514_vm6, %v2475_v49, %v1886_v15 }
 0x18a   : > { %1581 = vrot.lane.b32.xlu0 %v1464_v1, %s5013_s5  ;;  %v2477_v59 = vsel %vm2449_vm5, %v2412_v46, %v1564_v31  ;;  %v1797_v1 = vshrl.u32 %v6113_v20, 16  ;;  %v1487_v23 = vrot.slane %v1485_v29, 1 }
 0x18b   : > { %1258 = vrot.lane.b32.xlu1 %v6084_v57, %s5011_s0 }
 0x18c   : > { %v2017_v35 = vpop.permute.xlu0 %2016  ;;  %v1799_v61 = vor.u32 %v1797_v1, %v1795_v16 }
 0x18d   : > { %v1888_v4 = vpop.permute.xlu1 %1887  ;;  %v2605_v34 = vsel %vm2579_vm7, %v2540_v42, %v2017_v35  ;;  %v1803_v35 = vrot.slane %v1801_v2, 1 }
 0x18e   : > { %1905 = vrot.lane.b32.xlu0 %v1788_v28, %s5014_s20  ;;  %v2542_v58 = vsel %vm2514_vm6, %v2477_v59, %v1888_v4  ;;  %v1480_v28 = vsel %vm1276_vm1, %v1475_v17, %v1479_v24  ;;  %v1805_v4 = vshrl.u32 %v6160_v5, 16  ;;  %v1979_v59 = vsel %vm1926_vm0, %v1976_v41, %v1978_v36  ;;  %v6236_v17 = vld [vmem:[%s5362_s8 + $0x1d8] sm:$0xff]  }
 0x18f   : > { %1583 = vrot.lane.b32.xlu1 %v1472_v8, %s5013_s5  ;;  %v1483_v8 = vor.u32 %v1481_v27, %v1479_v24  ;;  %v1804_v9 = vsel %vm1276_vm1, %v1799_v61, %v1803_v35 }
 0x190   : > { %v2147_v43 = vpop.permute.xlu0 %2146  ;;  %v1807_v42 = vor.u32 %v1805_v4, %v1803_v35  ;;  %v6265_v4 = vld [vmem:[%s5362_s8 + $0x1e0] sm:$0xff]  }
 0x191   : > { %v2019_v6 = vpop.permute.xlu1 %2018  ;;  %v2670_v57 = vsel %vm2644_vm8, %v2605_v34, %v2147_v43  ;;  %v1488_v49 = vsel %vm1276_vm1, %v1483_v8, %v1487_v23  ;;  %v1977_v34 = vsel %vm1926_vm0, %v1974_v56, %v1976_v41  ;;  %v1489_v56 = vshrl.u32 %v6174_v18, 16 }
 0x192   : > { %2036 = vrot.lane.b32.xlu0 %v1973_v26, %s5012_s3  ;;  %v2607_v14 = vsel %vm2579_vm7, %v2542_v58, %v2019_v6  ;;  %v1809_v26 = vshll.u32 %v6189_v30, 16  ;;  %v2106_v6 = vrot.slane %v6160_v5, 1 }
 0x193   : > { %1907 = vrot.lane.b32.xlu1 %v1796_v44, %s5014_s20 }
 0x194   : > { %v2345_v40 = vpop.permute.xlu0 %2344  ;;  %v1811_v44 = vrot.slane %v1809_v26, 1  ;;  %v2107_v63 = vsel %vm1926_vm0, %v2104_v7, %v2106_v6  ;;  %v2290_v7 = vrot.slane %v1489_v56, 1 }
 0x195   : > { %v2735_v60 = vsel %vm2709_vm9, %v2670_v57, %v2345_v40  ;;  %v2149_v32 = vpop.permute.xlu1 %2148 }
 0x196   : > { %2166 = vrot.lane.b32.xlu0 %v2103_v51, %s5015_s23  ;;  %4494 = vmatprep.mubr.msk.bf16.mxu0 %vm2802_vm10, %v2735_v60  ;;  %v2672_v19 = vsel %vm2644_vm8, %v2607_v14, %v2149_v32  ;;  %v2286_v51 = vrot.slane %v1481_v27, 1  ;;  %v1812_v60 = vsel %vm1276_vm1, %v1807_v42, %v1811_v44  ;;  %v6220_v32 = vld [vmem:[%s5362_s8 + $0xd8] sm:$0xff]   ;;  %v1821_v42 = vshrl.u32 %v6236_v17, 16 }
 0x197   : > { %2038 = vrot.lane.b32.xlu1 %v1975_v54, %s5012_s3  ;;  %v1497_v8 = vshrl.u32 %v6220_v32, 16 }
 0x198   : > { %v1241_v11 = vpop.permute.xlu0 %1240  ;;  %v2288_v46 = vor.u32 %v2287_v37, %v2286_v51  ;;  %v1980_v51 = vrot.slane %v6220_v32, 1 }
 0x199   : > { %v2347_v22 = vpop.permute.xlu1 %2346  ;;  %v2414_v16 = vsel %vm2384_vm4, %v5717_v53, %v1241_v11  ;;  %v2291_v11 = vrot.slane %v1485_v29, 2 }
 0x19a   : > { %2364 = vrot.lane.b32.xlu0 %v2281_v62, %s5016_s12  ;;  %v2737_v13 = vsel %vm2709_vm9, %v2672_v19, %v2347_v22  ;;  %v1493_v19 = vshll.u32 %v6220_v32, 16 }
 0x19b   : > { %2168 = vrot.lane.b32.xlu1 %v2105_v33, %s5015_s23  ;;  %4495 = vmatmul.mubr.msk.bf16.gmra.mrb[24].mxu0 %vm2802_vm10, %v2737_v13  ;;  %v2289_v33 = vsel %vm2186_vm2, %v6171_v52, %v2288_v46  ;;  %v6247_v52 = vor.u32 %v2291_v11, %v2290_v7  ;;  %v1491_v13 = vor.u32 %v1489_v56, %v1487_v23 }
 0x19c   : > { %v1566_v15 = vpop.permute.xlu0 %1565  ;;  %v1495_v29 = vrot.slane %v1493_v19, 1  ;;  %v1981_v56 = vsel %vm1926_vm0, %v1978_v36, %v1980_v51 }
 0x19d   : > { %v1243_v31 = vpop.permute.xlu1 %1242  ;;  %v2479_v40 = vsel %vm2449_vm5, %v2414_v16, %v1566_v15  ;;  %v6250_v15 = vld [vmem:[%s5362_s8 + $0xe0] sm:$0xff]  }
 0x19e   : > { %1260 = vrot.lane.b32.xlu0 %v6113_v20, %s5011_s0  ;;  %v2108_v20 = vrot.slane %v6189_v30, 1  ;;  %v2416_v58 = vsel %vm2384_vm4, %v5765_v48, %v1243_v31  ;;  %v1813_v31 = vshrl.u32 %v6189_v30, 16  ;;  %v1501_v23 = vshll.u32 %v6250_v15, 16 }
 0x19f   : > { %2366 = vrot.lane.b32.xlu1 %v2285_v12, %s5016_s12  ;;  %v1499_v16 = vor.u32 %v1497_v8, %v1495_v29  ;;  %v1505_v36 = vshrl.u32 %v6250_v15, 16 }
 0x1a0   : > { %v1890_v25 = vpop.permute.xlu0 %1889  ;;  %v2109_v48 = vsel %vm1926_vm0, %v2106_v6, %v2108_v20 }
 0x1a1   : > { %v1568_v39 = vpop.permute.xlu1 %1567  ;;  %v2544_v53 = vsel %vm2514_vm6, %v2479_v40, %v1890_v25  ;;  %v2293_v25 = vsel %vm2186_vm2, %v2288_v46, %v6247_v52 }
 0x1a2   : > { %1585 = vrot.lane.b32.xlu0 %v1480_v28, %s5013_s5  ;;  %v2481_v22 = vsel %vm2449_vm5, %v2416_v58, %v1568_v39  ;;  %v1817_v28 = vshll.u32 %v6236_v17, 16  ;;  %v1496_v39 = vsel %vm1276_vm1, %v1491_v13, %v1495_v29  ;;  %v6312_v13 = vld [vmem:[%s5362_s8 + $0x1e8] sm:$0xff]  }
 0x1a3   : > { %1262 = vrot.lane.b32.xlu1 %v6160_v5, %s5011_s0 }
 0x1a4   : > { %v2021_v43 = vpop.permute.xlu0 %2020  ;;  %v1819_v41 = vrot.slane %v1817_v28, 1 }
 0x1a5   : > { %v1892_v38 = vpop.permute.xlu1 %1891  ;;  %v2609_v54 = vsel %vm2579_vm7, %v2544_v53, %v2021_v43 }
 0x1a6   : > { %1909 = vrot.lane.b32.xlu0 %v1804_v9, %s5014_s20  ;;  %v2546_v1 = vsel %vm2514_vm6, %v2481_v22, %v1892_v38  ;;  %v1815_v9 = vor.u32 %v1813_v31, %v1811_v44  ;;  %v1825_v38 = vshll.u32 %v6265_v4, 16  ;;  %v1823_v40 = vor.u32 %v1821_v42, %v1819_v41  ;;  %v6341_v42 = vld [vmem:[%s5362_s8 + $0x1f0] sm:$0xff]  }
 0x1a7   : > { %1587 = vrot.lane.b32.xlu1 %v1488_v49, %s5013_s5  ;;  %v1503_v49 = vrot.slane %v1501_v23, 1 }
 0x1a8   : > { %v2151_v57 = vpop.permute.xlu0 %2150  ;;  %v1820_v6 = vsel %vm1276_vm1, %v1815_v9, %v1819_v41  ;;  %v1827_v53 = vrot.slane %v1825_v38, 1 }
 0x1a9   : > { %v2023_v45 = vpop.permute.xlu1 %2022  ;;  %v2674_v62 = vsel %vm2644_vm8, %v2609_v54, %v2151_v57  ;;  %v1504_v57 = vsel %vm1276_vm1, %v1499_v16, %v1503_v49  ;;  %v2110_v54 = vrot.slane %v6236_v17, 1 }
 0x1aa   : > { %2040 = vrot.lane.b32.xlu0 %v1977_v34, %s5012_s3  ;;  %v2611_v2 = vsel %vm2579_vm7, %v2546_v1, %v2023_v45  ;;  %v2294_v45 = vrot.slane %v1497_v8, 1 }
 0x1ab   : > { %1911 = vrot.lane.b32.xlu1 %v1812_v60, %s5014_s20  ;;  %v2111_v11 = vsel %vm1926_vm0, %v2108_v20, %v2110_v54  ;;  %v2298_v20 = vrot.slane %v1505_v36, 1 }
 0x1ac   : > { %v2349_v5 = vpop.permute.xlu0 %2348 }
 0x1ad   : > { %v2739_v55 = vsel %vm2709_vm9, %v2674_v62, %v2349_v5  ;;  %v2153_v14 = vpop.permute.xlu1 %2152  ;;  %v1828_v5 = vsel %vm1276_vm1, %v1823_v40, %v1827_v53  ;;  %v1837_v40 = vshrl.u32 %v6312_v13, 16 }
 0x1ae   : > { %2170 = vrot.lane.b32.xlu0 %v2107_v63, %s5015_s23  ;;  %4498 = vmatprep.mubr.msk.bf16.mxu0 %vm2802_vm10, %v2739_v55  ;;  %v2676_v12 = vsel %vm2644_vm8, %v2611_v2, %v2153_v14  ;;  %v2295_v63 = vrot.slane %v1493_v19, 2  ;;  %v1982_v55 = vrot.slane %v6250_v15, 1  ;;  %v6296_v14 = vld [vmem:[%s5362_s8 + $0xe8] sm:$0xff]  }
 0x1af   : > { %2042 = vrot.lane.b32.xlu1 %v1979_v59, %s5012_s3  ;;  %v1513_v16 = vshrl.u32 %v6296_v14, 16 }
 0x1b0   : > { %v1245_v24 = vpop.permute.xlu0 %1244  ;;  %v2296_v58 = vor.u32 %v2295_v63, %v2294_v45  ;;  %v1983_v22 = vsel %vm1926_vm0, %v1980_v51, %v1982_v55 }
 0x1b1   : > { %v2351_v27 = vpop.permute.xlu1 %2350  ;;  %v2418_v44 = vsel %vm2384_vm4, %v5794_v50, %v1245_v24  ;;  %v2299_v24 = vrot.slane %v1501_v23, 2 }
 0x1b2   : > { %2368 = vrot.lane.b32.xlu0 %v2289_v33, %s5016_s12  ;;  %v2741_v61 = vsel %vm2709_vm9, %v2676_v12, %v2351_v27  ;;  %v1509_v12 = vshll.u32 %v6296_v14, 16 }
 0x1b3   : > { %2172 = vrot.lane.b32.xlu1 %v2109_v48, %s5015_s23  ;;  %4499 = vmatmul.mubr.msk.bf16.gmra.mrb[28].mxu0 %vm2802_vm10, %v2741_v61  ;;  %v2297_v48 = vsel %vm2186_vm2, %v6247_v52, %v2296_v58  ;;  %v6323_v52 = vor.u32 %v2299_v24, %v2298_v20  ;;  %v1507_v61 = vor.u32 %v1505_v36, %v1503_v49 }
 0x1b4   : > { %v1570_v35 = vpop.permute.xlu0 %1569  ;;  %v1511_v23 = vrot.slane %v1509_v12, 1 }
 0x1b5   : > { %v1247_v26 = vpop.permute.xlu1 %1246  ;;  %v2483_v62 = vsel %vm2449_vm5, %v2418_v44, %v1570_v35  ;;  %v6326_v35 = vld [vmem:[%s5362_s8 + $0xf0] sm:$0xff]  }
 0x1b6   : > { %1264 = vrot.lane.b32.xlu0 %v6189_v30, %s5011_s0  ;;  %v2112_v30 = vrot.slane %v6265_v4, 1  ;;  %v2420_v1 = vsel %vm2384_vm4, %v5841_v0, %v1247_v26  ;;  %v1829_v26 = vshrl.u32 %v6265_v4, 16  ;;  %v1517_v49 = vshll.u32 %v6326_v35, 16 }
 0x1b7   : > { %2370 = vrot.lane.b32.xlu1 %v2293_v25, %s5016_s12  ;;  %v1515_v44 = vor.u32 %v1513_v16, %v1511_v23  ;;  %v1521_v63 = vshrl.u32 %v6326_v35, 16  ;;  %v1986_v24 = vrot.slane %v6326_v35, 1 }
 0x1b8   : > { %v1894_v43 = vpop.permute.xlu0 %1893  ;;  %v2113_v0 = vsel %vm1926_vm0, %v2110_v54, %v2112_v30 }
 0x1b9   : > { %v1572_v34 = vpop.permute.xlu1 %1571  ;;  %v2548_v50 = vsel %vm2514_vm6, %v2483_v62, %v1894_v43  ;;  %v2301_v43 = vsel %vm2186_vm2, %v2296_v58, %v6323_v52 }
 0x1ba   : > { %1589 = vrot.lane.b32.xlu0 %v1496_v39, %s5013_s5  ;;  %v2485_v27 = vsel %vm2449_vm5, %v2420_v1, %v1572_v34  ;;  %v1833_v39 = vshll.u32 %v6312_v13, 16  ;;  %v1512_v34 = vsel %vm1276_vm1, %v1507_v61, %v1511_v23 }
 0x1bb   : > { %1266 = vrot.lane.b32.xlu1 %v6236_v17, %s5011_s0 }
 0x1bc   : > { %v2025_v37 = vpop.permute.xlu0 %2024  ;;  %v1835_v51 = vrot.slane %v1833_v39, 1 }
 0x1bd   : > { %v1896_v60 = vpop.permute.xlu1 %1895  ;;  %v2613_v59 = vsel %vm2579_vm7, %v2548_v50, %v2025_v37 }
 0x1be   : > { %1913 = vrot.lane.b32.xlu0 %v1820_v6, %s5014_s20  ;;  %v2550_v31 = vsel %vm2514_vm6, %v2485_v27, %v1896_v60  ;;  %v1831_v6 = vor.u32 %v1829_v26, %v1827_v53  ;;  %v1841_v60 = vshll.u32 %v6341_v42, 16  ;;  %v1984_v53 = vrot.slane %v6296_v14, 1 }
 0x1bf   : > { %1591 = vrot.lane.b32.xlu1 %v1504_v57, %s5013_s5  ;;  %v6348_v57 = vrot.slane %v1517_v49, 1  ;;  %v1839_v50 = vor.u32 %v1837_v40, %v1835_v51 }
 0x1c0   : > { %v2155_v46 = vpop.permute.xlu0 %2154  ;;  %v1836_v54 = vsel %vm1276_vm1, %v1831_v6, %v1835_v51 }
 0x1c1   : > { %v2027_v7 = vpop.permute.xlu1 %2026  ;;  %v2678_v33 = vsel %vm2644_vm8, %v2613_v59, %v2155_v46  ;;  %v1520_v62 = vsel %vm1276_vm1, %v1515_v44, %v6348_v57  ;;  %v1985_v59 = vsel %vm1926_vm0, %v1982_v55, %v1984_v53  ;;  %v6429_v44 = vld [vmem:[%s699_s24] sm:$0xf] }
 0x1c2   : > { %2044 = vrot.lane.b32.xlu0 %v1981_v56, %s5012_s3  ;;  %v2615_v28 = vsel %vm2579_vm7, %v2550_v31, %v2027_v7  ;;  %v2114_v7 = vrot.slane %v6312_v13, 1 }
 0x1c3   : > { %1915 = vrot.lane.b32.xlu1 %v1828_v5, %s5014_s20  ;;  %v6363_v5 = vrot.slane %v1841_v60, 1 }
 0x1c4   : > { %v2353_v17 = vpop.permute.xlu0 %2352 }
 0x1c5   : > { %v2743_v19 = vsel %vm2709_vm9, %v2678_v33, %v2353_v17  ;;  %v2157_v2 = vpop.permute.xlu1 %2156  ;;  %v2306_v33 = vrot.slane %v1521_v63, 1  ;;  %v2307_v17 = vrot.slane %v1517_v49, 2  ;;  %v1844_v55 = vsel %vm1276_vm1, %v1839_v50, %v6363_v5 }
 0x1c6   : > { %2174 = vrot.lane.b32.xlu0 %v2111_v11, %s5015_s23  ;;  %4502 = vmatprep.mubr.msk.bf16.mxu1 %vm2802_vm10, %v2743_v19  ;;  %v2680_v25 = vsel %vm2644_vm8, %v2615_v28, %v2157_v2  ;;  %v2303_v11 = vrot.slane %v1509_v12, 2 }
 0x1c7   : > { %2046 = vrot.lane.b32.xlu1 %v1983_v22, %s5012_s3  ;;  %v6372_v22 = vld [vmem:[%s5362_s8 + $0xf8] sm:$0xff]   ;;  %v6386_v31 = vor.u32 %v2307_v17, %v2306_v33 }
 0x1c8   : > { %v1249_v29 = vpop.permute.xlu0 %1248 }
 0x1c9   : > { %v2355_v8 = vpop.permute.xlu1 %2354  ;;  %v2422_v46 = vsel %vm2384_vm4, %v5870_v10, %v1249_v29  ;;  %v2302_v10 = vrot.slane %v1513_v16, 1  ;;  %v2116_v29 = vrot.slane %v6341_v42, 1 }
 0x1ca   : > { %2372 = vrot.lane.b32.xlu0 %v2297_v48, %s5016_s12  ;;  %v2745_v9 = vsel %vm2709_vm9, %v2680_v25, %v2355_v8  ;;  %v2115_v48 = vsel %vm1926_vm0, %v2112_v30, %v2114_v7  ;;  %v1987_v30 = vsel %vm1926_vm0, %v1984_v53, %v1986_v24  ;;  %v6403_v8 = vld [vmem:[%s5362_s8 + $0x1f8] sm:$0xff]  }
 0x1cb   : > { %2176 = vrot.lane.b32.xlu1 %v2113_v0, %s5015_s23  ;;  %4503 = vmatmul.mubr.msk.bf16.vlgmr.msra.gmra.mrb[0].mxu1 %vm2802_vm10, %v2745_v9  ;;  %v1523_v9 = vor.u32 %v1521_v63, %v6348_v57  ;;  %v1845_v57 = vshrl.u32 %v6341_v42, 16 }
 0x1cc   : > { %v1574_v41 = vpop.permute.xlu0 %1573 }
 0x1cd   : > { %v1251_v38 = vpop.permute.xlu1 %1250  ;;  %v2487_v19 = vsel %vm2449_vm5, %v2422_v46, %v1574_v41 }
 0x1ce   : > { %1268 = vrot.lane.b32.xlu0 %v6265_v4, %s5011_s0  ;;  %v1525_v4 = vshll.u32 %v6372_v22, 16  ;;  %v2424_v0 = vsel %vm2384_vm4, %v5917_v21, %v1251_v38  ;;  %v2117_v21 = vsel %vm1926_vm0, %v2114_v7, %v2116_v29  ;;  %v1529_v38 = vshrl.u32 %v6372_v22, 16 }
 0x1cf   : > { %2374 = vrot.lane.b32.xlu1 %v2301_v43, %s5016_s12 }
 0x1d0   : > { %v1898_v37 = vpop.permute.xlu0 %1897  ;;  %v1527_v49 = vrot.slane %v1525_v4, 1 }
 0x1d1   : > { %v1576_v56 = vpop.permute.xlu1 %1575  ;;  %v2552_v20 = vsel %vm2514_vm6, %v2487_v19, %v1898_v37 }
 0x1d2   : > { %1593 = vrot.lane.b32.xlu0 %v1512_v34, %s5013_s5  ;;  %v2489_v23 = vsel %vm2449_vm5, %v2424_v0, %v1576_v56  ;;  %v1531_v0 = vor.u32 %v1529_v38, %v1527_v49 }
 0x1d3   : > { %1270 = vrot.lane.b32.xlu1 %v6312_v13, %s5011_s0  ;;  %v2304_v13 = vor.u32 %v2303_v11, %v2302_v10  ;;  %v1528_v10 = vsel %vm1276_vm1, %v1523_v9, %v1527_v49  ;;  %v1533_v11 = vshll.u32 %v6429_v44, 16 }
 0x1d4   : > { %v2029_v45 = vpop.permute.xlu0 %2028 }
 0x1d5   : > { %v1900_v36 = vpop.permute.xlu1 %1899  ;;  %v2617_v1 = vsel %vm2579_vm7, %v2552_v20, %v2029_v45  ;;  %v2305_v25 = vsel %vm2186_vm2, %v6323_v52, %v2304_v13  ;;  %v2309_v52 = vsel %vm2186_vm2, %v2304_v13, %v6386_v31  ;;  %v1849_v45 = vshll.u32 %v6403_v8, 16  ;;  %v6457_v13 = vld [vmem:[%s699_s24 + $0x4] sm:$0xf] }
 0x1d6   : > { %1917 = vrot.lane.b32.xlu0 %v1836_v54, %s5014_s20  ;;  %v2554_v41 = vsel %vm2514_vm6, %v2489_v23, %v1900_v36  ;;  %v1853_v23 = vshrl.u32 %v6403_v8, 16 }
 0x1d7   : > { %1595 = vrot.lane.b32.xlu1 %v1520_v62, %s5013_s5 }
 0x1d8   : > { %v2159_v58 = vpop.permute.xlu0 %2158 }
 0x1d9   : > { %v2031_v2 = vpop.permute.xlu1 %2030  ;;  %v2682_v12 = vsel %vm2644_vm8, %v2617_v1, %v2159_v58 }
 0x1da   : > { %2048 = vrot.lane.b32.xlu0 %v1985_v59, %s5012_s3  ;;  %v2619_v34 = vsel %vm2579_vm7, %v2554_v41, %v2031_v2  ;;  %v1847_v2 = vor.u32 %v1845_v57, %v6363_v5  ;;  %v1988_v41 = vrot.slane %v6372_v22, 1 }
 0x1db   : > { %1919 = vrot.lane.b32.xlu1 %v1844_v55, %s5014_s20 }
 0x1dc   : > { %v2357_v27 = vpop.permute.xlu0 %2356  ;;  %v1989_v57 = vsel %vm1926_vm0, %v1986_v24, %v1988_v41  ;;  %v1990_v24 = vrot.slane %v6429_v44, 1 }
 0x1dd   : > { %v2747_v28 = vsel %vm2709_vm9, %v2682_v12, %v2357_v27  ;;  %v2161_v61 = vpop.permute.xlu1 %2160 }
 0x1de   : > { %2178 = vrot.lane.b32.xlu0 %v2115_v48, %s5015_s23  ;;  %4506 = vmatprep.mubr.msk.bf16.mxu1 %vm2802_vm10, %v2747_v28  ;;  %v4472_v26 = vpop.f32.mrb[0].mxu0  ;;  %v2684_v40 = vsel %vm2644_vm8, %v2619_v34, %v2161_v61  ;;  %v1851_v48 = vrot.slane %v1849_v45, 1 }
 0x1df   : > { %v4364_v43 = vpack.c.bf16 %v4472_v26, %v4472_v26  ;;  %v2905_v16 = vpop.f32.mrb[1].mxu0  ;;  %2050 = vrot.lane.b32.xlu1 %v1987_v30, %s5012_s3  ;;  %v3610_v60 = vmul.f32 %v4472_v26, %v4472_v26  ;;  %v3484_v58 = vsel %vm2449_vm5, %v4472_v26, 0.0  ;;  %v1857_v26 = vshll.u32 %v6457_v13, 16 }
 0x1e0   : > { %v6411_v39 = vpop.permute.xlu0 %1252  ;;  %v4362_v6 = vpack.c.bf16 %v2905_v16, %v2905_v16  ;;  %v3608_v51 = vmul.f32 %v2905_v16, %v2905_v16  ;;  %v4473_v37 = vpop.f32.mrb[2].mxu0  ;;  %v3481_v63 = vsel %vm2449_vm5, %v2905_v16, 0.0  ;;  %v1852_v9 = vsel %vm1276_vm1, %v1847_v2, %v1851_v48  ;;  %v4794_v16 = vld [vmem:[%s5362_s8 + $0xa0] sm:$0xff]  }
 0x1e1   : > { %3419 = vst.msk [vmem:[%s6409_s4 + $0x8] sm:$0xf] %vm3416_vm11, %v4364_v43  ;;  %v4365_v56 = vpack.c.bf16 %v4473_v37, %v4473_v37  ;;  %v2908_v54 = vpop.f32.mrb[3].mxu0  ;;  %v2359_v53 = vpop.permute.xlu1 %2358  ;;  %v3611_v17 = vmul.f32 %v4473_v37, %v4473_v37  ;;  %v3675_v12 = vsel %vm2449_vm5, %v3610_v60, 0.0  ;;  %v3486_v27 = vsel %vm2449_vm5, %v4473_v37, 0.0 }
 0x1e2   : > { %2376 = vrot.lane.b32.xlu0 %v2305_v25, %s5016_s12  ;;  %3417 = vst.msk [vmem:[%s6409_s4] sm:$0xf] %vm3416_vm11, %v4362_v6  ;;  %v4363_v46 = vpack.c.bf16 %v2908_v54, %v2908_v54  ;;  %v3482_v62 = vsel %vm2449_vm5, %v2908_v54, 0.0  ;;  %v3609_v50 = vmul.f32 %v2908_v54, %v2908_v54  ;;  %v2749_v7 = vsel %vm2709_vm9, %v2684_v40, %v2359_v53 }
 0x1e3   : > { %3420 = vst.msk [vmem:[%s6409_s4 + $0xc] sm:$0xf] %vm3416_vm11, %v4365_v56  ;;  %v3483_v59 = vadd.f32 %v3482_v62, %v3481_v63  ;;  %2180 = vrot.lane.b32.xlu1 %v2117_v21, %s5015_s23  ;;  %v3672_v33 = vsel %vm2449_vm5, %v3608_v51, 0.0  ;;  %4507 = vmatmul.mubr.msk.bf16.gmra.mrb[4].mxu1 %vm2802_vm10, %v2749_v7  ;;  %v3677_v5 = vsel %vm2449_vm5, %v3611_v17, 0.0  ;;  %v1535_v25 = vrot.slane %v1533_v11, 1 }
 0x1e4   : > { %v1578_v36 = vpop.permute.xlu0 %1577  ;;  %3418 = vst.msk [vmem:[%s6409_s4 + $0x4] sm:$0xf] %vm3416_vm11, %v4363_v46  ;;  %v3673_v19 = vsel %vm2449_vm5, %v3609_v50, 0.0  ;;  %v2426_v49 = vsel %vm2384_vm4, %v4794_v16, %v6411_v39  ;;  %v1855_v6 = vor.u32 %v1853_v23, %v1851_v48  ;;  %v1859_v51 = vrot.slane %v1857_v26, 1 }
 0x1e5   : > { %v3485_v20 = vadd.f32 %v3484_v58, %v3483_v59  ;;  %v3674_v55 = vadd.f32 %v3673_v19, %v3672_v33  ;;  %v1255_v1 = vpop.permute.xlu1 %1254  ;;  %v1536_v34 = vsel %vm1276_vm1, %v1531_v0, %v1535_v25  ;;  %v2118_v40 = vrot.slane %v6403_v8, 1 }
 0x1e6   : > { %1272 = vrot.lane.b32.xlu0 %v6341_v42, %s5011_s0  ;;  %v2310_v60 = vrot.slane %v1529_v38, 1  ;;  %v2311_v56 = vrot.slane %v1525_v4, 2  ;;  %v2491_v54 = vsel %vm2449_vm5, %v2426_v49, %v1578_v36  ;;  %v2314_v53 = vshrl.u32 %v6429_v44, 16  ;;  %v4795_v42 = vld [vmem:[%s5362_s8 + $0xa8] sm:$0xff]  }
 0x1e7   : > { %v3676_v30 = vadd.f32 %v3675_v12, %v3674_v55  ;;  %2378 = vrot.lane.b32.xlu1 %v2309_v52, %s5016_s12  ;;  %v6464_v61 = vadd.f32 %v3486_v27, %v3485_v20  ;;  %v1860_v63 = vsel %vm1276_vm1, %v1855_v6, %v1859_v51  ;;  %v2119_v4 = vsel %vm1926_vm0, %v2116_v29, %v2118_v40 }
 0x1e8   : > { %v1902_v28 = vpop.permute.xlu0 %1901  ;;  %v2312_v46 = vor.u32 %v2311_v56, %v2310_v60  ;;  %v2120_v59 = vrot.slane %v6457_v13, 1  ;;  %v2316_v7 = vrot.slane %v2314_v53, 1  ;;  %v1991_v44 = vsel %vm1926_vm0, %v1988_v41, %v1990_v24 }
 0x1e9   : > { %v1580_v21 = vpop.permute.xlu1 %1579  ;;  %v6472_v52 = vadd.f32 %v3677_v5, %v3676_v30  ;;  %v2556_v45 = vsel %vm2514_vm6, %v2491_v54, %v1902_v28  ;;  %v2428_v29 = vsel %vm2384_vm4, %v4795_v42, %v1255_v1 }
 0x1ea   : > { %1597 = vrot.lane.b32.xlu0 %v1528_v10, %s5013_s5  ;;  %v2317_v10 = vrot.slane %v1533_v11, 2  ;;  %v2313_v33 = vsel %vm2186_vm2, %v6386_v31, %v2312_v46  ;;  %v2493_v17 = vsel %vm2449_vm5, %v2428_v29, %v1580_v21  ;;  %v2121_v48 = vsel %vm1926_vm0, %v2118_v40, %v2120_v59 }
 0x1eb   : > { %1274 = vrot.lane.b32.xlu1 %v6403_v8, %s5011_s0  ;;  %s6849_s0 = scalar_lea.vmem [#allocation6], %s4115_s9 }
 0x1ec   : > { %v2033_v43 = vpop.permute.xlu0 %2032  ;;  %v2318_v13 = vor.u32 %v2317_v10, %v2316_v7 }
 0x1ed   : > { %v1904_v37 = vpop.permute.xlu1 %1903  ;;  %v2621_v8 = vsel %vm2579_vm7, %v2556_v45, %v2033_v43 }
 0x1ee   : > { %1921 = vrot.lane.b32.xlu0 %v1852_v9, %s5014_s20  ;;  %v2558_v11 = vsel %vm2514_vm6, %v2493_v17, %v1904_v37  ;;  %v2319_v51 = vsel %vm2186_vm2, %v2312_v46, %v2318_v13 }
 0x1ef   : > { %1599 = vrot.lane.b32.xlu1 %v1536_v34, %s5013_s5 }
 0x1f0   : > { %v2163_v39 = vpop.permute.xlu0 %2162 }
 0x1f1   : > { %v2035_v38 = vpop.permute.xlu1 %2034  ;;  %v2686_v62 = vsel %vm2644_vm8, %v2621_v8, %v2163_v39 }
 0x1f2   : > { %2052 = vrot.lane.b32.xlu0 %v1989_v57, %s5012_s3  ;;  %v2623_v1 = vsel %vm2579_vm7, %v2558_v11, %v2035_v38 }
 0x1f3   : > { %1923 = vrot.lane.b32.xlu1 %v1860_v63, %s5014_s20 }
 0x1f4   : > { %v2361_v50 = vpop.permute.xlu0 %2360 }
 0x1f5   : > { %v2751_v36 = vsel %vm2709_vm9, %v2686_v62, %v2361_v50  ;;  %v2165_v58 = vpop.permute.xlu1 %2164 }
 0x1f6   : > { %2182 = vrot.lane.b32.xlu0 %v2119_v4, %s5015_s23  ;;  %4510 = vmatprep.mubr.msk.bf16.mxu1 %vm2802_vm10, %v2751_v36  ;;  %v4476_v19 = vpop.f32.mrb[4].mxu0  ;;  %v2688_v30 = vsel %vm2644_vm8, %v2623_v1, %v2165_v58  ;;  %v4796_v4 = vld [vmem:[%s5362_s8 + $0xb0] sm:$0xff]  }
 0x1f7   : > { %v4368_v55 = vpack.c.bf16 %v4476_v19, %v4476_v19  ;;  %v2921_v2 = vpop.f32.mrb[5].mxu0  ;;  %2054 = vrot.lane.b32.xlu1 %v1991_v44, %s5012_s3  ;;  %v3614_v26 = vmul.f32 %v4476_v19, %v4476_v19  ;;  %v3492_v6 = vsel %vm2449_vm5, %v4476_v19, 0.0 }
 0x1f8   : > { %v1257_v20 = vpop.permute.xlu0 %1256  ;;  %v4366_v12 = vpack.c.bf16 %v2921_v2, %v2921_v2  ;;  %v3488_v31 = vsel %vm2449_vm5, %v2921_v2, 0.0  ;;  %v3612_v27 = vmul.f32 %v2921_v2, %v2921_v2  ;;  %v4477_v28 = vpop.f32.mrb[6].mxu0 }
 0x1f9   : > { %3423 = vst.msk [vmem:[%s6409_s4 + $0x18] sm:$0xf] %vm3416_vm11, %v4368_v55  ;;  %v3489_v0 = vadd.f32 %v3488_v31, %v6464_v61  ;;  %v4369_v5 = vpack.c.bf16 %v4477_v28, %v4477_v28  ;;  %v2924_v25 = vpop.f32.mrb[7].mxu0  ;;  %v2363_v23 = vpop.permute.xlu1 %2362  ;;  %v3615_v37 = vmul.f32 %v4477_v28, %v4477_v28  ;;  %v3494_v60 = vsel %vm2449_vm5, %v4477_v28, 0.0 }
 0x1fa   : > { %2380 = vrot.lane.b32.xlu0 %v2313_v33, %s5016_s12  ;;  %3421 = vst.msk [vmem:[%s6409_s4 + $0x10] sm:$0xf] %vm3416_vm11, %v4366_v12  ;;  %v3679_v21 = vsel %vm2449_vm5, %v3612_v27, 0.0  ;;  %v4367_v9 = vpack.c.bf16 %v2924_v25, %v2924_v25  ;;  %v3490_v41 = vsel %vm2449_vm5, %v2924_v25, 0.0  ;;  %v3613_v34 = vmul.f32 %v2924_v25, %v2924_v25 }
 0x1fb   : > { %v3680_v16 = vadd.f32 %v3679_v21, %v6472_v52  ;;  %3424 = vst.msk [vmem:[%s6409_s4 + $0x1c] sm:$0xf] %vm3416_vm11, %v4369_v5  ;;  %v3491_v49 = vadd.f32 %v3490_v41, %v3489_v0  ;;  %v2753_v61 = vsel %vm2709_vm9, %v2688_v30, %v2363_v23  ;;  %2184 = vrot.lane.b32.xlu1 %v2121_v48, %s5015_s23  ;;  %v3683_v54 = vsel %vm2449_vm5, %v3614_v26, 0.0 }
 0x1fc   : > { %v1582_v43 = vpop.permute.xlu0 %1581  ;;  %3422 = vst.msk [vmem:[%s6409_s4 + $0x14] sm:$0xf] %vm3416_vm11, %v4367_v9  ;;  %4511 = vmatmul.mubr.msk.bf16.gmra.mrb[8].mxu1 %vm2802_vm10, %v2753_v61  ;;  %v3681_v52 = vsel %vm2449_vm5, %v3613_v34, 0.0  ;;  %v3685_v63 = vsel %vm2449_vm5, %v3615_v37, 0.0  ;;  %v2430_v46 = vsel %vm2384_vm4, %v4796_v4, %v1257_v20 }
 0x1fd   : > { %v3493_v57 = vadd.f32 %v3492_v6, %v3491_v49  ;;  %v1259_v40 = vpop.permute.xlu1 %1258  ;;  %v3682_v56 = vadd.f32 %v3681_v52, %v3680_v16  ;;  %v2495_v36 = vsel %vm2449_vm5, %v2430_v46, %v1582_v43 }
 0x1fe   : > { %v2432_v58 = vsel %vm2384_vm4, %v6069_v47, %v1259_v40 }
 0x1ff   : > { %2382 = vrot.lane.b32.xlu1 %v2319_v51, %s5016_s12  ;;  %v3495_v53 = vadd.f32 %v3494_v60, %v3493_v57  ;;  %v3684_v45 = vadd.f32 %v3683_v54, %v3682_v56 }
 0x200   : > { %v1906_v39 = vpop.permute.xlu0 %1905 }
 0x201   : > { %v1584_v24 = vpop.permute.xlu1 %1583  ;;  %v3686_v38 = vadd.f32 %v3685_v63, %v3684_v45  ;;  %v2560_v59 = vsel %vm2514_vm6, %v2495_v36, %v1906_v39  ;;  %v4797_v63 = vld [vmem:[%s5362_s8 + $0xc0] sm:$0xff]   ;;  %s734_s8 = scalar_lea.vmem [#allocation4], %s4115_s9 }
 0x202   : > { %v2497_v17 = vsel %vm2449_vm5, %v2432_v58, %v1584_v24 }
 0x204   : > { %v2037_v8 = vpop.permute.xlu0 %2036 }
 0x205   : > { %v1908_v62 = vpop.permute.xlu1 %1907  ;;  %v2625_v7 = vsel %vm2579_vm7, %v2560_v59, %v2037_v8 }
 0x206   : > { %v2562_v11 = vsel %vm2514_vm6, %v2497_v17, %v1908_v62 }
 0x208   : > { %v2167_v50 = vpop.permute.xlu0 %2166 }
 0x209   : > { %v2039_v10 = vpop.permute.xlu1 %2038  ;;  %v2690_v44 = vsel %vm2644_vm8, %v2625_v7, %v2167_v50 }
 0x20a   : > { %v2627_v48 = vsel %vm2579_vm7, %v2562_v11, %v2039_v10 }
 0x20c   : > { %v2365_v42 = vpop.permute.xlu0 %2364 }
 0x20d   : > { %v2755_v29 = vsel %vm2709_vm9, %v2690_v44, %v2365_v42  ;;  %v2169_v33 = vpop.permute.xlu1 %2168 }
 0x20e   : > { %4514 = vmatprep.mubr.msk.bf16.mxu1 %vm2802_vm10, %v2755_v29  ;;  %v4480_v19 = vpop.f32.mrb[8].mxu0  ;;  %v2692_v47 = vsel %vm2644_vm8, %v2627_v48, %v2169_v33 }
 0x20f   : > { %v4372_v55 = vpack.c.bf16 %v4480_v19, %v4480_v19  ;;  %v2937_v2 = vpop.f32.mrb[9].mxu0  ;;  %v3618_v5 = vmul.f32 %v4480_v19, %v4480_v19  ;;  %v3500_v49 = vsel %vm2449_vm5, %v4480_v19, 0.0 }
 0x210   : > { %v1261_v20 = vpop.permute.xlu0 %1260  ;;  %v4370_v13 = vpack.c.bf16 %v2937_v2, %v2937_v2  ;;  %v3496_v1 = vsel %vm2449_vm5, %v2937_v2, 0.0  ;;  %v3616_v12 = vmul.f32 %v2937_v2, %v2937_v2  ;;  %v4481_v31 = vpop.f32.mrb[10].mxu0 }
 0x211   : > { %3427 = vst.msk [vmem:[%s6409_s4 + $0x28] sm:$0xf] %vm3416_vm11, %v4372_v55  ;;  %v3497_v27 = vadd.f32 %v3496_v1, %v3495_v53  ;;  %v4373_v28 = vpack.c.bf16 %v4481_v31, %v4481_v31  ;;  %v2940_v30 = vpop.f32.mrb[11].mxu0  ;;  %v2367_v0 = vpop.permute.xlu1 %2366  ;;  %v3619_v34 = vmul.f32 %v4481_v31, %v4481_v31  ;;  %v3502_v37 = vsel %vm2449_vm5, %v4481_v31, 0.0 }
 0x212   : > { %3425 = vst.msk [vmem:[%s6409_s4 + $0x20] sm:$0xf] %vm3416_vm11, %v4370_v13  ;;  %v3687_v25 = vsel %vm2449_vm5, %v3616_v12, 0.0  ;;  %v4371_v23 = vpack.c.bf16 %v2940_v30, %v2940_v30  ;;  %v3498_v26 = vsel %vm2449_vm5, %v2940_v30, 0.0  ;;  %v3617_v43 = vmul.f32 %v2940_v30, %v2940_v30 }
 0x213   : > { %v3688_v9 = vadd.f32 %v3687_v25, %v3686_v38  ;;  %3428 = vst.msk [vmem:[%s6409_s4 + $0x2c] sm:$0xf] %vm3416_vm11, %v4373_v28  ;;  %v3499_v41 = vadd.f32 %v3498_v26, %v3497_v27  ;;  %v2757_v16 = vsel %vm2709_vm9, %v2692_v47, %v2367_v0  ;;  %v3691_v40 = vsel %vm2449_vm5, %v3618_v5, 0.0 }
 0x214   : > { %v1586_v21 = vpop.permute.xlu0 %1585  ;;  %3426 = vst.msk [vmem:[%s6409_s4 + $0x24] sm:$0xf] %vm3416_vm11, %v4371_v23  ;;  %4515 = vmatmul.mubr.msk.bf16.gmra.mrb[12].mxu1 %vm2802_vm10, %v2757_v16  ;;  %v3689_v6 = vsel %vm2449_vm5, %v3617_v43, 0.0  ;;  %v3693_v39 = vsel %vm2449_vm5, %v3619_v34, 0.0  ;;  %v2434_v24 = vsel %vm2384_vm4, %v4797_v63, %v1261_v20 }
 0x215   : > { %v3501_v61 = vadd.f32 %v3500_v49, %v3499_v41  ;;  %v1263_v51 = vpop.permute.xlu1 %1262  ;;  %v3690_v57 = vadd.f32 %v3689_v6, %v3688_v9  ;;  %v2499_v4 = vsel %vm2449_vm5, %v2434_v24, %v1586_v21 }
 0x216   : > { %v2436_v10 = vsel %vm2384_vm4, %v6144_v3, %v1263_v51 }
 0x217   : > { %v3503_v60 = vadd.f32 %v3502_v37, %v3501_v61  ;;  %v3692_v56 = vadd.f32 %v3691_v40, %v3690_v57 }
 0x218   : > { %v1910_v52 = vpop.permute.xlu0 %1909 }
 0x219   : > { %v1588_v54 = vpop.permute.xlu1 %1587  ;;  %v3694_v45 = vadd.f32 %v3693_v39, %v3692_v56  ;;  %v2564_v46 = vsel %vm2514_vm6, %v2499_v4, %v1910_v52 }
 0x21a   : > { %v2501_v42 = vsel %vm2449_vm5, %v2436_v10, %v1588_v54 }
 0x21c   : > { %v2041_v53 = vpop.permute.xlu0 %2040 }
 0x21d   : > { %v1912_v8 = vpop.permute.xlu1 %1911  ;;  %v2629_v62 = vsel %vm2579_vm7, %v2564_v46, %v2041_v53 }
 0x21e   : > { %v2566_v33 = vsel %vm2514_vm6, %v2501_v42, %v1912_v8 }
 0x220   : > { %v2171_v38 = vpop.permute.xlu0 %2170 }
 0x221   : > { %v2043_v50 = vpop.permute.xlu1 %2042  ;;  %v2694_v36 = vsel %vm2644_vm8, %v2629_v62, %v2171_v38 }
 0x222   : > { %v2631_v20 = vsel %vm2579_vm7, %v2566_v33, %v2043_v50 }
 0x224   : > { %v2369_v59 = vpop.permute.xlu0 %2368 }
 0x225   : > { %v2759_v7 = vsel %vm2709_vm9, %v2694_v36, %v2369_v59  ;;  %v2173_v44 = vpop.permute.xlu1 %2172 }
 0x226   : > { %4518 = vmatprep.mubr.msk.bf16.mxu1 %vm2802_vm10, %v2759_v7  ;;  %v4484_v29 = vpop.f32.mrb[12].mxu0  ;;  %v2696_v3 = vsel %vm2644_vm8, %v2631_v20, %v2173_v44 }
 0x227   : > { %v4376_v17 = vpack.c.bf16 %v4484_v29, %v4484_v29  ;;  %v2953_v19 = vpop.f32.mrb[13].mxu0  ;;  %v3622_v47 = vmul.f32 %v4484_v29, %v4484_v29  ;;  %v3508_v21 = vsel %vm2449_vm5, %v4484_v29, 0.0 }
 0x228   : > { %v1265_v58 = vpop.permute.xlu0 %1264  ;;  %v4374_v11 = vpack.c.bf16 %v2953_v19, %v2953_v19  ;;  %v3504_v55 = vsel %vm2449_vm5, %v2953_v19, 0.0  ;;  %v3620_v2 = vmul.f32 %v2953_v19, %v2953_v19  ;;  %v4485_v48 = vpop.f32.mrb[14].mxu0 }
 0x229   : > { %3431 = vst.msk [vmem:[%s6409_s4 + $0x38] sm:$0xf] %vm3416_vm11, %v4376_v17  ;;  %v3505_v13 = vadd.f32 %v3504_v55, %v3503_v60  ;;  %v4377_v1 = vpack.c.bf16 %v4485_v48, %v4485_v48  ;;  %v2956_v12 = vpop.f32.mrb[15].mxu0  ;;  %v2371_v31 = vpop.permute.xlu1 %2370  ;;  %v3623_v9 = vmul.f32 %v4485_v48, %v4485_v48  ;;  %v3510_v49 = vsel %vm2449_vm5, %v4485_v48, 0.0 }
 0x22a   : > { %3429 = vst.msk [vmem:[%s6409_s4 + $0x30] sm:$0xf] %vm3416_vm11, %v4374_v11  ;;  %v3695_v27 = vsel %vm2449_vm5, %v3620_v2, 0.0  ;;  %v4375_v28 = vpack.c.bf16 %v2956_v12, %v2956_v12  ;;  %v3506_v30 = vsel %vm2449_vm5, %v2956_v12, 0.0  ;;  %v3621_v23 = vmul.f32 %v2956_v12, %v2956_v12 }
 0x22b   : > { %v3696_v5 = vadd.f32 %v3695_v27, %v3694_v45  ;;  %3432 = vst.msk [vmem:[%s6409_s4 + $0x3c] sm:$0xf] %vm3416_vm11, %v4377_v1  ;;  %v3507_v25 = vadd.f32 %v3506_v30, %v3505_v13  ;;  %v2761_v26 = vsel %vm2709_vm9, %v2696_v3, %v2371_v31  ;;  %v3699_v6 = vsel %vm2449_vm5, %v3622_v47, 0.0 }
 0x22c   : > { %v1590_v0 = vpop.permute.xlu0 %1589  ;;  %3430 = vst.msk [vmem:[%s6409_s4 + $0x34] sm:$0xf] %vm3416_vm11, %v4375_v28  ;;  %4519 = vmatmul.mubr.msk.bf16.gmra.mrb[16].mxu1 %vm2802_vm10, %v2761_v26  ;;  %v3697_v43 = vsel %vm2449_vm5, %v3621_v23, 0.0  ;;  %v3701_v57 = vsel %vm2449_vm5, %v3623_v9, 0.0  ;;  %v2438_v56 = vsel %vm2384_vm4, %v6174_v18, %v1265_v58 }
 0x22d   : > { %v3509_v41 = vadd.f32 %v3508_v21, %v3507_v25  ;;  %v1267_v16 = vpop.permute.xlu1 %1266  ;;  %v3698_v34 = vadd.f32 %v3697_v43, %v3696_v5  ;;  %v2503_v53 = vsel %vm2449_vm5, %v2438_v56, %v1590_v0 }
 0x22e   : > { %v2440_v18 = vsel %vm2384_vm4, %v6220_v32, %v1267_v16 }
 0x22f   : > { %v3511_v51 = vadd.f32 %v3510_v49, %v3509_v41  ;;  %v3700_v37 = vadd.f32 %v3699_v6, %v3698_v34 }
 0x230   : > { %v1914_v61 = vpop.permute.xlu0 %1913 }
 0x231   : > { %v1592_v52 = vpop.permute.xlu1 %1591  ;;  %v3702_v60 = vadd.f32 %v3701_v57, %v3700_v37  ;;  %v2568_v45 = vsel %vm2514_vm6, %v2503_v53, %v1914_v61 }
 0x232   : > { %v2505_v62 = vsel %vm2449_vm5, %v2440_v18, %v1592_v52 }
 0x234   : > { %v2045_v40 = vpop.permute.xlu0 %2044 }
 0x235   : > { %v1916_v39 = vpop.permute.xlu1 %1915  ;;  %v2633_v63 = vsel %vm2579_vm7, %v2568_v45, %v2045_v40 }
 0x236   : > { %v2570_v59 = vsel %vm2514_vm6, %v2505_v62, %v1916_v39 }
 0x238   : > { %v2175_v54 = vpop.permute.xlu0 %2174 }
 0x239   : > { %v2047_v24 = vpop.permute.xlu1 %2046  ;;  %v2698_v8 = vsel %vm2644_vm8, %v2633_v63, %v2175_v54 }
 0x23a   : > { %v2635_v44 = vsel %vm2579_vm7, %v2570_v59, %v2047_v24 }
 0x23c   : > { %v2373_v38 = vpop.permute.xlu0 %2372 }
 0x23d   : > { %v2763_v4 = vsel %vm2709_vm9, %v2698_v8, %v2373_v38  ;;  %v2177_v46 = vpop.permute.xlu1 %2176 }
 0x23e   : > { %4522 = vmatprep.mubr.msk.bf16.mxu1 %vm2802_vm10, %v2763_v4  ;;  %v4488_v50 = vpop.f32.mrb[16].mxu0  ;;  %v2700_v32 = vsel %vm2644_vm8, %v2635_v44, %v2177_v46 }
 0x23f   : > { %v4380_v7 = vpack.c.bf16 %v4488_v50, %v4488_v50  ;;  %v2969_v10 = vpop.f32.mrb[17].mxu0  ;;  %v3626_v55 = vmul.f32 %v4488_v50, %v4488_v50  ;;  %v3516_v27 = vsel %vm2449_vm5, %v4488_v50, 0.0 }
 0x240   : > { %v1269_v36 = vpop.permute.xlu0 %1268  ;;  %v4378_v42 = vpack.c.bf16 %v2969_v10, %v2969_v10  ;;  %v3512_v29 = vsel %vm2449_vm5, %v2969_v10, 0.0  ;;  %v3624_v58 = vmul.f32 %v2969_v10, %v2969_v10  ;;  %v4489_v33 = vpop.f32.mrb[18].mxu0 }
 0x241   : > { %3435 = vst.msk [vmem:[%s6409_s4 + $0x48] sm:$0xf] %vm3416_vm11, %v4380_v7  ;;  %v3513_v17 = vadd.f32 %v3512_v29, %v3511_v51  ;;  %v4381_v19 = vpack.c.bf16 %v4489_v33, %v4489_v33  ;;  %v2972_v20 = vpop.f32.mrb[19].mxu0  ;;  %v2375_v11 = vpop.permute.xlu1 %2374  ;;  %v3627_v28 = vmul.f32 %v4489_v33, %v4489_v33  ;;  %v3518_v25 = vsel %vm2449_vm5, %v4489_v33, 0.0 }
 0x242   : > { %3433 = vst.msk [vmem:[%s6409_s4 + $0x40] sm:$0xf] %vm3416_vm11, %v4378_v42  ;;  %v3703_v2 = vsel %vm2449_vm5, %v3624_v58, 0.0  ;;  %v4379_v48 = vpack.c.bf16 %v2972_v20, %v2972_v20  ;;  %v3514_v3 = vsel %vm2449_vm5, %v2972_v20, 0.0  ;;  %v3625_v31 = vmul.f32 %v2972_v20, %v2972_v20 }
 0x243   : > { %v3704_v1 = vadd.f32 %v3703_v2, %v3702_v60  ;;  %3436 = vst.msk [vmem:[%s6409_s4 + $0x4c] sm:$0xf] %vm3416_vm11, %v4381_v19  ;;  %v3515_v12 = vadd.f32 %v3514_v3, %v3513_v17  ;;  %v2765_v47 = vsel %vm2709_vm9, %v2700_v32, %v2375_v11  ;;  %v3707_v21 = vsel %vm2449_vm5, %v3626_v55, 0.0 }
 0x244   : > { %v1594_v13 = vpop.permute.xlu0 %1593  ;;  %3434 = vst.msk [vmem:[%s6409_s4 + $0x44] sm:$0xf] %vm3416_vm11, %v4379_v48  ;;  %4523 = vmatmul.mubr.msk.bf16.gmra.mrb[20].mxu1 %vm2802_vm10, %v2765_v47  ;;  %v3705_v0 = vsel %vm2449_vm5, %v3625_v31, 0.0  ;;  %v3709_v43 = vsel %vm2449_vm5, %v3627_v28, 0.0  ;;  %v2442_v61 = vsel %vm2384_vm4, %v6250_v15, %v1269_v36 }
 0x245   : > { %v3517_v30 = vadd.f32 %v3516_v27, %v3515_v12  ;;  %v1271_v5 = vpop.permute.xlu1 %1270  ;;  %v3706_v23 = vadd.f32 %v3705_v0, %v3704_v1  ;;  %v2507_v37 = vsel %vm2449_vm5, %v2442_v61, %v1594_v13 }
 0x246   : > { %v2444_v15 = vsel %vm2384_vm4, %v6296_v14, %v1271_v5 }
 0x247   : > { %v3519_v9 = vadd.f32 %v3518_v25, %v3517_v30  ;;  %v3708_v41 = vadd.f32 %v3707_v21, %v3706_v23 }
 0x248   : > { %v1918_v26 = vpop.permute.xlu0 %1917 }
 0x249   : > { %v1596_v16 = vpop.permute.xlu1 %1595  ;;  %v3710_v34 = vadd.f32 %v3709_v43, %v3708_v41  ;;  %v2572_v57 = vsel %vm2514_vm6, %v2507_v37, %v1918_v26 }
 0x24a   : > { %v2509_v53 = vsel %vm2449_vm5, %v2444_v15, %v1596_v16 }
 0x24c   : > { %v2049_v49 = vpop.permute.xlu0 %2048 }
 0x24d   : > { %v1920_v6 = vpop.permute.xlu1 %1919  ;;  %v2637_v52 = vsel %vm2579_vm7, %v2572_v57, %v2049_v49 }
 0x24e   : > { %v2574_v24 = vsel %vm2514_vm6, %v2509_v53, %v1920_v6 }
 0x250   : > { %v2179_v51 = vpop.permute.xlu0 %2178 }
 0x251   : > { %v2051_v40 = vpop.permute.xlu1 %2050  ;;  %v2702_v60 = vsel %vm2644_vm8, %v2637_v52, %v2179_v51 }
 0x252   : > { %v2639_v4 = vsel %vm2579_vm7, %v2574_v24, %v2051_v40 }
 0x254   : > { %v2377_v56 = vpop.permute.xlu0 %2376 }
 0x255   : > { %v2767_v39 = vsel %vm2709_vm9, %v2702_v60, %v2377_v56  ;;  %v2181_v54 = vpop.permute.xlu1 %2180 }
 0x256   : > { %4526 = vmatprep.mubr.msk.bf16.mxu1 %vm2802_vm10, %v2767_v39  ;;  %v4492_v45 = vpop.f32.mrb[20].mxu0  ;;  %v2704_v14 = vsel %vm2644_vm8, %v2639_v4, %v2181_v54 }
 0x257   : > { %v4384_v8 = vpack.c.bf16 %v4492_v45, %v4492_v45  ;;  %v2985_v38 = vpop.f32.mrb[21].mxu0  ;;  %v3630_v44 = vmul.f32 %v4492_v45, %v4492_v45  ;;  %v3524_v11 = vsel %vm2449_vm5, %v4492_v45, 0.0 }
 0x258   : > { %v1273_v63 = vpop.permute.xlu0 %1272  ;;  %v4382_v18 = vpack.c.bf16 %v2985_v38, %v2985_v38  ;;  %v3520_v46 = vsel %vm2449_vm5, %v2985_v38, 0.0  ;;  %v3628_v62 = vmul.f32 %v2985_v38, %v2985_v38  ;;  %v4493_v50 = vpop.f32.mrb[22].mxu0 }
 0x259   : > { %3439 = vst.msk [vmem:[%s6409_s4 + $0x58] sm:$0xf] %vm3416_vm11, %v4384_v8  ;;  %v3521_v36 = vadd.f32 %v3520_v46, %v3519_v9  ;;  %v4385_v59 = vpack.c.bf16 %v4493_v50, %v4493_v50  ;;  %v2988_v7 = vpop.f32.mrb[23].mxu0  ;;  %v2379_v10 = vpop.permute.xlu1 %2378  ;;  %v3631_v55 = vmul.f32 %v4493_v50, %v4493_v50  ;;  %v3526_v13 = vsel %vm2449_vm5, %v4493_v50, 0.0 }
 0x25a   : > { %3437 = vst.msk [vmem:[%s6409_s4 + $0x50] sm:$0xf] %vm3416_vm11, %v4382_v18  ;;  %v3711_v42 = vsel %vm2449_vm5, %v3628_v62, 0.0  ;;  %v4383_v29 = vpack.c.bf16 %v2988_v7, %v2988_v7  ;;  %v3522_v58 = vsel %vm2449_vm5, %v2988_v7, 0.0  ;;  %v3629_v19 = vmul.f32 %v2988_v7, %v2988_v7 }
 0x25b   : > { %v3712_v32 = vadd.f32 %v3711_v42, %v3710_v34  ;;  %3440 = vst.msk [vmem:[%s6409_s4 + $0x5c] sm:$0xf] %vm3416_vm11, %v4385_v59  ;;  %v3523_v17 = vadd.f32 %v3522_v58, %v3521_v36  ;;  %v2769_v20 = vsel %vm2709_vm9, %v2704_v14, %v2379_v10  ;;  %v3715_v31 = vsel %vm2449_vm5, %v3630_v44, 0.0 }
 0x25c   : > { %v1598_v33 = vpop.permute.xlu0 %1597  ;;  %3438 = vst.msk [vmem:[%s6409_s4 + $0x54] sm:$0xf] %vm3416_vm11, %v4383_v29  ;;  %4527 = vmatmul.mubr.msk.bf16.gmra.mrb[24].mxu1 %vm2802_vm10, %v2769_v20  ;;  %v3713_v48 = vsel %vm2449_vm5, %v3629_v19, 0.0  ;;  %v3717_v28 = vsel %vm2449_vm5, %v3631_v55, 0.0  ;;  %v2446_v25 = vsel %vm2384_vm4, %v6326_v35, %v1273_v63 }
 0x25d   : > { %v3525_v2 = vadd.f32 %v3524_v11, %v3523_v17  ;;  %v1275_v3 = vpop.permute.xlu1 %1274  ;;  %v3714_v1 = vadd.f32 %v3713_v48, %v3712_v32  ;;  %v2511_v21 = vsel %vm2449_vm5, %v2446_v25, %v1598_v33 }
 0x25e   : > { %v2448_v35 = vsel %vm2384_vm4, %v6372_v22, %v1275_v3 }
 0x25f   : > { %v3527_v47 = vadd.f32 %v3526_v13, %v3525_v2  ;;  %v3716_v27 = vadd.f32 %v3715_v31, %v3714_v1 }
 0x260   : > { %v1922_v12 = vpop.permute.xlu0 %1921 }
 0x261   : > { %v1600_v30 = vpop.permute.xlu1 %1599  ;;  %v3718_v5 = vadd.f32 %v3717_v28, %v3716_v27  ;;  %v2576_v9 = vsel %vm2514_vm6, %v2511_v21, %v1922_v12 }
 0x262   : > { %v2513_v6 = vsel %vm2449_vm5, %v2448_v35, %v1600_v30 }
 0x264   : > { %v2053_v0 = vpop.permute.xlu0 %2052 }
 0x265   : > { %v1924_v23 = vpop.permute.xlu1 %1923  ;;  %v2641_v41 = vsel %vm2579_vm7, %v2576_v9, %v2053_v0 }
 0x266   : > { %v2578_v37 = vsel %vm2514_vm6, %v2513_v6, %v1924_v23 }
 0x268   : > { %v2183_v26 = vpop.permute.xlu0 %2182 }
 0x269   : > { %v2055_v43 = vpop.permute.xlu1 %2054  ;;  %v2706_v16 = vsel %vm2644_vm8, %v2641_v41, %v2183_v26 }
 0x26a   : > { %v2643_v40 = vsel %vm2579_vm7, %v2578_v37, %v2055_v43 }
 0x26c   : > { %v2381_v49 = vpop.permute.xlu0 %2380 }
 0x26d   : > { %v2771_v34 = vsel %vm2709_vm9, %v2706_v16, %v2381_v49  ;;  %v2185_v61 = vpop.permute.xlu1 %2184 }
 0x26e   : > { %4530 = vmatprep.mubr.msk.bf16.mxu1 %vm2802_vm10, %v2771_v34  ;;  %v4496_v51 = vpop.f32.mrb[24].mxu0  ;;  %v2708_v54 = vsel %vm2644_vm8, %v2643_v40, %v2185_v61 }
 0x26f   : > { %v4388_v57 = vpack.c.bf16 %v4496_v51, %v4496_v51  ;;  %v3001_v52 = vpop.f32.mrb[25].mxu0  ;;  %v3634_v24 = vmul.f32 %v4496_v51, %v4496_v51  ;;  %v3532_v14 = vsel %vm2449_vm5, %v4496_v51, 0.0 }
 0x270   : > { %v4386_v60 = vpack.c.bf16 %v3001_v52, %v3001_v52  ;;  %v3528_v56 = vsel %vm2449_vm5, %v3001_v52, 0.0  ;;  %v3632_v39 = vmul.f32 %v3001_v52, %v3001_v52  ;;  %v4497_v15 = vpop.f32.mrb[26].mxu0 }
 0x271   : > { %3443 = vst.msk [vmem:[%s6409_s4 + $0x68] sm:$0xf] %vm3416_vm11, %v4388_v57  ;;  %v3529_v22 = vadd.f32 %v3528_v56, %v3527_v47  ;;  %v4389_v53 = vpack.c.bf16 %v4497_v15, %v4497_v15  ;;  %v3004_v45 = vpop.f32.mrb[27].mxu0  ;;  %v2383_v63 = vpop.permute.xlu1 %2382  ;;  %v3635_v36 = vmul.f32 %v4497_v15, %v4497_v15  ;;  %v3534_v10 = vsel %vm2449_vm5, %v4497_v15, 0.0 }
 0x272   : > { %3441 = vst.msk [vmem:[%s6409_s4 + $0x60] sm:$0xf] %vm3416_vm11, %v4386_v60  ;;  %v3719_v8 = vsel %vm2449_vm5, %v3632_v39, 0.0  ;;  %v4387_v38 = vpack.c.bf16 %v3004_v45, %v3004_v45  ;;  %v3530_v4 = vsel %vm2449_vm5, %v3004_v45, 0.0  ;;  %v3633_v62 = vmul.f32 %v3004_v45, %v3004_v45 }
 0x273   : > { %v3720_v18 = vadd.f32 %v3719_v8, %v3718_v5  ;;  %3444 = vst.msk [vmem:[%s6409_s4 + $0x6c] sm:$0xf] %vm3416_vm11, %v4389_v53  ;;  %v3531_v46 = vadd.f32 %v3530_v4, %v3529_v22  ;;  %v2773_v50 = vsel %vm2709_vm9, %v2708_v54, %v2383_v63  ;;  %v3723_v42 = vsel %vm2449_vm5, %v3634_v24, 0.0 }
 0x274   : > { %3442 = vst.msk [vmem:[%s6409_s4 + $0x64] sm:$0xf] %vm3416_vm11, %v4387_v38  ;;  %4531 = vmatmul.mubr.msk.bf16.gmra.mrb[28].mxu1 %vm2802_vm10, %v2773_v50  ;;  %v3721_v7 = vsel %vm2449_vm5, %v3633_v62, 0.0  ;;  %v3725_v33 = vsel %vm2449_vm5, %v3635_v36, 0.0 }
 0x275   : > { %v3533_v59 = vadd.f32 %v3532_v14, %v3531_v46  ;;  %v3722_v44 = vadd.f32 %v3721_v7, %v3720_v18 }
 0x277   : > { %v3535_v29 = vadd.f32 %v3534_v10, %v3533_v59  ;;  %v3724_v58 = vadd.f32 %v3723_v42, %v3722_v44 }
 0x279   : > { %v3726_v32 = vadd.f32 %v3725_v33, %v3724_v58 }
 0x286   : > { %v4500_v17 = vpop.f32.mrb[28].mxu0 }
 0x287   : > { %v4392_v19 = vpack.c.bf16 %v4500_v17, %v4500_v17  ;;  %v3017_v20 = vpop.f32.mrb[29].mxu0  ;;  %v3638_v27 = vmul.f32 %v4500_v17, %v4500_v17  ;;  %v3540_v5 = vsel %vm2449_vm5, %v4500_v17, 0.0 }
 0x288   : > { %v4390_v11 = vpack.c.bf16 %v3017_v20, %v3017_v20  ;;  %v3536_v55 = vsel %vm2449_vm5, %v3017_v20, 0.0  ;;  %v3636_v2 = vmul.f32 %v3017_v20, %v3017_v20  ;;  %v4501_v48 = vpop.f32.mrb[30].mxu0 }
 0x289   : > { %3447 = vst.msk [vmem:[%s6409_s4 + $0x78] sm:$0xf] %vm3416_vm11, %v4392_v19  ;;  %v3537_v3 = vadd.f32 %v3536_v55, %v3535_v29  ;;  %v4393_v13 = vpack.c.bf16 %v4501_v48, %v4501_v48  ;;  %v3020_v1 = vpop.f32.mrb[31].mxu0  ;;  %v3639_v25 = vmul.f32 %v4501_v48, %v4501_v48  ;;  %v3542_v21 = vsel %vm2449_vm5, %v4501_v48, 0.0 }
 0x28a   : > { %3445 = vst.msk [vmem:[%s6409_s4 + $0x70] sm:$0xf] %vm3416_vm11, %v4390_v11  ;;  %v3727_v12 = vsel %vm2449_vm5, %v3636_v2, 0.0  ;;  %v4391_v31 = vpack.c.bf16 %v3020_v1, %v3020_v1  ;;  %v3538_v47 = vsel %vm2449_vm5, %v3020_v1, 0.0  ;;  %v3637_v0 = vmul.f32 %v3020_v1, %v3020_v1 }
 0x28b   : > { %v3728_v28 = vadd.f32 %v3727_v12, %v3726_v32  ;;  %3448 = vst.msk [vmem:[%s6409_s4 + $0x7c] sm:$0xf] %vm3416_vm11, %v4393_v13  ;;  %v3539_v30 = vadd.f32 %v3538_v47, %v3537_v3  ;;  %v3731_v41 = vsel %vm2449_vm5, %v3638_v27, 0.0  ;;  %v3733_v49 = vsel %vm2449_vm5, %v3639_v25, 0.0 }
 0x28c   : > { %3446 = vst.msk [vmem:[%s6409_s4 + $0x74] sm:$0xf] %vm3416_vm11, %v4391_v31  ;;  %v3729_v26 = vsel %vm2449_vm5, %v3637_v0, 0.0 }
 0x28d   : > { %v3541_v23 = vadd.f32 %v3540_v5, %v3539_v30  ;;  %v3730_v9 = vadd.f32 %v3729_v26, %v3728_v28 }
 0x28f   : > { %v3543_v43 = vadd.f32 %v3542_v21, %v3541_v23  ;;  %v3732_v16 = vadd.f32 %v3731_v41, %v3730_v9 }
 0x291   : > { %v3734_v34 = vadd.f32 %v3733_v49, %v3732_v16 }
 0x29e   : > { %v4504_v35 = vpop.f32.mrb[0].mxu1 }
 0x29f   : > { %v4396_v61 = vpack.c.bf16 %v4504_v35, %v4504_v35  ;;  %v3033_v6 = vpop.f32.mrb[1].mxu1  ;;  %v3642_v22 = vmul.f32 %v4504_v35, %v4504_v35  ;;  %v3548_v24 = vsel %vm2449_vm5, %v4504_v35, 0.0 }
 0x2a0   : > { %v4394_v51 = vpack.c.bf16 %v3033_v6, %v3033_v6  ;;  %v3544_v37 = vsel %vm2449_vm5, %v3033_v6, 0.0  ;;  %v3640_v57 = vmul.f32 %v3033_v6, %v3033_v6  ;;  %v4505_v52 = vpop.f32.mrb[2].mxu1 }
 0x2a1   : > { %3451 = vst.msk [vmem:[%s6409_s4 + $0x88] sm:$0xf] %vm3416_vm11, %v4396_v61  ;;  %v3545_v40 = vadd.f32 %v3544_v37, %v3543_v43  ;;  %v4397_v60 = vpack.c.bf16 %v4505_v52, %v4505_v52  ;;  %v3036_v56 = vpop.f32.mrb[3].mxu1  ;;  %v3643_v8 = vmul.f32 %v4505_v52, %v4505_v52  ;;  %v3550_v18 = vsel %vm2449_vm5, %v4505_v52, 0.0 }
 0x2a2   : > { %3449 = vst.msk [vmem:[%s6409_s4 + $0x80] sm:$0xf] %vm3416_vm11, %v4394_v51  ;;  %v3735_v39 = vsel %vm2449_vm5, %v3640_v57, 0.0  ;;  %v4395_v15 = vpack.c.bf16 %v3036_v56, %v3036_v56  ;;  %v3546_v54 = vsel %vm2449_vm5, %v3036_v56, 0.0  ;;  %v3641_v63 = vmul.f32 %v3036_v56, %v3036_v56 }
 0x2a3   : > { %v3736_v53 = vadd.f32 %v3735_v39, %v3734_v34  ;;  %3452 = vst.msk [vmem:[%s6409_s4 + $0x8c] sm:$0xf] %vm3416_vm11, %v4397_v60  ;;  %v3547_v45 = vadd.f32 %v3546_v54, %v3545_v40  ;;  %v3739_v62 = vsel %vm2449_vm5, %v3642_v22, 0.0  ;;  %v3741_v36 = vsel %vm2449_vm5, %v3643_v8, 0.0 }
 0x2a4   : > { %3450 = vst.msk [vmem:[%s6409_s4 + $0x84] sm:$0xf] %vm3416_vm11, %v4395_v15  ;;  %v3737_v4 = vsel %vm2449_vm5, %v3641_v63, 0.0 }
 0x2a5   : > { %v3549_v38 = vadd.f32 %v3548_v24, %v3547_v45  ;;  %v3738_v46 = vadd.f32 %v3737_v4, %v3736_v53 }
 0x2a7   : > { %v3551_v50 = vadd.f32 %v3550_v18, %v3549_v38  ;;  %v3740_v14 = vadd.f32 %v3739_v62, %v3738_v46 }
 0x2a9   : > { %v3742_v59 = vadd.f32 %v3741_v36, %v3740_v14 }
 0x2b6   : > { %v4508_v7 = vpop.f32.mrb[4].mxu1 }
 0x2b7   : > { %v4400_v10 = vpack.c.bf16 %v4508_v7, %v4508_v7  ;;  %v3049_v44 = vpop.f32.mrb[5].mxu1  ;;  %v3646_v2 = vmul.f32 %v4508_v7, %v4508_v7  ;;  %v3556_v1 = vsel %vm2449_vm5, %v4508_v7, 0.0 }
 0x2b8   : > { %v4398_v42 = vpack.c.bf16 %v3049_v44, %v3049_v44  ;;  %v3552_v29 = vsel %vm2449_vm5, %v3049_v44, 0.0  ;;  %v3644_v58 = vmul.f32 %v3049_v44, %v3049_v44  ;;  %v4509_v33 = vpop.f32.mrb[6].mxu1 }
 0x2b9   : > { %3455 = vst.msk [vmem:[%s6409_s4 + $0x98] sm:$0xf] %vm3416_vm11, %v4400_v10  ;;  %v3553_v32 = vadd.f32 %v3552_v29, %v3551_v50  ;;  %v4401_v17 = vpack.c.bf16 %v4509_v33, %v4509_v33  ;;  %v3052_v19 = vpop.f32.mrb[7].mxu1  ;;  %v3647_v12 = vmul.f32 %v4509_v33, %v4509_v33  ;;  %v3558_v27 = vsel %vm2449_vm5, %v4509_v33, 0.0 }
 0x2ba   : > { %3453 = vst.msk [vmem:[%s6409_s4 + $0x90] sm:$0xf] %vm3416_vm11, %v4398_v42  ;;  %v3743_v20 = vsel %vm2449_vm5, %v3644_v58, 0.0  ;;  %v4399_v11 = vpack.c.bf16 %v3052_v19, %v3052_v19  ;;  %v3554_v55 = vsel %vm2449_vm5, %v3052_v19, 0.0  ;;  %v3645_v13 = vmul.f32 %v3052_v19, %v3052_v19 }
 0x2bb   : > { %v3744_v48 = vadd.f32 %v3743_v20, %v3742_v59  ;;  %3456 = vst.msk [vmem:[%s6409_s4 + $0x9c] sm:$0xf] %vm3416_vm11, %v4401_v17  ;;  %v3555_v3 = vadd.f32 %v3554_v55, %v3553_v32  ;;  %v3747_v30 = vsel %vm2449_vm5, %v3646_v2, 0.0  ;;  %v3749_v25 = vsel %vm2449_vm5, %v3647_v12, 0.0 }
 0x2bc   : > { %3454 = vst.msk [vmem:[%s6409_s4 + $0x94] sm:$0xf] %vm3416_vm11, %v4399_v11  ;;  %v3745_v47 = vsel %vm2449_vm5, %v3645_v13, 0.0 }
 0x2bd   : > { %v3557_v31 = vadd.f32 %v3556_v1, %v3555_v3  ;;  %v3746_v28 = vadd.f32 %v3745_v47, %v3744_v48 }
 0x2bf   : > { %v3559_v0 = vadd.f32 %v3558_v27, %v3557_v31  ;;  %v3748_v5 = vadd.f32 %v3747_v30, %v3746_v28 }
 0x2c1   : > { %v3750_v23 = vadd.f32 %v3749_v25, %v3748_v5 }
 0x2cf   : > { %v4512_v26 = vpop.f32.mrb[8].mxu1 }
 0x2d0   : > { %v4404_v21 = vpack.c.bf16 %v4512_v26, %v4512_v26  ;;  %v3065_v9 = vpop.f32.mrb[9].mxu1  ;;  %v3650_v57 = vmul.f32 %v4512_v26, %v4512_v26  ;;  %v3564_v56 = vsel %vm2449_vm5, %v4512_v26, 0.0 }
 0x2d1   : > { %v4402_v41 = vpack.c.bf16 %v3065_v9, %v3065_v9  ;;  %v3560_v43 = vsel %vm2449_vm5, %v3065_v9, 0.0  ;;  %v3648_v16 = vmul.f32 %v3065_v9, %v3065_v9  ;;  %v4513_v49 = vpop.f32.mrb[10].mxu1 }
 0x2d2   : > { %3459 = vst.msk [vmem:[%s6409_s4 + $0xa8] sm:$0xf] %vm3416_vm11, %v4404_v21  ;;  %v3561_v34 = vadd.f32 %v3560_v43, %v3559_v0  ;;  %v4405_v35 = vpack.c.bf16 %v4513_v49, %v4513_v49  ;;  %v3068_v61 = vpop.f32.mrb[11].mxu1  ;;  %v3651_v39 = vmul.f32 %v4513_v49, %v4513_v49  ;;  %v3566_v22 = vsel %vm2449_vm5, %v4513_v49, 0.0 }
 0x2d3   : > { %3457 = vst.msk [vmem:[%s6409_s4 + $0xa0] sm:$0xf] %vm3416_vm11, %v4402_v41  ;;  %v3751_v6 = vsel %vm2449_vm5, %v3648_v16, 0.0  ;;  %v4403_v51 = vpack.c.bf16 %v3068_v61, %v3068_v61  ;;  %v3562_v37 = vsel %vm2449_vm5, %v3068_v61, 0.0  ;;  %v3649_v60 = vmul.f32 %v3068_v61, %v3068_v61 }
 0x2d4   : > { %v3752_v52 = vadd.f32 %v3751_v6, %v3750_v23  ;;  %3460 = vst.msk [vmem:[%s6409_s4 + $0xac] sm:$0xf] %vm3416_vm11, %v4405_v35  ;;  %v3563_v40 = vadd.f32 %v3562_v37, %v3561_v34  ;;  %v3755_v45 = vsel %vm2449_vm5, %v3650_v57, 0.0  ;;  %v3757_v8 = vsel %vm2449_vm5, %v3651_v39, 0.0 }
 0x2d5   : > { %3458 = vst.msk [vmem:[%s6409_s4 + $0xa4] sm:$0xf] %vm3416_vm11, %v4403_v51  ;;  %v3753_v54 = vsel %vm2449_vm5, %v3649_v60, 0.0 }
 0x2d6   : > { %v3565_v15 = vadd.f32 %v3564_v56, %v3563_v40  ;;  %v3754_v53 = vadd.f32 %v3753_v54, %v3752_v52 }
 0x2d8   : > { %v3567_v63 = vadd.f32 %v3566_v22, %v3565_v15  ;;  %v3756_v24 = vadd.f32 %v3755_v45, %v3754_v53 }
 0x2da   : > { %v3758_v38 = vadd.f32 %v3757_v8, %v3756_v24 }
 0x2e7   : > { %v4516_v4 = vpop.f32.mrb[12].mxu1 }
 0x2e8   : > { %v4408_v18 = vpack.c.bf16 %v4516_v4, %v4516_v4  ;;  %v3081_v46 = vpop.f32.mrb[13].mxu1  ;;  %v3654_v58 = vmul.f32 %v4516_v4, %v4516_v4  ;;  %v3572_v19 = vsel %vm2449_vm5, %v4516_v4, 0.0 }
 0x2e9   : > { %v4406_v62 = vpack.c.bf16 %v3081_v46, %v3081_v46  ;;  %v3568_v50 = vsel %vm2449_vm5, %v3081_v46, 0.0  ;;  %v3652_v14 = vmul.f32 %v3081_v46, %v3081_v46  ;;  %v4517_v36 = vpop.f32.mrb[14].mxu1 }
 0x2ea   : > { %3463 = vst.msk [vmem:[%s6409_s4 + $0xb8] sm:$0xf] %vm3416_vm11, %v4408_v18  ;;  %v3569_v59 = vadd.f32 %v3568_v50, %v3567_v63  ;;  %v4409_v7 = vpack.c.bf16 %v4517_v36, %v4517_v36  ;;  %v3084_v10 = vpop.f32.mrb[15].mxu1  ;;  %v3655_v20 = vmul.f32 %v4517_v36, %v4517_v36  ;;  %v3574_v2 = vsel %vm2449_vm5, %v4517_v36, 0.0 }
 0x2eb   : > { %3461 = vst.msk [vmem:[%s6409_s4 + $0xb0] sm:$0xf] %vm3416_vm11, %v4406_v62  ;;  %v3759_v44 = vsel %vm2449_vm5, %v3652_v14, 0.0  ;;  %v4407_v42 = vpack.c.bf16 %v3084_v10, %v3084_v10  ;;  %v3570_v29 = vsel %vm2449_vm5, %v3084_v10, 0.0  ;;  %v3653_v17 = vmul.f32 %v3084_v10, %v3084_v10 }
 0x2ec   : > { %v3760_v33 = vadd.f32 %v3759_v44, %v3758_v38  ;;  %3464 = vst.msk [vmem:[%s6409_s4 + $0xbc] sm:$0xf] %vm3416_vm11, %v4409_v7  ;;  %v3571_v32 = vadd.f32 %v3570_v29, %v3569_v59  ;;  %v3763_v3 = vsel %vm2449_vm5, %v3654_v58, 0.0  ;;  %v3765_v12 = vsel %vm2449_vm5, %v3655_v20, 0.0 }
 0x2ed   : > { %3462 = vst.msk [vmem:[%s6409_s4 + $0xb4] sm:$0xf] %vm3416_vm11, %v4407_v42  ;;  %v3761_v55 = vsel %vm2449_vm5, %v3653_v17, 0.0 }
 0x2ee   : > { %v3573_v11 = vadd.f32 %v3572_v19, %v3571_v32  ;;  %v3762_v48 = vadd.f32 %v3761_v55, %v3760_v33 }
 0x2f0   : > { %v3575_v13 = vadd.f32 %v3574_v2, %v3573_v11  ;;  %v3764_v1 = vadd.f32 %v3763_v3, %v3762_v48 }
 0x2f2   : > { %v3766_v31 = vadd.f32 %v3765_v12, %v3764_v1 }
 0x2ff   : > { %v4520_v47 = vpop.f32.mrb[16].mxu1 }
 0x300   : > { %v4412_v27 = vpack.c.bf16 %v4520_v47, %v4520_v47  ;;  %v3097_v28 = vpop.f32.mrb[17].mxu1  ;;  %v3658_v16 = vmul.f32 %v4520_v47, %v4520_v47  ;;  %v3580_v61 = vsel %vm2449_vm5, %v4520_v47, 0.0 }
 0x301   : > { %v4410_v30 = vpack.c.bf16 %v3097_v28, %v3097_v28  ;;  %v3576_v0 = vsel %vm2449_vm5, %v3097_v28, 0.0  ;;  %v3656_v5 = vmul.f32 %v3097_v28, %v3097_v28  ;;  %v4521_v25 = vpop.f32.mrb[18].mxu1 }
 0x302   : > { %3467 = vst.msk [vmem:[%s6409_s4 + $0xc8] sm:$0xf] %vm3416_vm11, %v4412_v27  ;;  %v3577_v23 = vadd.f32 %v3576_v0, %v3575_v13  ;;  %v4413_v26 = vpack.c.bf16 %v4521_v25, %v4521_v25  ;;  %v3100_v21 = vpop.f32.mrb[19].mxu1  ;;  %v3659_v6 = vmul.f32 %v4521_v25, %v4521_v25  ;;  %v3582_v57 = vsel %vm2449_vm5, %v4521_v25, 0.0 }
 0x303   : > { %3465 = vst.msk [vmem:[%s6409_s4 + $0xc0] sm:$0xf] %vm3416_vm11, %v4410_v30  ;;  %v3767_v9 = vsel %vm2449_vm5, %v3656_v5, 0.0  ;;  %v4411_v41 = vpack.c.bf16 %v3100_v21, %v3100_v21  ;;  %v3578_v43 = vsel %vm2449_vm5, %v3100_v21, 0.0  ;;  %v3657_v35 = vmul.f32 %v3100_v21, %v3100_v21 }
 0x304   : > { %v3768_v49 = vadd.f32 %v3767_v9, %v3766_v31  ;;  %3468 = vst.msk [vmem:[%s6409_s4 + $0xcc] sm:$0xf] %vm3416_vm11, %v4413_v26  ;;  %v3579_v34 = vadd.f32 %v3578_v43, %v3577_v23  ;;  %v3771_v40 = vsel %vm2449_vm5, %v3658_v16, 0.0  ;;  %v3773_v39 = vsel %vm2449_vm5, %v3659_v6, 0.0 }
 0x305   : > { %3466 = vst.msk [vmem:[%s6409_s4 + $0xc4] sm:$0xf] %vm3416_vm11, %v4411_v41  ;;  %v3769_v37 = vsel %vm2449_vm5, %v3657_v35, 0.0 }
 0x306   : > { %v3581_v51 = vadd.f32 %v3580_v61, %v3579_v34  ;;  %v3770_v52 = vadd.f32 %v3769_v37, %v3768_v49 }
 0x308   : > { %v3583_v60 = vadd.f32 %v3582_v57, %v3581_v51  ;;  %v3772_v56 = vadd.f32 %v3771_v40, %v3770_v52 }
 0x30a   : > { %v3774_v15 = vadd.f32 %v3773_v39, %v3772_v56 }
 0x317   : > { %v4524_v54 = vpop.f32.mrb[20].mxu1 }
 0x318   : > { %v4416_v22 = vpack.c.bf16 %v4524_v54, %v4524_v54  ;;  %v3113_v53 = vpop.f32.mrb[21].mxu1  ;;  %v3662_v14 = vmul.f32 %v4524_v54, %v4524_v54  ;;  %v3588_v10 = vsel %vm2449_vm5, %v4524_v54, 0.0 }
 0x319   : > { %v4414_v45 = vpack.c.bf16 %v3113_v53, %v3113_v53  ;;  %v3584_v63 = vsel %vm2449_vm5, %v3113_v53, 0.0  ;;  %v3660_v24 = vmul.f32 %v3113_v53, %v3113_v53  ;;  %v4525_v8 = vpop.f32.mrb[22].mxu1 }
 0x31a   : > { %3471 = vst.msk [vmem:[%s6409_s4 + $0xd8] sm:$0xf] %vm3416_vm11, %v4416_v22  ;;  %v3585_v38 = vadd.f32 %v3584_v63, %v3583_v60  ;;  %v4417_v4 = vpack.c.bf16 %v4525_v8, %v4525_v8  ;;  %v3116_v18 = vpop.f32.mrb[23].mxu1  ;;  %v3663_v44 = vmul.f32 %v4525_v8, %v4525_v8  ;;  %v3590_v58 = vsel %vm2449_vm5, %v4525_v8, 0.0 }
 0x31b   : > { %3469 = vst.msk [vmem:[%s6409_s4 + $0xd0] sm:$0xf] %vm3416_vm11, %v4414_v45  ;;  %v3775_v46 = vsel %vm2449_vm5, %v3660_v24, 0.0  ;;  %v4415_v62 = vpack.c.bf16 %v3116_v18, %v3116_v18  ;;  %v3586_v50 = vsel %vm2449_vm5, %v3116_v18, 0.0  ;;  %v3661_v7 = vmul.f32 %v3116_v18, %v3116_v18 }
 0x31c   : > { %v3776_v36 = vadd.f32 %v3775_v46, %v3774_v15  ;;  %3472 = vst.msk [vmem:[%s6409_s4 + $0xdc] sm:$0xf] %vm3416_vm11, %v4417_v4  ;;  %v3587_v59 = vadd.f32 %v3586_v50, %v3585_v38  ;;  %v3779_v32 = vsel %vm2449_vm5, %v3662_v14, 0.0  ;;  %v3781_v20 = vsel %vm2449_vm5, %v3663_v44, 0.0 }
 0x31d   : > { %3470 = vst.msk [vmem:[%s6409_s4 + $0xd4] sm:$0xf] %vm3416_vm11, %v4415_v62  ;;  %v3777_v29 = vsel %vm2449_vm5, %v3661_v7, 0.0 }
 0x31e   : > { %v3589_v42 = vadd.f32 %v3588_v10, %v3587_v59  ;;  %v3778_v33 = vadd.f32 %v3777_v29, %v3776_v36  ;;  %v5017_v29 = vmov (!%p4349_p10), 0.0  }
 0x31f   : > { %3803 = vst.msk [vmem:[%s734_s8] sm:$0xff] (!%p4349_p10), %vm2449_vm5, %v5017_v29  ;;  %3804 = vst.msk [vmem:[%s6849_s0] sm:$0xff] (!%p4349_p10), %vm2449_vm5, %v5017_v29 }
 0x320   : > { %v3591_v17 = vadd.f32 %v3590_v58, %v3589_v42  ;;  %v3780_v19 = vadd.f32 %v3779_v32, %v3778_v33 }
 0x322   : > { %v3782_v11 = vadd.f32 %v3781_v20, %v3780_v19 }
 0x32f   : > { %v4528_v55 = vpop.f32.mrb[24].mxu1 }
 0x330   : > { %v4420_v2 = vpack.c.bf16 %v4528_v55, %v4528_v55  ;;  %v3129_v48 = vpop.f32.mrb[25].mxu1  ;;  %v3666_v5 = vmul.f32 %v4528_v55, %v4528_v55  ;;  %v3596_v21 = vsel %vm2449_vm5, %v4528_v55, 0.0 }
 0x331   : > { %v4418_v3 = vpack.c.bf16 %v3129_v48, %v3129_v48  ;;  %v3592_v13 = vsel %vm2449_vm5, %v3129_v48, 0.0  ;;  %v3664_v1 = vmul.f32 %v3129_v48, %v3129_v48  ;;  %v4529_v12 = vpop.f32.mrb[26].mxu1 }
 0x332   : > { %3475 = vst.msk [vmem:[%s6409_s4 + $0xe8] sm:$0xf] %vm3416_vm11, %v4420_v2  ;;  %v3593_v31 = vadd.f32 %v3592_v13, %v3591_v17  ;;  %v4421_v47 = vpack.c.bf16 %v4529_v12, %v4529_v12  ;;  %v3132_v27 = vpop.f32.mrb[27].mxu1  ;;  %v3667_v9 = vmul.f32 %v4529_v12, %v4529_v12  ;;  %v3598_v16 = vsel %vm2449_vm5, %v4529_v12, 0.0 }
 0x333   : > { %3473 = vst.msk [vmem:[%s6409_s4 + $0xe0] sm:$0xf] %vm3416_vm11, %v4418_v3  ;;  %v3783_v28 = vsel %vm2449_vm5, %v3664_v1, 0.0  ;;  %v4419_v30 = vpack.c.bf16 %v3132_v27, %v3132_v27  ;;  %v3594_v0 = vsel %vm2449_vm5, %v3132_v27, 0.0  ;;  %v3665_v26 = vmul.f32 %v3132_v27, %v3132_v27 }
 0x334   : > { %v3784_v25 = vadd.f32 %v3783_v28, %v3782_v11  ;;  %3476 = vst.msk [vmem:[%s6409_s4 + $0xec] sm:$0xf] %vm3416_vm11, %v4421_v47  ;;  %v3595_v23 = vadd.f32 %v3594_v0, %v3593_v31  ;;  %v3787_v34 = vsel %vm2449_vm5, %v3666_v5, 0.0  ;;  %v3789_v6 = vsel %vm2449_vm5, %v3667_v9, 0.0 }
 0x335   : > { %3474 = vst.msk [vmem:[%s6409_s4 + $0xe4] sm:$0xf] %vm3416_vm11, %v4419_v30  ;;  %v3785_v43 = vsel %vm2449_vm5, %v3665_v26, 0.0 }
 0x336   : > { %v3597_v41 = vadd.f32 %v3596_v21, %v3595_v23  ;;  %v3786_v49 = vadd.f32 %v3785_v43, %v3784_v25 }
 0x338   : > { %v3599_v35 = vadd.f32 %v3598_v16, %v3597_v41  ;;  %v3788_v61 = vadd.f32 %v3787_v34, %v3786_v49 }
 0x33a   : > { %v3790_v51 = vadd.f32 %v3789_v6, %v3788_v61 }
 0x347   : > { %v4532_v37 = vpop.f32.mrb[28].mxu1 }
 0x348   : > { %v4424_v57 = vpack.c.bf16 %v4532_v37, %v4532_v37  ;;  %v3145_v52 = vpop.f32.mrb[29].mxu1  ;;  %v3670_v24 = vmul.f32 %v4532_v37, %v4532_v37  ;;  %v3604_v18 = vsel %vm2449_vm5, %v4532_v37, 0.0 }
 0x349   : > { %v4422_v40 = vpack.c.bf16 %v3145_v52, %v3145_v52  ;;  %v3600_v60 = vsel %vm2449_vm5, %v3145_v52, 0.0  ;;  %v3668_v56 = vmul.f32 %v3145_v52, %v3145_v52  ;;  %v4533_v39 = vpop.f32.mrb[30].mxu1 }
 0x34a   : > { %3479 = vst.msk [vmem:[%s6409_s4 + $0xf8] sm:$0xf] %vm3416_vm11, %v4424_v57  ;;  %v3601_v15 = vadd.f32 %v3600_v60, %v3599_v35  ;;  %v4425_v54 = vpack.c.bf16 %v4533_v39, %v4533_v39  ;;  %v3148_v22 = vpop.f32.mrb[31].mxu1  ;;  %v3671_v46 = vmul.f32 %v4533_v39, %v4533_v39  ;;  %v3606_v14 = vsel %vm2449_vm5, %v4533_v39, 0.0 }
 0x34b   : > { %3477 = vst.msk [vmem:[%s6409_s4 + $0xf0] sm:$0xf] %vm3416_vm11, %v4422_v40  ;;  %v3791_v53 = vsel %vm2449_vm5, %v3668_v56, 0.0  ;;  %v4423_v45 = vpack.c.bf16 %v3148_v22, %v3148_v22  ;;  %v3602_v63 = vsel %vm2449_vm5, %v3148_v22, 0.0  ;;  %v3669_v4 = vmul.f32 %v3148_v22, %v3148_v22 }
 0x34c   : > { %v3792_v8 = vadd.f32 %v3791_v53, %v3790_v51  ;;  %3480 = vst.msk [vmem:[%s6409_s4 + $0xfc] sm:$0xf] %vm3416_vm11, %v4425_v54  ;;  %v3603_v38 = vadd.f32 %v3602_v63, %v3601_v15  ;;  %v3795_v59 = vsel %vm2449_vm5, %v3670_v24, 0.0  ;;  %v3797_v44 = vsel %vm2449_vm5, %v3671_v46, 0.0  ;;  %3802 = sbr.rel (%p4349_p10) target bundleno = 851 (0x353), region = 139 }
 0x34d   : > { %3478 = vst.msk [vmem:[%s6409_s4 + $0xf4] sm:$0xf] %vm3416_vm11, %v4423_v45  ;;  %v3793_v50 = vsel %vm2449_vm5, %v3669_v4, 0.0 }
 0x34e   : > { %v3605_v62 = vadd.f32 %v3604_v18, %v3603_v38  ;;  %v3794_v36 = vadd.f32 %v3793_v50, %v3792_v8 }
 0x350   : > { %v3607_v7 = vadd.f32 %v3606_v14, %v3605_v62  ;;  %v3796_v10 = vadd.f32 %v3795_v59, %v3794_v36 }
 0x352   : > { %v3798_v42 = vadd.f32 %v3797_v44, %v3796_v10 }
 0x353 PF: > { %v3805_v58 = vld [vmem:[%s734_s8] sm:$0xff]  ;;  %v3808_v33 = vld [vmem:[%s6849_s0] sm:$0xff]  ;;  %s4352_s3 = sshll.u32 %s4981_s26, 7  ;;  %s6991_s20 = sld [smem:[#allocation20_spill]] }
 0x354   : > { %v3806_v32 = vadd.f32 %v3805_v58, %v3607_v7  ;;  %v3809_v17 = vadd.f32 %v3808_v33, %v3798_v42  ;;  %s3843_s9 = sshll.u32 %s734_s8, 4  ;;  %s6993_s26 = sld [smem:[#allocation21_spill]]  ;;  %s6862_s9 = int_to_ptr.vmem [resolvable:$true] %s3843_s9 }
 0x355   : > { %s3856_s21 = sshll.u32 %s6849_s0, 4  ;;  %s3821_s16 = scalar_lea.sflag [#allocation5], %s5429_s14  ;;  %s3857_s21 = int_to_ptr.vmem [resolvable:$true] %s3856_s21 }
 0x356   : > { %3807 = vst.msk [vmem:[%s734_s8] sm:$0xff] %vm2449_vm5, %v3806_v32  ;;  %3810 = vst.msk [vmem:[%s6849_s0] sm:$0xff] %vm2449_vm5, %v3809_v17  ;;  %s4798_s17 = scalar_lea.vmem %s6862_s9, 128  ;;  %s5018_s13 = smov [#allocation4]  }
 0x357   : > { %p4799_p11 = scmp.ne.s32.totalorder %s6862_s9, %s4798_s17  ;;  %s4802_s15 = sshll.u32 %s5018_s13, 4  ;;  %s4803_s15 = int_to_ptr.vmem [resolvable:$false] %s4802_s15 }
 0x358   : > { %s4804_s4 = scalar_lea.vmem %s4803_s15, 256  ;;  %p4805_p2 = scmp.lt.s32.totalorder %s6862_s9, %s4803_s15 }
 0x359   : > { %s6992_s12 = smov %s6991_s20  ;;  %s6860_s23 = scalar_lea.hbm %s6991_s20, %s4352_s3 }
 0x35a   : > { %s6994_s11 = smov %s6993_s26  ;;  %s6870_s10 = scalar_lea.hbm %s6993_s26, %s4352_s3 }
 0x35b   : > { %p4800_p12 = pnand %p4799_p11, %p5165_p0  ;;  %p4806_p3 = scmp.lt.s32.totalorder %s4804_s4, %s4798_s17 }
 0x35d   : > { %p4801_p13 = pneg %p4800_p12  ;;  %p4807_p4 = por %p4806_p3, %p4805_p2 }
 0x35f   : > { %p4808_p5 = pnand %p4807_p4, %p4801_p13 }
 0x361   : > { %4811 = shalt.err (!%p4808_p5)
}
 0x362   : > { %s4812_s24 = scalar_lea.hbm %s6860_s23, 128  ;;  %s4816_s25 = scalar_lea.hbm %s6992_s12, 256 }
 0x363   : > { %p4813_p6 = scmp.ne.s32.totalorder %s6860_s23, %s4812_s24  ;;  %p4817_p9 = scmp.lt.u32.totalorder %s6860_s23, %s6992_s12 }
 0x364   : > { %p4818_p10 = scmp.lt.u32.totalorder %s4816_s25, %s4812_s24  ;;  %p4820_p12 = scmp.lt.u32.totalorder %s4812_s24, %s6860_s23 }
 0x365   : > { %p4814_p7 = pnand %p4813_p6, %p5165_p0 }
 0x366   : > { %p4819_p11 = por %p4818_p10, %p4817_p9 }
 0x367   : > { %p4815_p8 = pneg %p4814_p7 }
 0x368   : > { %p4821_p13 = por %p4820_p12, %p4819_p11 }
 0x36a   : > { %p4822_p2 = pnand %p4821_p13, %p4815_p8 }
 0x36c   : > { %4825 = shalt.err (!%p4822_p2)
}
 0x36d   : > { %4545 = dma.vmem_to_hbm [thread:$0]  (%p5165_p0), %s6862_s9, 128, %s6860_s23, %s3821_s16  }
 0x36e   : > { %s3826_s7 = scalar_lea.sflag [#allocation7], %s5429_s14  ;;  %s4826_s30 = scalar_lea.vmem %s3857_s21, 128 }
 0x36f   : > { %p4827_p3 = scmp.ne.s32.totalorder %s3857_s21, %s4826_s30  ;;  %s5019_s26 = smov [#allocation6]  }
 0x370   : > { %s4830_s17 = sshll.u32 %s5019_s26, 4  ;;  %s4831_s17 = int_to_ptr.vmem [resolvable:$false] %s4830_s17 }
 0x371   : > { %p4828_p4 = pnand %p4827_p3, %p5165_p0  ;;  %s4832_s13 = scalar_lea.vmem %s4831_s17, 256 }
 0x372   : > { %p4833_p6 = scmp.lt.s32.totalorder %s3857_s21, %s4831_s17  ;;  %p4834_p7 = scmp.lt.s32.totalorder %s4832_s13, %s4826_s30 }
 0x373   : > { %p4829_p5 = pneg %p4828_p4 }
 0x374   : > { %p4835_p8 = por %p4834_p7, %p4833_p6 }
 0x376   : > { %p4836_p9 = pnand %p4835_p8, %p4829_p5 }
 0x378   : > { %4839 = shalt.err (!%p4836_p9)
}
 0x379   : > { %s4840_s14 = scalar_lea.hbm %s6870_s10, 128  ;;  %s4844_s9 = scalar_lea.hbm %s6994_s11, 256 }
 0x37a   : > { %p4841_p10 = scmp.ne.s32.totalorder %s6870_s10, %s4840_s14  ;;  %p4845_p13 = scmp.lt.u32.totalorder %s6870_s10, %s6994_s11 }
 0x37b   : > { %p4846_p2 = scmp.lt.u32.totalorder %s4844_s9, %s4840_s14  ;;  %p4848_p4 = scmp.lt.u32.totalorder %s4840_s14, %s6870_s10 }
 0x37c   : > { %p4842_p11 = pnand %p4841_p10, %p5165_p0 }
 0x37d   : > { %p4847_p3 = por %p4846_p2, %p4845_p13 }
 0x37e   : > { %p4843_p12 = pneg %p4842_p11 }
 0x37f   : > { %p4849_p5 = por %p4848_p4, %p4847_p3 }
 0x381   : > { %p4850_p6 = pnand %p4849_p5, %p4843_p12 }
 0x383   : > { %4853 = shalt.err (!%p4850_p6)
}
 0x384   : > { %4546 = dma.vmem_to_hbm [thread:$0]  (%p5165_p0), %s3857_s21, 128, %s6870_s10, %s3826_s7  }
 0x385 PF: > { %p4556_p7 = scmp.ge.s32.totalorder %s4993_s29, 2  ;;  %s3880_s4 = sand.u32 1, %s4949_s18  }
 0x386   : > { %s3881_s24 = scalar_lea.sflag [#allocation5], %s3880_s4 }
 0x387   : > { %p4550_p8 = pnand %p4556_p7, %p5169_p1 }
 0x389   : > { %4936 = dma.done.wait (!%p4550_p8), %s3881_s24, 128  }
 0x38a   : > { %4938 = vsyncadd (!%p4550_p8), %s3881_s24, 4294967168  ;;  %s3890_s8 = scalar_lea.sflag [#allocation7], %s3880_s4 }
 0x38b   : > { %4940 = dma.done.wait (!%p4550_p8), %s3890_s8, 128  }
 0x38c   : > { %4942 = vsyncadd (!%p4550_p8), %s3890_s8, 4294967168  ;;  %s22_s29 = sadd.s32 1, %s4993_s29   ;;  %s6995_s27 = sld [smem:[#allocation10_spill]] }
 0x38d   : > { %p19_p9 = scmp.ge.s32.totalorder %s22_s29, 6   ;;  %s6996_s20 = sld [smem:[#allocation17_spill]] }
 0x38e   : > { %s6997_s10 = sld [smem:[#allocation16_spill]]  ;;  %s6998_s23 = sld [smem:[#allocation11_spill]] }
 0x38f   : > { %s6999_s24 = sld [smem:[#allocation15_spill]]  ;;  %s7000_s25 = sld [smem:[#allocation12_spill]] }
 0x390   : > { %s7001_s6 = sld [smem:[#allocation13_spill]]  ;;  %s7002_s3 = sld [smem:[#allocation14_spill]] }
 0x391   : > { %s7003_s18 = smov %s4953_s19  ;;  %s7005_s21 = smov %s4965_s22 }
 0x392   : > { %s7004_s19 = smov %s6995_s27  ;;  %s7007_s26 = smov %s4989_s28 }
 0x393   :  { %21 = sbr.rel (!%p19_p9) target bundleno = 14 (0xe), region = 254 }
 0x394   : > { %s7006_s22 = smov %s6997_s10 }
 0x396   : > { %s7008_s27 = smov %s7001_s6  ;;  %s7009_s28 = smov %s7002_s3 }
 0x39a   :  { %3895 = vsyncpa [#allocation5], 1 }
 0x39b   :  { %3897 = vsyncpa [#allocation5 + $0x1], 1 }
 0x39c   :  { %3898 = vsyncpa [#allocation7], 1 }
 0x39d   :  { %3900 = vsyncpa [#allocation7 + $0x1], 1 }

</bundles_post_ra>
